<compile_context>
chip_gen: v7x
topology: tpu7x:2x2x1
jax: 0.10.0
libtpu: 0.0.40
codegen_flags: <defaults>
</compile_context>

<pallas_src>
import jax
import jax.numpy as jnp
from jax import lax
from jax.experimental import pallas as pl
from jax.experimental.pallas import tpu as pltpu


_DN_T = (((0,), (0,)), ((), ()))  # contract lhs dim 0 with rhs dim 0 (folds the L2DST transpose)


# ------------------------------ Pallas kernel --------------------------------

def reslst_fused_kernel(x_ref,
                        w1a_ref, b1a_ref, w1b_ref, b1b_ref,
                        w2a_ref, b2a_ref, w2b_ref, b2b_ref,
                        w3a_ref, b3a_ref, w3b_ref, b3b_ref,
                        wo_ref, bo_ref,
                        out_ref, a1_scr, s_scr, s_flat):
    """One grid step == TB batch elements: 3 L2DST blocks + residual + fused W_o head."""
    TB, C_pad = out_ref.shape
    TBS, _ = x_ref.shape
    S = TBS // TB
    H = s_scr.shape[1]
    f32, bf16 = jnp.float32, jnp.bfloat16

    # Hoisted weight/bias reads (weights bf16 for the MXU, biases f32 for the VPU path).
    w1b, b1b = w1b_ref[...], b1b_ref[...]
    w2a, b2a = w2a_ref[...], b2a_ref[...]
    w2b, b2b = w2b_ref[...], b2b_ref[...]
    w3a, b3a = w3a_ref[...], b3a_ref[...]
    w3b, b3b = w3b_ref[...], b3b_ref[...]

    # ---- Stage 1 (L2DST_1.dense1) batched over all TB*S rows: one MXU matmul ----
    a1 = jnp.tanh(jnp.dot(x_ref[...], w1a_ref[...], preferred_element_type=f32)
                  + b1a_ref[...])                              # (TB*S, I) f32
    a1_scr[...] = a1.astype(bf16)

    def dot0(a, w):
        # contract lhs dim 0 with rhs dim 0: "transpose, then matmul" without moving data
        return lax.dot_general(a, w, dimension_numbers=_DN_T, preferred_element_type=f32)

    # ---- Stages 1b..3b: per-batch-element 32x32 contractions (bounded unroll) ----
    for b in range(TB):
        a1b = a1_scr[pl.ds(b * S, S), :]                       # (S, I)  bf16
        t1 = jnp.tanh(dot0(a1b, w1b) + b1b)                    # (I, I)  == o1^T
        a2 = jnp.tanh(dot0(t1.astype(bf16), w2a) + b2a)        # (I, I)
        t2 = jnp.tanh(dot0(a2.astype(bf16), w2b) + b2b)        # (I, H)  == o2^T
        a3 = jnp.tanh(dot0(t2.astype(bf16), w3a) + b3a)        # (H, H)
        t3 = jnp.tanh(dot0(a3.astype(bf16), w3b) + b3b)        # (H, H)  == o3^T
        s_scr[b] = t1 + t3                                     # (o1 + o3)^T, f32

    # ---- Flatten (TB, H, H) -> (TB, H*H) lanes: H independent copies, no MXU ----
    for q in range(H):
        s_flat[:, q * H:(q + 1) * H] = s_scr[:, q, :]

    # ---- Fused classifier head: ONE (TB, H*H) x (H*H, C_pad) matmul + log_softmax ----
    logits = jnp.dot(s_flat[...].astype(bf16), wo_ref[...],
                     preferred_element_type=f32) + bo_ref[...]   # padded classes at -1e30
    m = jnp.max(logits, axis=1, keepdims=True)
    z = jnp.exp(logits - m)
    out_ref[...] = logits - (m + jnp.log(jnp.sum(z, axis=1, keepdims=True)))


# -------------------------------- wrapper -------------------------------------

def _tensorcores_per_chip():
    """Chips whose Pallas 'parallel' grid axes shard across >1 TensorCore."""
    try:
        kind = jax.devices()[0].device_kind.lower()
    except Exception:
        return 1
    return 2 if any(t in kind for t in ("v7", "v5p", "v4")) else 1


def _pick_tb(B, num_cores, max_tb=8):
    """Largest batch block that keeps sublane-aligned output blocks and >= num_cores grid steps."""
    divs = [t for t in range(1, min(B, max_tb) + 1) if B % t == 0]
    aligned = [t for t in divs if t % 8 == 0 or t == B]
    for cands in ([t for t in aligned if B // t >= num_cores],
                  aligned,
                  ([B] if B <= 4 * max_tb else []),
                  divs):
        if cands:
            return max(cands)
    return 1


def reslst_forward(x, params):
    B, S, D = x.shape
    I = params["w1a"].shape[1]
    H = params["w3b"].shape[1]
    C = params["wo"].shape[1]
    # The module's residual (o3 + o1) and W_o(H*H) silently require H == I.
    assert H == I, "ResLST residual requires hidden_size == input_size"
    assert params["wo"].shape[0] == H * H

    num_cores = _tensorcores_per_chip()
    TB = _pick_tb(B, num_cores)
    grid = (B // TB,)
    C_pad = ((C + 127) // 128) * 128          # lane-dense, unmasked final stores

    bf16, f32 = jnp.bfloat16, jnp.float32

    # bf16 MXU operands (f32 accumulation in-kernel); biases stay f32.
    names = ("w1a", "b1a", "w1b", "b1b", "w2a", "b2a", "w2b", "b2b",
             "w3a", "b3a", "w3b", "b3b")
    w_args = [params[k].astype(bf16) if k.startswith("w") else params[k].astype(f32)
              for k in names]

    # W_o: fold the kernel's q-major flatten into the weight (see header derivation),
    # pad classes to a full 128-lane tile (zero weights, -1e30 bias on padded classes).
    wo_flat = params["wo"].reshape(H, H, C).transpose(1, 0, 2).reshape(H * H, C)
    wo_flat = jnp.pad(wo_flat, ((0, 0), (0, C_pad - C))).astype(bf16)
    bo_pad = jnp.concatenate(
        [params["bo"].astype(f32), jnp.full((1, C_pad - C), -1e30, f32)], axis=1)

    # x pre-reshaped host-side to (B*S, D) so stage 1 is a single batched matmul.
    x2 = x.astype(bf16).reshape(B * S, D)

    in_specs = [pl.BlockSpec((TB * S, D), lambda g: (g, 0))]
    for v in w_args + [wo_flat, bo_pad]:
        # whole-array blocks with constant index maps -> DMA'd once across the grid
        in_specs.append(pl.BlockSpec(v.shape, lambda g, _nd=v.ndim: (0,) * _nd))

    # Tight VMEM budget (review: v7x only has 64 MiB physical); comfortably above the
    # ~0.7 MiB actually needed, far below the old 32 MiB floor.
    def _nbytes(a):
        return int(a.size) * a.dtype.itemsize
    est = (2 * (TB * S * D * 2 + TB * C_pad * 4
                + sum(_nbytes(a) for a in w_args) + _nbytes(wo_flat) + _nbytes(bo_pad))
           + TB * S * I * 2 + 2 * TB * H * H * 4)
    vmem_limit = int(max(8 * 1024 * 1024, 4 * est))

    out_full = pl.pallas_call(
        reslst_fused_kernel,
        out_shape=jax.ShapeDtypeStruct((B, C_pad), f32),
        grid=grid,
        in_specs=in_specs,
        out_specs=pl.BlockSpec((TB, C_pad), lambda g: (g, 0)),
        scratch_shapes=[pltpu.VMEM((TB * S, I), bf16),     # stage-1 activations
                        pltpu.VMEM((TB, H, H), f32),       # (o1 + o3)^T per batch element
                        pltpu.VMEM((TB, H * H), f32)],     # lane-flattened residual for the head
        compiler_params=pltpu.CompilerParams(
            dimension_semantics=("parallel",),
            vmem_limit_bytes=vmem_limit),
    )(x2, *w_args, wo_flat, bo_pad)

    return out_full[:, :C]                    # drop class padding -> (B, C) log-probs


# ------------------------- deterministic parameters --------------------------

def init_params(key, S, D, input_size, hidden_size, num_classes):
    I, H, C = input_size, hidden_size, num_classes
    keys = jax.random.split(key, 14)

    def lin(k, fan_in, fan_out):
        bound = 1.0 / jnp.sqrt(fan_in)
        kw, kb = jax.random.split(k)
        w = jax.random.uniform(kw, (fan_in, fan_out), jnp.float32, -bound, bound)
        b = jax.random.uniform(kb, (1, fan_out), jnp.float32, -bound, bound)
        return w, b

    p = {}
    # L2DST_1 = L2DST(I, I): dense1 in=D, dense2 in=S
    p["w1a"], p["b1a"] = lin(keys[0], D, I)
    p["w1b"], p["b1b"] = lin(keys[1], S, I)
    # L2DST_2 = L2DST(I, H): dense1 in=I, dense2 in=I
    p["w2a"], p["b2a"] = lin(keys[2], I, I)
    p["w2b"], p["b2b"] = lin(keys[3], I, H)
    # L2DST_3 = L2DST(H, H): dense1 in=I, dense2 in=H
    p["w3a"], p["b3a"] = lin(keys[4], I, H)
    p["w3b"], p["b3b"] = lin(keys[5], H, H)
    # W_o: xavier-uniform weight (as in the module), uniform bias
    fan_in, fan_out = H * H, C
    gain = jnp.sqrt(6.0 / (fan_in + fan_out))
    p["wo"] = jax.random.uniform(keys[6], (fan_in, fan_out), jnp.float32, -gain, gain)
    p["bo"] = jax.random.uniform(keys[7], (1, fan_out), jnp.float32,
                                 -1.0 / jnp.sqrt(fan_in), 1.0 / jnp.sqrt(fan_in))
    return p


# -------------------------------- reference -----------------------------------
# Pure-JAX reference with the SAME bf16 quantization points as the kernel
# (bf16 MXU operands, f32 accumulation, f32 tanh/bias/softmax).

def _l2dst_ref(x, w1, b1, w2, b2):
    bf16, f32 = jnp.bfloat16, jnp.float32
    a = jnp.tanh(jnp.dot(x.astype(bf16), w1.astype(bf16),
                         preferred_element_type=f32) + b1)
    aT = jnp.swapaxes(a, -1, -2)
    t = jnp.tanh(jnp.dot(aT.astype(bf16), w2.astype(bf16),
                         preferred_element_type=f32) + b2)
    return jnp.swapaxes(t, -1, -2)


def reslst_ref(x, p):
    bf16, f32 = jnp.bfloat16, jnp.float32
    xb = x.astype(bf16)
    o1 = _l2dst_ref(xb, p["w1a"], p["b1a"], p["w1b"], p["b1b"])
    o2 = _l2dst_ref(o1, p["w2a"], p["b2a"], p["w2b"], p["b2b"])
    o3 = _l2dst_ref(o2, p["w3a"], p["b3a"], p["w3b"], p["b3b"])
    out = (o3 + o1).reshape(x.shape[0], -1)
    logits = jnp.dot(out.astype(bf16), p["wo"].astype(bf16),
                     preferred_element_type=f32) + p["bo"]
    return jax.nn.log_softmax(logits, axis=1)


# ---------------------------------- main ---------------------------------------

if __name__ == "__main__":
    # Small shapes consistent with the module; residual implies input_size == hidden_size.
    B, S, D = 16, 8, 16
    input_size = hidden_size = 32
    num_classes = 10

    key = jax.random.PRNGKey(0)
    kx, kp = jax.random.split(key)
    x = jax.random.normal(kx, (B, S, D), jnp.float32)
    params = init_params(kp, S, D, input_size, hidden_size, num_classes)

    out = reslst_forward(x, params)
    out = jax.block_until_ready(out)

    ref = reslst_ref(x, params)
    assert out.shape == (B, num_classes), out.shape
    max_err = jnp.max(jnp.abs(out - ref))
    assert jnp.allclose(out, ref, atol=2e-3, rtol=2e-3), f"max abs err {max_err}"

    print("KERNEL_OK")
</pallas_src>

<mosaic_0001>
module attributes {stable_mosaic.version = 11 : i64} {
  func.func @reslst_fused_kernel(%arg0: i32, %arg1: memref<64x16xbf16, #tpu.memory_space<vmem>>, %arg2: memref<16x32xbf16, #tpu.memory_space<vmem>>, %arg3: memref<1x32xf32, #tpu.memory_space<vmem>>, %arg4: memref<8x32xbf16, #tpu.memory_space<vmem>>, %arg5: memref<1x32xf32, #tpu.memory_space<vmem>>, %arg6: memref<32x32xbf16, #tpu.memory_space<vmem>>, %arg7: memref<1x32xf32, #tpu.memory_space<vmem>>, %arg8: memref<32x32xbf16, #tpu.memory_space<vmem>>, %arg9: memref<1x32xf32, #tpu.memory_space<vmem>>, %arg10: memref<32x32xbf16, #tpu.memory_space<vmem>>, %arg11: memref<1x32xf32, #tpu.memory_space<vmem>>, %arg12: memref<32x32xbf16, #tpu.memory_space<vmem>>, %arg13: memref<1x32xf32, #tpu.memory_space<vmem>>, %arg14: memref<1024x128xbf16, #tpu.memory_space<vmem>>, %arg15: memref<1x128xf32, #tpu.memory_space<vmem>>, %arg16: memref<8x128xf32, #tpu.memory_space<vmem>>, %arg17: memref<64x32xbf16, #tpu.memory_space<vmem>>, %arg18: memref<8x32x32xf32, #tpu.memory_space<vmem>>, %arg19: memref<8x1024xf32, #tpu.memory_space<vmem>>) attributes {dimension_semantics = [#tpu.dimension_semantics<parallel>], iteration_bounds = array<i64: 2>, scalar_prefetch = 0 : i64, scratch_operands = 3 : i64, tpu.core_type = #tpu.core_type<tc>, window_params = [{transform_indices = @transform_0, window_bounds = array<i64: 64, 16>}, {pipeline_mode = #tpu.pipeline_mode<synchronous>, transform_indices = @transform_1, window_bounds = array<i64: 16, 32>}, {pipeline_mode = #tpu.pipeline_mode<synchronous>, transform_indices = @transform_2, window_bounds = array<i64: 1, 32>}, {pipeline_mode = #tpu.pipeline_mode<synchronous>, transform_indices = @transform_3, window_bounds = array<i64: 8, 32>}, {pipeline_mode = #tpu.pipeline_mode<synchronous>, transform_indices = @transform_4, window_bounds = array<i64: 1, 32>}, {pipeline_mode = #tpu.pipeline_mode<synchronous>, transform_indices = @transform_5, window_bounds = array<i64: 32, 32>}, {pipeline_mode = #tpu.pipeline_mode<synchronous>, transform_indices = @transform_6, window_bounds = array<i64: 1, 32>}, {pipeline_mode = #tpu.pipeline_mode<synchronous>, transform_indices = @transform_7, window_bounds = array<i64: 32, 32>}, {pipeline_mode = #tpu.pipeline_mode<synchronous>, transform_indices = @transform_8, window_bounds = array<i64: 1, 32>}, {pipeline_mode = #tpu.pipeline_mode<synchronous>, transform_indices = @transform_9, window_bounds = array<i64: 32, 32>}, {pipeline_mode = #tpu.pipeline_mode<synchronous>, transform_indices = @transform_10, window_bounds = array<i64: 1, 32>}, {pipeline_mode = #tpu.pipeline_mode<synchronous>, transform_indices = @transform_11, window_bounds = array<i64: 32, 32>}, {pipeline_mode = #tpu.pipeline_mode<synchronous>, transform_indices = @transform_12, window_bounds = array<i64: 1, 32>}, {pipeline_mode = #tpu.pipeline_mode<synchronous>, transform_indices = @transform_13, window_bounds = array<i64: 1024, 128>}, {pipeline_mode = #tpu.pipeline_mode<synchronous>, transform_indices = @transform_14, window_bounds = array<i64: 1, 128>}, {transform_indices = @transform_15, window_bounds = array<i64: 8, 128>}]} {
    %c0 = arith.constant 0 : index
    %c0_0 = arith.constant 0 : index
    %0 = vector.load %arg4[%c0, %c0_0] : memref<8x32xbf16, #tpu.memory_space<vmem>>, vector<8x32xbf16>
    %c0_1 = arith.constant 0 : index
    %c0_2 = arith.constant 0 : index
    %1 = vector.load %arg5[%c0_1, %c0_2] : memref<1x32xf32, #tpu.memory_space<vmem>>, vector<1x32xf32>
    %c0_3 = arith.constant 0 : index
    %c0_4 = arith.constant 0 : index
    %2 = vector.load %arg6[%c0_3, %c0_4] : memref<32x32xbf16, #tpu.memory_space<vmem>>, vector<32x32xbf16>
    %c0_5 = arith.constant 0 : index
    %c0_6 = arith.constant 0 : index
    %3 = vector.load %arg7[%c0_5, %c0_6] : memref<1x32xf32, #tpu.memory_space<vmem>>, vector<1x32xf32>
    %c0_7 = arith.constant 0 : index
    %c0_8 = arith.constant 0 : index
    %4 = vector.load %arg8[%c0_7, %c0_8] : memref<32x32xbf16, #tpu.memory_space<vmem>>, vector<32x32xbf16>
    %c0_9 = arith.constant 0 : index
    %c0_10 = arith.constant 0 : index
    %5 = vector.load %arg9[%c0_9, %c0_10] : memref<1x32xf32, #tpu.memory_space<vmem>>, vector<1x32xf32>
    %c0_11 = arith.constant 0 : index
    %c0_12 = arith.constant 0 : index
    %6 = vector.load %arg10[%c0_11, %c0_12] : memref<32x32xbf16, #tpu.memory_space<vmem>>, vector<32x32xbf16>
    %c0_13 = arith.constant 0 : index
    %c0_14 = arith.constant 0 : index
    %7 = vector.load %arg11[%c0_13, %c0_14] : memref<1x32xf32, #tpu.memory_space<vmem>>, vector<1x32xf32>
    %c0_15 = arith.constant 0 : index
    %c0_16 = arith.constant 0 : index
    %8 = vector.load %arg12[%c0_15, %c0_16] : memref<32x32xbf16, #tpu.memory_space<vmem>>, vector<32x32xbf16>
    %c0_17 = arith.constant 0 : index
    %c0_18 = arith.constant 0 : index
    %9 = vector.load %arg13[%c0_17, %c0_18] : memref<1x32xf32, #tpu.memory_space<vmem>>, vector<1x32xf32>
    %c0_19 = arith.constant 0 : index
    %c0_20 = arith.constant 0 : index
    %10 = vector.load %arg1[%c0_19, %c0_20] : memref<64x16xbf16, #tpu.memory_space<vmem>>, vector<64x16xbf16>
    %c0_21 = arith.constant 0 : index
    %c0_22 = arith.constant 0 : index
    %11 = vector.load %arg2[%c0_21, %c0_22] : memref<16x32xbf16, #tpu.memory_space<vmem>>, vector<16x32xbf16>
    %cst = arith.constant dense<0.000000e+00> : vector<64x32xf32>
    %12 = tpu.matmul %10, %11, %cst {dimension_numbers = #tpu.dot_dimension_numbers<[1], [0], [0], [1], [0, 0, 1, 1], [], []>} : vector<64x16xbf16>, vector<16x32xbf16>, vector<64x32xf32> -> vector<64x32xf32>
    %c0_23 = arith.constant 0 : index
    %c0_24 = arith.constant 0 : index
    %13 = vector.load %arg3[%c0_23, %c0_24] : memref<1x32xf32, #tpu.memory_space<vmem>>, vector<1x32xf32>
    %14 = vector.broadcast %13 : vector<1x32xf32> to vector<64x32xf32>
    %15 = arith.addf %12, %14 : vector<64x32xf32>
    %16 = math.tanh %15 : vector<64x32xf32>
    %17 = arith.truncf %16 : vector<64x32xf32> to vector<64x32xbf16>
    %c0_25 = arith.constant 0 : index
    %c0_26 = arith.constant 0 : index
    %18 = vector.load %arg17[%c0_25, %c0_26] : memref<64x32xbf16, #tpu.memory_space<vmem>>, vector<64x32xbf16>
    tpu.vector_store %arg17[%c0_25, %c0_26], %17 {strides = array<i32>} : memref<64x32xbf16, #tpu.memory_space<vmem>>, vector<64x32xbf16>,
    %c0_27 = arith.constant 0 : index
    %c0_28 = arith.constant 0 : index
    %19 = vector.load %arg17[%c0_27, %c0_28] : memref<64x32xbf16, #tpu.memory_space<vmem>>, vector<8x32xbf16>
    %cst_29 = arith.constant dense<0.000000e+00> : vector<32x32xf32>
    %20 = tpu.matmul %19, %0, %cst_29 {dimension_numbers = #tpu.dot_dimension_numbers<[0], [0], [1], [1], [0, 1, 1, 1], [], []>} : vector<8x32xbf16>, vector<8x32xbf16>, vector<32x32xf32> -> vector<32x32xf32>
    %21 = vector.broadcast %1 : vector<1x32xf32> to vector<32x32xf32>
    %22 = arith.addf %20, %21 : vector<32x32xf32>
    %23 = math.tanh %22 : vector<32x32xf32>
    %24 = arith.truncf %23 : vector<32x32xf32> to vector<32x32xbf16>
    %cst_30 = arith.constant dense<0.000000e+00> : vector<32x32xf32>
    %25 = tpu.matmul %24, %2, %cst_30 {dimension_numbers = #tpu.dot_dimension_numbers<[0], [0], [1], [1], [0, 1, 1, 1], [], []>} : vector<32x32xbf16>, vector<32x32xbf16>, vector<32x32xf32> -> vector<32x32xf32>
    %26 = vector.broadcast %3 : vector<1x32xf32> to vector<32x32xf32>
    %27 = arith.addf %25, %26 : vector<32x32xf32>
    %28 = math.tanh %27 : vector<32x32xf32>
    %29 = arith.truncf %28 : vector<32x32xf32> to vector<32x32xbf16>
    %cst_31 = arith.constant dense<0.000000e+00> : vector<32x32xf32>
    %30 = tpu.matmul %29, %4, %cst_31 {dimension_numbers = #tpu.dot_dimension_numbers<[0], [0], [1], [1], [0, 1, 1, 1], [], []>} : vector<32x32xbf16>, vector<32x32xbf16>, vector<32x32xf32> -> vector<32x32xf32>
    %31 = vector.broadcast %5 : vector<1x32xf32> to vector<32x32xf32>
    %32 = arith.addf %30, %31 : vector<32x32xf32>
    %33 = math.tanh %32 : vector<32x32xf32>
    %34 = arith.truncf %33 : vector<32x32xf32> to vector<32x32xbf16>
    %cst_32 = arith.constant dense<0.000000e+00> : vector<32x32xf32>
    %35 = tpu.matmul %34, %6, %cst_32 {dimension_numbers = #tpu.dot_dimension_numbers<[0], [0], [1], [1], [0, 1, 1, 1], [], []>} : vector<32x32xbf16>, vector<32x32xbf16>, vector<32x32xf32> -> vector<32x32xf32>
    %36 = vector.broadcast %7 : vector<1x32xf32> to vector<32x32xf32>
    %37 = arith.addf %35, %36 : vector<32x32xf32>
    %38 = math.tanh %37 : vector<32x32xf32>
    %39 = arith.truncf %38 : vector<32x32xf32> to vector<32x32xbf16>
    %cst_33 = arith.constant dense<0.000000e+00> : vector<32x32xf32>
    %40 = tpu.matmul %39, %8, %cst_33 {dimension_numbers = #tpu.dot_dimension_numbers<[0], [0], [1], [1], [0, 1, 1, 1], [], []>} : vector<32x32xbf16>, vector<32x32xbf16>, vector<32x32xf32> -> vector<32x32xf32>
    %41 = vector.broadcast %9 : vector<1x32xf32> to vector<32x32xf32>
    %42 = arith.addf %40, %41 : vector<32x32xf32>
    %43 = math.tanh %42 : vector<32x32xf32>
    %44 = arith.addf %23, %43 : vector<32x32xf32>
    %c0_34 = arith.constant 0 : index
    %c0_35 = arith.constant 0 : index
    %c0_36 = arith.constant 0 : index
    %45 = vector.load %arg18[%c0_34, %c0_35, %c0_36] : memref<8x32x32xf32, #tpu.memory_space<vmem>>, vector<1x32x32xf32>
    %46 = vector.shape_cast %45 : vector<1x32x32xf32> to vector<32x32xf32>
    %47 = vector.shape_cast %44 : vector<32x32xf32> to vector<1x32x32xf32>
    tpu.vector_store %arg18[%c0_34, %c0_35, %c0_36], %47 {strides = array<i32>} : memref<8x32x32xf32, #tpu.memory_space<vmem>>, vector<1x32x32xf32>,
    %c8 = arith.constant 8 : index
    %c0_37 = arith.constant 0 : index
    %48 = vector.load %arg17[%c8, %c0_37] : memref<64x32xbf16, #tpu.memory_space<vmem>>, vector<8x32xbf16>
    %cst_38 = arith.constant dense<0.000000e+00> : vector<32x32xf32>
    %49 = tpu.matmul %48, %0, %cst_38 {dimension_numbers = #tpu.dot_dimension_numbers<[0], [0], [1], [1], [0, 1, 1, 1], [], []>} : vector<8x32xbf16>, vector<8x32xbf16>, vector<32x32xf32> -> vector<32x32xf32>
    %50 = vector.broadcast %1 : vector<1x32xf32> to vector<32x32xf32>
    %51 = arith.addf %49, %50 : vector<32x32xf32>
    %52 = math.tanh %51 : vector<32x32xf32>
    %53 = arith.truncf %52 : vector<32x32xf32> to vector<32x32xbf16>
    %cst_39 = arith.constant dense<0.000000e+00> : vector<32x32xf32>
    %54 = tpu.matmul %53, %2, %cst_39 {dimension_numbers = #tpu.dot_dimension_numbers<[0], [0], [1], [1], [0, 1, 1, 1], [], []>} : vector<32x32xbf16>, vector<32x32xbf16>, vector<32x32xf32> -> vector<32x32xf32>
    %55 = vector.broadcast %3 : vector<1x32xf32> to vector<32x32xf32>
    %56 = arith.addf %54, %55 : vector<32x32xf32>
    %57 = math.tanh %56 : vector<32x32xf32>
    %58 = arith.truncf %57 : vector<32x32xf32> to vector<32x32xbf16>
    %cst_40 = arith.constant dense<0.000000e+00> : vector<32x32xf32>
    %59 = tpu.matmul %58, %4, %cst_40 {dimension_numbers = #tpu.dot_dimension_numbers<[0], [0], [1], [1], [0, 1, 1, 1], [], []>} : vector<32x32xbf16>, vector<32x32xbf16>, vector<32x32xf32> -> vector<32x32xf32>
    %60 = vector.broadcast %5 : vector<1x32xf32> to vector<32x32xf32>
    %61 = arith.addf %59, %60 : vector<32x32xf32>
    %62 = math.tanh %61 : vector<32x32xf32>
    %63 = arith.truncf %62 : vector<32x32xf32> to vector<32x32xbf16>
    %cst_41 = arith.constant dense<0.000000e+00> : vector<32x32xf32>
    %64 = tpu.matmul %63, %6, %cst_41 {dimension_numbers = #tpu.dot_dimension_numbers<[0], [0], [1], [1], [0, 1, 1, 1], [], []>} : vector<32x32xbf16>, vector<32x32xbf16>, vector<32x32xf32> -> vector<32x32xf32>
    %65 = vector.broadcast %7 : vector<1x32xf32> to vector<32x32xf32>
    %66 = arith.addf %64, %65 : vector<32x32xf32>
    %67 = math.tanh %66 : vector<32x32xf32>
    %68 = arith.truncf %67 : vector<32x32xf32> to vector<32x32xbf16>
    %cst_42 = arith.constant dense<0.000000e+00> : vector<32x32xf32>
    %69 = tpu.matmul %68, %8, %cst_42 {dimension_numbers = #tpu.dot_dimension_numbers<[0], [0], [1], [1], [0, 1, 1, 1], [], []>} : vector<32x32xbf16>, vector<32x32xbf16>, vector<32x32xf32> -> vector<32x32xf32>
    %70 = vector.broadcast %9 : vector<1x32xf32> to vector<32x32xf32>
    %71 = arith.addf %69, %70 : vector<32x32xf32>
    %72 = math.tanh %71 : vector<32x32xf32>
    %73 = arith.addf %52, %72 : vector<32x32xf32>
    %c1 = arith.constant 1 : index
    %c0_43 = arith.constant 0 : index
    %c0_44 = arith.constant 0 : index
    %74 = vector.load %arg18[%c1, %c0_43, %c0_44] : memref<8x32x32xf32, #tpu.memory_space<vmem>>, vector<1x32x32xf32>
    %75 = vector.shape_cast %74 : vector<1x32x32xf32> to vector<32x32xf32>
    %76 = vector.shape_cast %73 : vector<32x32xf32> to vector<1x32x32xf32>
    tpu.vector_store %arg18[%c1, %c0_43, %c0_44], %76 {strides = array<i32>} : memref<8x32x32xf32, #tpu.memory_space<vmem>>, vector<1x32x32xf32>,
    %c16 = arith.constant 16 : index
    %c0_45 = arith.constant 0 : index
    %77 = vector.load %arg17[%c16, %c0_45] : memref<64x32xbf16, #tpu.memory_space<vmem>>, vector<8x32xbf16>
    %cst_46 = arith.constant dense<0.000000e+00> : vector<32x32xf32>
    %78 = tpu.matmul %77, %0, %cst_46 {dimension_numbers = #tpu.dot_dimension_numbers<[0], [0], [1], [1], [0, 1, 1, 1], [], []>} : vector<8x32xbf16>, vector<8x32xbf16>, vector<32x32xf32> -> vector<32x32xf32>
    %79 = vector.broadcast %1 : vector<1x32xf32> to vector<32x32xf32>
    %80 = arith.addf %78, %79 : vector<32x32xf32>
    %81 = math.tanh %80 : vector<32x32xf32>
    %82 = arith.truncf %81 : vector<32x32xf32> to vector<32x32xbf16>
    %cst_47 = arith.constant dense<0.000000e+00> : vector<32x32xf32>
    %83 = tpu.matmul %82, %2, %cst_47 {dimension_numbers = #tpu.dot_dimension_numbers<[0], [0], [1], [1], [0, 1, 1, 1], [], []>} : vector<32x32xbf16>, vector<32x32xbf16>, vector<32x32xf32> -> vector<32x32xf32>
    %84 = vector.broadcast %3 : vector<1x32xf32> to vector<32x32xf32>
    %85 = arith.addf %83, %84 : vector<32x32xf32>
    %86 = math.tanh %85 : vector<32x32xf32>
    %87 = arith.truncf %86 : vector<32x32xf32> to vector<32x32xbf16>
    %cst_48 = arith.constant dense<0.000000e+00> : vector<32x32xf32>
    %88 = tpu.matmul %87, %4, %cst_48 {dimension_numbers = #tpu.dot_dimension_numbers<[0], [0], [1], [1], [0, 1, 1, 1], [], []>} : vector<32x32xbf16>, vector<32x32xbf16>, vector<32x32xf32> -> vector<32x32xf32>
    %89 = vector.broadcast %5 : vector<1x32xf32> to vector<32x32xf32>
    %90 = arith.addf %88, %89 : vector<32x32xf32>
    %91 = math.tanh %90 : vector<32x32xf32>
    %92 = arith.truncf %91 : vector<32x32xf32> to vector<32x32xbf16>
    %cst_49 = arith.constant dense<0.000000e+00> : vector<32x32xf32>
    %93 = tpu.matmul %92, %6, %cst_49 {dimension_numbers = #tpu.dot_dimension_numbers<[0], [0], [1], [1], [0, 1, 1, 1], [], []>} : vector<32x32xbf16>, vector<32x32xbf16>, vector<32x32xf32> -> vector<32x32xf32>
    %94 = vector.broadcast %7 : vector<1x32xf32> to vector<32x32xf32>
    %95 = arith.addf %93, %94 : vector<32x32xf32>
    %96 = math.tanh %95 : vector<32x32xf32>
    %97 = arith.truncf %96 : vector<32x32xf32> to vector<32x32xbf16>
    %cst_50 = arith.constant dense<0.000000e+00> : vector<32x32xf32>
    %98 = tpu.matmul %97, %8, %cst_50 {dimension_numbers = #tpu.dot_dimension_numbers<[0], [0], [1], [1], [0, 1, 1, 1], [], []>} : vector<32x32xbf16>, vector<32x32xbf16>, vector<32x32xf32> -> vector<32x32xf32>
    %99 = vector.broadcast %9 : vector<1x32xf32> to vector<32x32xf32>
    %100 = arith.addf %98, %99 : vector<32x32xf32>
    %101 = math.tanh %100 : vector<32x32xf32>
    %102 = arith.addf %81, %101 : vector<32x32xf32>
    %c2 = arith.constant 2 : index
    %c0_51 = arith.constant 0 : index
    %c0_52 = arith.constant 0 : index
    %103 = vector.load %arg18[%c2, %c0_51, %c0_52] : memref<8x32x32xf32, #tpu.memory_space<vmem>>, vector<1x32x32xf32>
    %104 = vector.shape_cast %103 : vector<1x32x32xf32> to vector<32x32xf32>
    %105 = vector.shape_cast %102 : vector<32x32xf32> to vector<1x32x32xf32>
    tpu.vector_store %arg18[%c2, %c0_51, %c0_52], %105 {strides = array<i32>} : memref<8x32x32xf32, #tpu.memory_space<vmem>>, vector<1x32x32xf32>,
    %c24 = arith.constant 24 : index
    %c0_53 = arith.constant 0 : index
    %106 = vector.load %arg17[%c24, %c0_53] : memref<64x32xbf16, #tpu.memory_space<vmem>>, vector<8x32xbf16>
    %cst_54 = arith.constant dense<0.000000e+00> : vector<32x32xf32>
    %107 = tpu.matmul %106, %0, %cst_54 {dimension_numbers = #tpu.dot_dimension_numbers<[0], [0], [1], [1], [0, 1, 1, 1], [], []>} : vector<8x32xbf16>, vector<8x32xbf16>, vector<32x32xf32> -> vector<32x32xf32>
    %108 = vector.broadcast %1 : vector<1x32xf32> to vector<32x32xf32>
    %109 = arith.addf %107, %108 : vector<32x32xf32>
    %110 = math.tanh %109 : vector<32x32xf32>
    %111 = arith.truncf %110 : vector<32x32xf32> to vector<32x32xbf16>
    %cst_55 = arith.constant dense<0.000000e+00> : vector<32x32xf32>
    %112 = tpu.matmul %111, %2, %cst_55 {dimension_numbers = #tpu.dot_dimension_numbers<[0], [0], [1], [1], [0, 1, 1, 1], [], []>} : vector<32x32xbf16>, vector<32x32xbf16>, vector<32x32xf32> -> vector<32x32xf32>
    %113 = vector.broadcast %3 : vector<1x32xf32> to vector<32x32xf32>
    %114 = arith.addf %112, %113 : vector<32x32xf32>
    %115 = math.tanh %114 : vector<32x32xf32>
    %116 = arith.truncf %115 : vector<32x32xf32> to vector<32x32xbf16>
    %cst_56 = arith.constant dense<0.000000e+00> : vector<32x32xf32>
    %117 = tpu.matmul %116, %4, %cst_56 {dimension_numbers = #tpu.dot_dimension_numbers<[0], [0], [1], [1], [0, 1, 1, 1], [], []>} : vector<32x32xbf16>, vector<32x32xbf16>, vector<32x32xf32> -> vector<32x32xf32>
    %118 = vector.broadcast %5 : vector<1x32xf32> to vector<32x32xf32>
    %119 = arith.addf %117, %118 : vector<32x32xf32>
    %120 = math.tanh %119 : vector<32x32xf32>
    %121 = arith.truncf %120 : vector<32x32xf32> to vector<32x32xbf16>
    %cst_57 = arith.constant dense<0.000000e+00> : vector<32x32xf32>
    %122 = tpu.matmul %121, %6, %cst_57 {dimension_numbers = #tpu.dot_dimension_numbers<[0], [0], [1], [1], [0, 1, 1, 1], [], []>} : vector<32x32xbf16>, vector<32x32xbf16>, vector<32x32xf32> -> vector<32x32xf32>
    %123 = vector.broadcast %7 : vector<1x32xf32> to vector<32x32xf32>
    %124 = arith.addf %122, %123 : vector<32x32xf32>
    %125 = math.tanh %124 : vector<32x32xf32>
    %126 = arith.truncf %125 : vector<32x32xf32> to vector<32x32xbf16>
    %cst_58 = arith.constant dense<0.000000e+00> : vector<32x32xf32>
    %127 = tpu.matmul %126, %8, %cst_58 {dimension_numbers = #tpu.dot_dimension_numbers<[0], [0], [1], [1], [0, 1, 1, 1], [], []>} : vector<32x32xbf16>, vector<32x32xbf16>, vector<32x32xf32> -> vector<32x32xf32>
    %128 = vector.broadcast %9 : vector<1x32xf32> to vector<32x32xf32>
    %129 = arith.addf %127, %128 : vector<32x32xf32>
    %130 = math.tanh %129 : vector<32x32xf32>
    %131 = arith.addf %110, %130 : vector<32x32xf32>
    %c3 = arith.constant 3 : index
    %c0_59 = arith.constant 0 : index
    %c0_60 = arith.constant 0 : index
    %132 = vector.load %arg18[%c3, %c0_59, %c0_60] : memref<8x32x32xf32, #tpu.memory_space<vmem>>, vector<1x32x32xf32>
    %133 = vector.shape_cast %132 : vector<1x32x32xf32> to vector<32x32xf32>
    %134 = vector.shape_cast %131 : vector<32x32xf32> to vector<1x32x32xf32>
    tpu.vector_store %arg18[%c3, %c0_59, %c0_60], %134 {strides = array<i32>} : memref<8x32x32xf32, #tpu.memory_space<vmem>>, vector<1x32x32xf32>,
    %c32 = arith.constant 32 : index
    %c0_61 = arith.constant 0 : index
    %135 = vector.load %arg17[%c32, %c0_61] : memref<64x32xbf16, #tpu.memory_space<vmem>>, vector<8x32xbf16>
    %cst_62 = arith.constant dense<0.000000e+00> : vector<32x32xf32>
    %136 = tpu.matmul %135, %0, %cst_62 {dimension_numbers = #tpu.dot_dimension_numbers<[0], [0], [1], [1], [0, 1, 1, 1], [], []>} : vector<8x32xbf16>, vector<8x32xbf16>, vector<32x32xf32> -> vector<32x32xf32>
    %137 = vector.broadcast %1 : vector<1x32xf32> to vector<32x32xf32>
    %138 = arith.addf %136, %137 : vector<32x32xf32>
    %139 = math.tanh %138 : vector<32x32xf32>
    %140 = arith.truncf %139 : vector<32x32xf32> to vector<32x32xbf16>
    %cst_63 = arith.constant dense<0.000000e+00> : vector<32x32xf32>
    %141 = tpu.matmul %140, %2, %cst_63 {dimension_numbers = #tpu.dot_dimension_numbers<[0], [0], [1], [1], [0, 1, 1, 1], [], []>} : vector<32x32xbf16>, vector<32x32xbf16>, vector<32x32xf32> -> vector<32x32xf32>
    %142 = vector.broadcast %3 : vector<1x32xf32> to vector<32x32xf32>
    %143 = arith.addf %141, %142 : vector<32x32xf32>
    %144 = math.tanh %143 : vector<32x32xf32>
    %145 = arith.truncf %144 : vector<32x32xf32> to vector<32x32xbf16>
    %cst_64 = arith.constant dense<0.000000e+00> : vector<32x32xf32>
    %146 = tpu.matmul %145, %4, %cst_64 {dimension_numbers = #tpu.dot_dimension_numbers<[0], [0], [1], [1], [0, 1, 1, 1], [], []>} : vector<32x32xbf16>, vector<32x32xbf16>, vector<32x32xf32> -> vector<32x32xf32>
    %147 = vector.broadcast %5 : vector<1x32xf32> to vector<32x32xf32>
    %148 = arith.addf %146, %147 : vector<32x32xf32>
    %149 = math.tanh %148 : vector<32x32xf32>
    %150 = arith.truncf %149 : vector<32x32xf32> to vector<32x32xbf16>
    %cst_65 = arith.constant dense<0.000000e+00> : vector<32x32xf32>
    %151 = tpu.matmul %150, %6, %cst_65 {dimension_numbers = #tpu.dot_dimension_numbers<[0], [0], [1], [1], [0, 1, 1, 1], [], []>} : vector<32x32xbf16>, vector<32x32xbf16>, vector<32x32xf32> -> vector<32x32xf32>
    %152 = vector.broadcast %7 : vector<1x32xf32> to vector<32x32xf32>
    %153 = arith.addf %151, %152 : vector<32x32xf32>
    %154 = math.tanh %153 : vector<32x32xf32>
    %155 = arith.truncf %154 : vector<32x32xf32> to vector<32x32xbf16>
    %cst_66 = arith.constant dense<0.000000e+00> : vector<32x32xf32>
    %156 = tpu.matmul %155, %8, %cst_66 {dimension_numbers = #tpu.dot_dimension_numbers<[0], [0], [1], [1], [0, 1, 1, 1], [], []>} : vector<32x32xbf16>, vector<32x32xbf16>, vector<32x32xf32> -> vector<32x32xf32>
    %157 = vector.broadcast %9 : vector<1x32xf32> to vector<32x32xf32>
    %158 = arith.addf %156, %157 : vector<32x32xf32>
    %159 = math.tanh %158 : vector<32x32xf32>
    %160 = arith.addf %139, %159 : vector<32x32xf32>
    %c4 = arith.constant 4 : index
    %c0_67 = arith.constant 0 : index
    %c0_68 = arith.constant 0 : index
    %161 = vector.load %arg18[%c4, %c0_67, %c0_68] : memref<8x32x32xf32, #tpu.memory_space<vmem>>, vector<1x32x32xf32>
    %162 = vector.shape_cast %161 : vector<1x32x32xf32> to vector<32x32xf32>
    %163 = vector.shape_cast %160 : vector<32x32xf32> to vector<1x32x32xf32>
    tpu.vector_store %arg18[%c4, %c0_67, %c0_68], %163 {strides = array<i32>} : memref<8x32x32xf32, #tpu.memory_space<vmem>>, vector<1x32x32xf32>,
    %c40 = arith.constant 40 : index
    %c0_69 = arith.constant 0 : index
    %164 = vector.load %arg17[%c40, %c0_69] : memref<64x32xbf16, #tpu.memory_space<vmem>>, vector<8x32xbf16>
    %cst_70 = arith.constant dense<0.000000e+00> : vector<32x32xf32>
    %165 = tpu.matmul %164, %0, %cst_70 {dimension_numbers = #tpu.dot_dimension_numbers<[0], [0], [1], [1], [0, 1, 1, 1], [], []>} : vector<8x32xbf16>, vector<8x32xbf16>, vector<32x32xf32> -> vector<32x32xf32>
    %166 = vector.broadcast %1 : vector<1x32xf32> to vector<32x32xf32>
    %167 = arith.addf %165, %166 : vector<32x32xf32>
    %168 = math.tanh %167 : vector<32x32xf32>
    %169 = arith.truncf %168 : vector<32x32xf32> to vector<32x32xbf16>
    %cst_71 = arith.constant dense<0.000000e+00> : vector<32x32xf32>
    %170 = tpu.matmul %169, %2, %cst_71 {dimension_numbers = #tpu.dot_dimension_numbers<[0], [0], [1], [1], [0, 1, 1, 1], [], []>} : vector<32x32xbf16>, vector<32x32xbf16>, vector<32x32xf32> -> vector<32x32xf32>
    %171 = vector.broadcast %3 : vector<1x32xf32> to vector<32x32xf32>
    %172 = arith.addf %170, %171 : vector<32x32xf32>
    %173 = math.tanh %172 : vector<32x32xf32>
    %174 = arith.truncf %173 : vector<32x32xf32> to vector<32x32xbf16>
    %cst_72 = arith.constant dense<0.000000e+00> : vector<32x32xf32>
    %175 = tpu.matmul %174, %4, %cst_72 {dimension_numbers = #tpu.dot_dimension_numbers<[0], [0], [1], [1], [0, 1, 1, 1], [], []>} : vector<32x32xbf16>, vector<32x32xbf16>, vector<32x32xf32> -> vector<32x32xf32>
    %176 = vector.broadcast %5 : vector<1x32xf32> to vector<32x32xf32>
    %177 = arith.addf %175, %176 : vector<32x32xf32>
    %178 = math.tanh %177 : vector<32x32xf32>
    %179 = arith.truncf %178 : vector<32x32xf32> to vector<32x32xbf16>
    %cst_73 = arith.constant dense<0.000000e+00> : vector<32x32xf32>
    %180 = tpu.matmul %179, %6, %cst_73 {dimension_numbers = #tpu.dot_dimension_numbers<[0], [0], [1], [1], [0, 1, 1, 1], [], []>} : vector<32x32xbf16>, vector<32x32xbf16>, vector<32x32xf32> -> vector<32x32xf32>
    %181 = vector.broadcast %7 : vector<1x32xf32> to vector<32x32xf32>
    %182 = arith.addf %180, %181 : vector<32x32xf32>
    %183 = math.tanh %182 : vector<32x32xf32>
    %184 = arith.truncf %183 : vector<32x32xf32> to vector<32x32xbf16>
    %cst_74 = arith.constant dense<0.000000e+00> : vector<32x32xf32>
    %185 = tpu.matmul %184, %8, %cst_74 {dimension_numbers = #tpu.dot_dimension_numbers<[0], [0], [1], [1], [0, 1, 1, 1], [], []>} : vector<32x32xbf16>, vector<32x32xbf16>, vector<32x32xf32> -> vector<32x32xf32>
    %186 = vector.broadcast %9 : vector<1x32xf32> to vector<32x32xf32>
    %187 = arith.addf %185, %186 : vector<32x32xf32>
    %188 = math.tanh %187 : vector<32x32xf32>
    %189 = arith.addf %168, %188 : vector<32x32xf32>
    %c5 = arith.constant 5 : index
    %c0_75 = arith.constant 0 : index
    %c0_76 = arith.constant 0 : index
    %190 = vector.load %arg18[%c5, %c0_75, %c0_76] : memref<8x32x32xf32, #tpu.memory_space<vmem>>, vector<1x32x32xf32>
    %191 = vector.shape_cast %190 : vector<1x32x32xf32> to vector<32x32xf32>
    %192 = vector.shape_cast %189 : vector<32x32xf32> to vector<1x32x32xf32>
    tpu.vector_store %arg18[%c5, %c0_75, %c0_76], %192 {strides = array<i32>} : memref<8x32x32xf32, #tpu.memory_space<vmem>>, vector<1x32x32xf32>,
    %c48 = arith.constant 48 : index
    %c0_77 = arith.constant 0 : index
    %193 = vector.load %arg17[%c48, %c0_77] : memref<64x32xbf16, #tpu.memory_space<vmem>>, vector<8x32xbf16>
    %cst_78 = arith.constant dense<0.000000e+00> : vector<32x32xf32>
    %194 = tpu.matmul %193, %0, %cst_78 {dimension_numbers = #tpu.dot_dimension_numbers<[0], [0], [1], [1], [0, 1, 1, 1], [], []>} : vector<8x32xbf16>, vector<8x32xbf16>, vector<32x32xf32> -> vector<32x32xf32>
    %195 = vector.broadcast %1 : vector<1x32xf32> to vector<32x32xf32>
    %196 = arith.addf %194, %195 : vector<32x32xf32>
    %197 = math.tanh %196 : vector<32x32xf32>
    %198 = arith.truncf %197 : vector<32x32xf32> to vector<32x32xbf16>
    %cst_79 = arith.constant dense<0.000000e+00> : vector<32x32xf32>
    %199 = tpu.matmul %198, %2, %cst_79 {dimension_numbers = #tpu.dot_dimension_numbers<[0], [0], [1], [1], [0, 1, 1, 1], [], []>} : vector<32x32xbf16>, vector<32x32xbf16>, vector<32x32xf32> -> vector<32x32xf32>
    %200 = vector.broadcast %3 : vector<1x32xf32> to vector<32x32xf32>
    %201 = arith.addf %199, %200 : vector<32x32xf32>
    %202 = math.tanh %201 : vector<32x32xf32>
    %203 = arith.truncf %202 : vector<32x32xf32> to vector<32x32xbf16>
    %cst_80 = arith.constant dense<0.000000e+00> : vector<32x32xf32>
    %204 = tpu.matmul %203, %4, %cst_80 {dimension_numbers = #tpu.dot_dimension_numbers<[0], [0], [1], [1], [0, 1, 1, 1], [], []>} : vector<32x32xbf16>, vector<32x32xbf16>, vector<32x32xf32> -> vector<32x32xf32>
    %205 = vector.broadcast %5 : vector<1x32xf32> to vector<32x32xf32>
    %206 = arith.addf %204, %205 : vector<32x32xf32>
    %207 = math.tanh %206 : vector<32x32xf32>
    %208 = arith.truncf %207 : vector<32x32xf32> to vector<32x32xbf16>
    %cst_81 = arith.constant dense<0.000000e+00> : vector<32x32xf32>
    %209 = tpu.matmul %208, %6, %cst_81 {dimension_numbers = #tpu.dot_dimension_numbers<[0], [0], [1], [1], [0, 1, 1, 1], [], []>} : vector<32x32xbf16>, vector<32x32xbf16>, vector<32x32xf32> -> vector<32x32xf32>
    %210 = vector.broadcast %7 : vector<1x32xf32> to vector<32x32xf32>
    %211 = arith.addf %209, %210 : vector<32x32xf32>
    %212 = math.tanh %211 : vector<32x32xf32>
    %213 = arith.truncf %212 : vector<32x32xf32> to vector<32x32xbf16>
    %cst_82 = arith.constant dense<0.000000e+00> : vector<32x32xf32>
    %214 = tpu.matmul %213, %8, %cst_82 {dimension_numbers = #tpu.dot_dimension_numbers<[0], [0], [1], [1], [0, 1, 1, 1], [], []>} : vector<32x32xbf16>, vector<32x32xbf16>, vector<32x32xf32> -> vector<32x32xf32>
    %215 = vector.broadcast %9 : vector<1x32xf32> to vector<32x32xf32>
    %216 = arith.addf %214, %215 : vector<32x32xf32>
    %217 = math.tanh %216 : vector<32x32xf32>
    %218 = arith.addf %197, %217 : vector<32x32xf32>
    %c6 = arith.constant 6 : index
    %c0_83 = arith.constant 0 : index
    %c0_84 = arith.constant 0 : index
    %219 = vector.load %arg18[%c6, %c0_83, %c0_84] : memref<8x32x32xf32, #tpu.memory_space<vmem>>, vector<1x32x32xf32>
    %220 = vector.shape_cast %219 : vector<1x32x32xf32> to vector<32x32xf32>
    %221 = vector.shape_cast %218 : vector<32x32xf32> to vector<1x32x32xf32>
    tpu.vector_store %arg18[%c6, %c0_83, %c0_84], %221 {strides = array<i32>} : memref<8x32x32xf32, #tpu.memory_space<vmem>>, vector<1x32x32xf32>,
    %c56 = arith.constant 56 : index
    %c0_85 = arith.constant 0 : index
    %222 = vector.load %arg17[%c56, %c0_85] : memref<64x32xbf16, #tpu.memory_space<vmem>>, vector<8x32xbf16>
    %cst_86 = arith.constant dense<0.000000e+00> : vector<32x32xf32>
    %223 = tpu.matmul %222, %0, %cst_86 {dimension_numbers = #tpu.dot_dimension_numbers<[0], [0], [1], [1], [0, 1, 1, 1], [], []>} : vector<8x32xbf16>, vector<8x32xbf16>, vector<32x32xf32> -> vector<32x32xf32>
    %224 = vector.broadcast %1 : vector<1x32xf32> to vector<32x32xf32>
    %225 = arith.addf %223, %224 : vector<32x32xf32>
    %226 = math.tanh %225 : vector<32x32xf32>
    %227 = arith.truncf %226 : vector<32x32xf32> to vector<32x32xbf16>
    %cst_87 = arith.constant dense<0.000000e+00> : vector<32x32xf32>
    %228 = tpu.matmul %227, %2, %cst_87 {dimension_numbers = #tpu.dot_dimension_numbers<[0], [0], [1], [1], [0, 1, 1, 1], [], []>} : vector<32x32xbf16>, vector<32x32xbf16>, vector<32x32xf32> -> vector<32x32xf32>
    %229 = vector.broadcast %3 : vector<1x32xf32> to vector<32x32xf32>
    %230 = arith.addf %228, %229 : vector<32x32xf32>
    %231 = math.tanh %230 : vector<32x32xf32>
    %232 = arith.truncf %231 : vector<32x32xf32> to vector<32x32xbf16>
    %cst_88 = arith.constant dense<0.000000e+00> : vector<32x32xf32>
    %233 = tpu.matmul %232, %4, %cst_88 {dimension_numbers = #tpu.dot_dimension_numbers<[0], [0], [1], [1], [0, 1, 1, 1], [], []>} : vector<32x32xbf16>, vector<32x32xbf16>, vector<32x32xf32> -> vector<32x32xf32>
    %234 = vector.broadcast %5 : vector<1x32xf32> to vector<32x32xf32>
    %235 = arith.addf %233, %234 : vector<32x32xf32>
    %236 = math.tanh %235 : vector<32x32xf32>
    %237 = arith.truncf %236 : vector<32x32xf32> to vector<32x32xbf16>
    %cst_89 = arith.constant dense<0.000000e+00> : vector<32x32xf32>
    %238 = tpu.matmul %237, %6, %cst_89 {dimension_numbers = #tpu.dot_dimension_numbers<[0], [0], [1], [1], [0, 1, 1, 1], [], []>} : vector<32x32xbf16>, vector<32x32xbf16>, vector<32x32xf32> -> vector<32x32xf32>
    %239 = vector.broadcast %7 : vector<1x32xf32> to vector<32x32xf32>
    %240 = arith.addf %238, %239 : vector<32x32xf32>
    %241 = math.tanh %240 : vector<32x32xf32>
    %242 = arith.truncf %241 : vector<32x32xf32> to vector<32x32xbf16>
    %cst_90 = arith.constant dense<0.000000e+00> : vector<32x32xf32>
    %243 = tpu.matmul %242, %8, %cst_90 {dimension_numbers = #tpu.dot_dimension_numbers<[0], [0], [1], [1], [0, 1, 1, 1], [], []>} : vector<32x32xbf16>, vector<32x32xbf16>, vector<32x32xf32> -> vector<32x32xf32>
    %244 = vector.broadcast %9 : vector<1x32xf32> to vector<32x32xf32>
    %245 = arith.addf %243, %244 : vector<32x32xf32>
    %246 = math.tanh %245 : vector<32x32xf32>
    %247 = arith.addf %226, %246 : vector<32x32xf32>
    %c7 = arith.constant 7 : index
    %c0_91 = arith.constant 0 : index
    %c0_92 = arith.constant 0 : index
    %248 = vector.load %arg18[%c7, %c0_91, %c0_92] : memref<8x32x32xf32, #tpu.memory_space<vmem>>, vector<1x32x32xf32>
    %249 = vector.shape_cast %248 : vector<1x32x32xf32> to vector<32x32xf32>
    %250 = vector.shape_cast %247 : vector<32x32xf32> to vector<1x32x32xf32>
    tpu.vector_store %arg18[%c7, %c0_91, %c0_92], %250 {strides = array<i32>} : memref<8x32x32xf32, #tpu.memory_space<vmem>>, vector<1x32x32xf32>,
    %c0_93 = arith.constant 0 : index
    %c0_94 = arith.constant 0 : index
    %c0_95 = arith.constant 0 : index
    %251 = vector.load %arg18[%c0_93, %c0_94, %c0_95] : memref<8x32x32xf32, #tpu.memory_space<vmem>>, vector<8x1x32xf32>
    %252 = vector.shape_cast %251 : vector<8x1x32xf32> to vector<8x32xf32>
    %c0_96 = arith.constant 0 : index
    %c0_97 = arith.constant 0 : index
    %253 = vector.load %arg19[%c0_96, %c0_97] : memref<8x1024xf32, #tpu.memory_space<vmem>>, vector<8x32xf32>
    tpu.vector_store %arg19[%c0_96, %c0_97], %252 {strides = array<i32>} : memref<8x1024xf32, #tpu.memory_space<vmem>>, vector<8x32xf32>,
    %c0_98 = arith.constant 0 : index
    %c1_99 = arith.constant 1 : index
    %c0_100 = arith.constant 0 : index
    %254 = vector.load %arg18[%c0_98, %c1_99, %c0_100] : memref<8x32x32xf32, #tpu.memory_space<vmem>>, vector<8x1x32xf32>
    %255 = vector.shape_cast %254 : vector<8x1x32xf32> to vector<8x32xf32>
    %c0_101 = arith.constant 0 : index
    %c32_102 = arith.constant 32 : index
    %256 = vector.load %arg19[%c0_101, %c32_102] : memref<8x1024xf32, #tpu.memory_space<vmem>>, vector<8x32xf32>
    tpu.vector_store %arg19[%c0_101, %c32_102], %255 {strides = array<i32>} : memref<8x1024xf32, #tpu.memory_space<vmem>>, vector<8x32xf32>,
    %c0_103 = arith.constant 0 : index
    %c2_104 = arith.constant 2 : index
    %c0_105 = arith.constant 0 : index
    %257 = vector.load %arg18[%c0_103, %c2_104, %c0_105] : memref<8x32x32xf32, #tpu.memory_space<vmem>>, vector<8x1x32xf32>
    %258 = vector.shape_cast %257 : vector<8x1x32xf32> to vector<8x32xf32>
    %c0_106 = arith.constant 0 : index
    %c64 = arith.constant 64 : index
    %259 = vector.load %arg19[%c0_106, %c64] : memref<8x1024xf32, #tpu.memory_space<vmem>>, vector<8x32xf32>
    tpu.vector_store %arg19[%c0_106, %c64], %258 {strides = array<i32>} : memref<8x1024xf32, #tpu.memory_space<vmem>>, vector<8x32xf32>,
    %c0_107 = arith.constant 0 : index
    %c3_108 = arith.constant 3 : index
    %c0_109 = arith.constant 0 : index
    %260 = vector.load %arg18[%c0_107, %c3_108, %c0_109] : memref<8x32x32xf32, #tpu.memory_space<vmem>>, vector<8x1x32xf32>
    %261 = vector.shape_cast %260 : vector<8x1x32xf32> to vector<8x32xf32>
    %c0_110 = arith.constant 0 : index
    %c96 = arith.constant 96 : index
    %262 = vector.load %arg19[%c0_110, %c96] : memref<8x1024xf32, #tpu.memory_space<vmem>>, vector<8x32xf32>
    tpu.vector_store %arg19[%c0_110, %c96], %261 {strides = array<i32>} : memref<8x1024xf32, #tpu.memory_space<vmem>>, vector<8x32xf32>,
    %c0_111 = arith.constant 0 : index
    %c4_112 = arith.constant 4 : index
    %c0_113 = arith.constant 0 : index
    %263 = vector.load %arg18[%c0_111, %c4_112, %c0_113] : memref<8x32x32xf32, #tpu.memory_space<vmem>>, vector<8x1x32xf32>
    %264 = vector.shape_cast %263 : vector<8x1x32xf32> to vector<8x32xf32>
    %c0_114 = arith.constant 0 : index
    %c128 = arith.constant 128 : index
    %265 = vector.load %arg19[%c0_114, %c128] : memref<8x1024xf32, #tpu.memory_space<vmem>>, vector<8x32xf32>
    tpu.vector_store %arg19[%c0_114, %c128], %264 {strides = array<i32>} : memref<8x1024xf32, #tpu.memory_space<vmem>>, vector<8x32xf32>,
    %c0_115 = arith.constant 0 : index
    %c5_116 = arith.constant 5 : index
    %c0_117 = arith.constant 0 : index
    %266 = vector.load %arg18[%c0_115, %c5_116, %c0_117] : memref<8x32x32xf32, #tpu.memory_space<vmem>>, vector<8x1x32xf32>
    %267 = vector.shape_cast %266 : vector<8x1x32xf32> to vector<8x32xf32>
    %c0_118 = arith.constant 0 : index
    %c160 = arith.constant 160 : index
    %268 = vector.load %arg19[%c0_118, %c160] : memref<8x1024xf32, #tpu.memory_space<vmem>>, vector<8x32xf32>
    tpu.vector_store %arg19[%c0_118, %c160], %267 {strides = array<i32>} : memref<8x1024xf32, #tpu.memory_space<vmem>>, vector<8x32xf32>,
    %c0_119 = arith.constant 0 : index
    %c6_120 = arith.constant 6 : index
    %c0_121 = arith.constant 0 : index
    %269 = vector.load %arg18[%c0_119, %c6_120, %c0_121] : memref<8x32x32xf32, #tpu.memory_space<vmem>>, vector<8x1x32xf32>
    %270 = vector.shape_cast %269 : vector<8x1x32xf32> to vector<8x32xf32>
    %c0_122 = arith.constant 0 : index
    %c192 = arith.constant 192 : index
    %271 = vector.load %arg19[%c0_122, %c192] : memref<8x1024xf32, #tpu.memory_space<vmem>>, vector<8x32xf32>
    tpu.vector_store %arg19[%c0_122, %c192], %270 {strides = array<i32>} : memref<8x1024xf32, #tpu.memory_space<vmem>>, vector<8x32xf32>,
    %c0_123 = arith.constant 0 : index
    %c7_124 = arith.constant 7 : index
    %c0_125 = arith.constant 0 : index
    %272 = vector.load %arg18[%c0_123, %c7_124, %c0_125] : memref<8x32x32xf32, #tpu.memory_space<vmem>>, vector<8x1x32xf32>
    %273 = vector.shape_cast %272 : vector<8x1x32xf32> to vector<8x32xf32>
    %c0_126 = arith.constant 0 : index
    %c224 = arith.constant 224 : index
    %274 = vector.load %arg19[%c0_126, %c224] : memref<8x1024xf32, #tpu.memory_space<vmem>>, vector<8x32xf32>
    tpu.vector_store %arg19[%c0_126, %c224], %273 {strides = array<i32>} : memref<8x1024xf32, #tpu.memory_space<vmem>>, vector<8x32xf32>,
    %c0_127 = arith.constant 0 : index
    %c8_128 = arith.constant 8 : index
    %c0_129 = arith.constant 0 : index
    %275 = vector.load %arg18[%c0_127, %c8_128, %c0_129] : memref<8x32x32xf32, #tpu.memory_space<vmem>>, vector<8x1x32xf32>
    %276 = vector.shape_cast %275 : vector<8x1x32xf32> to vector<8x32xf32>
    %c0_130 = arith.constant 0 : index
    %c256 = arith.constant 256 : index
    %277 = vector.load %arg19[%c0_130, %c256] : memref<8x1024xf32, #tpu.memory_space<vmem>>, vector<8x32xf32>
    tpu.vector_store %arg19[%c0_130, %c256], %276 {strides = array<i32>} : memref<8x1024xf32, #tpu.memory_space<vmem>>, vector<8x32xf32>,
    %c0_131 = arith.constant 0 : index
    %c9 = arith.constant 9 : index
    %c0_132 = arith.constant 0 : index
    %278 = vector.load %arg18[%c0_131, %c9, %c0_132] : memref<8x32x32xf32, #tpu.memory_space<vmem>>, vector<8x1x32xf32>
    %279 = vector.shape_cast %278 : vector<8x1x32xf32> to vector<8x32xf32>
    %c0_133 = arith.constant 0 : index
    %c288 = arith.constant 288 : index
    %280 = vector.load %arg19[%c0_133, %c288] : memref<8x1024xf32, #tpu.memory_space<vmem>>, vector<8x32xf32>
    tpu.vector_store %arg19[%c0_133, %c288], %279 {strides = array<i32>} : memref<8x1024xf32, #tpu.memory_space<vmem>>, vector<8x32xf32>,
    %c0_134 = arith.constant 0 : index
    %c10 = arith.constant 10 : index
    %c0_135 = arith.constant 0 : index
    %281 = vector.load %arg18[%c0_134, %c10, %c0_135] : memref<8x32x32xf32, #tpu.memory_space<vmem>>, vector<8x1x32xf32>
    %282 = vector.shape_cast %281 : vector<8x1x32xf32> to vector<8x32xf32>
    %c0_136 = arith.constant 0 : index
    %c320 = arith.constant 320 : index
    %283 = vector.load %arg19[%c0_136, %c320] : memref<8x1024xf32, #tpu.memory_space<vmem>>, vector<8x32xf32>
    tpu.vector_store %arg19[%c0_136, %c320], %282 {strides = array<i32>} : memref<8x1024xf32, #tpu.memory_space<vmem>>, vector<8x32xf32>,
    %c0_137 = arith.constant 0 : index
    %c11 = arith.constant 11 : index
    %c0_138 = arith.constant 0 : index
    %284 = vector.load %arg18[%c0_137, %c11, %c0_138] : memref<8x32x32xf32, #tpu.memory_space<vmem>>, vector<8x1x32xf32>
    %285 = vector.shape_cast %284 : vector<8x1x32xf32> to vector<8x32xf32>
    %c0_139 = arith.constant 0 : index
    %c352 = arith.constant 352 : index
    %286 = vector.load %arg19[%c0_139, %c352] : memref<8x1024xf32, #tpu.memory_space<vmem>>, vector<8x32xf32>
    tpu.vector_store %arg19[%c0_139, %c352], %285 {strides = array<i32>} : memref<8x1024xf32, #tpu.memory_space<vmem>>, vector<8x32xf32>,
    %c0_140 = arith.constant 0 : index
    %c12 = arith.constant 12 : index
    %c0_141 = arith.constant 0 : index
    %287 = vector.load %arg18[%c0_140, %c12, %c0_141] : memref<8x32x32xf32, #tpu.memory_space<vmem>>, vector<8x1x32xf32>
    %288 = vector.shape_cast %287 : vector<8x1x32xf32> to vector<8x32xf32>
    %c0_142 = arith.constant 0 : index
    %c384 = arith.constant 384 : index
    %289 = vector.load %arg19[%c0_142, %c384] : memref<8x1024xf32, #tpu.memory_space<vmem>>, vector<8x32xf32>
    tpu.vector_store %arg19[%c0_142, %c384], %288 {strides = array<i32>} : memref<8x1024xf32, #tpu.memory_space<vmem>>, vector<8x32xf32>,
    %c0_143 = arith.constant 0 : index
    %c13 = arith.constant 13 : index
    %c0_144 = arith.constant 0 : index
    %290 = vector.load %arg18[%c0_143, %c13, %c0_144] : memref<8x32x32xf32, #tpu.memory_space<vmem>>, vector<8x1x32xf32>
    %291 = vector.shape_cast %290 : vector<8x1x32xf32> to vector<8x32xf32>
    %c0_145 = arith.constant 0 : index
    %c416 = arith.constant 416 : index
    %292 = vector.load %arg19[%c0_145, %c416] : memref<8x1024xf32, #tpu.memory_space<vmem>>, vector<8x32xf32>
    tpu.vector_store %arg19[%c0_145, %c416], %291 {strides = array<i32>} : memref<8x1024xf32, #tpu.memory_space<vmem>>, vector<8x32xf32>,
    %c0_146 = arith.constant 0 : index
    %c14 = arith.constant 14 : index
    %c0_147 = arith.constant 0 : index
    %293 = vector.load %arg18[%c0_146, %c14, %c0_147] : memref<8x32x32xf32, #tpu.memory_space<vmem>>, vector<8x1x32xf32>
    %294 = vector.shape_cast %293 : vector<8x1x32xf32> to vector<8x32xf32>
    %c0_148 = arith.constant 0 : index
    %c448 = arith.constant 448 : index
    %295 = vector.load %arg19[%c0_148, %c448] : memref<8x1024xf32, #tpu.memory_space<vmem>>, vector<8x32xf32>
    tpu.vector_store %arg19[%c0_148, %c448], %294 {strides = array<i32>} : memref<8x1024xf32, #tpu.memory_space<vmem>>, vector<8x32xf32>,
    %c0_149 = arith.constant 0 : index
    %c15 = arith.constant 15 : index
    %c0_150 = arith.constant 0 : index
    %296 = vector.load %arg18[%c0_149, %c15, %c0_150] : memref<8x32x32xf32, #tpu.memory_space<vmem>>, vector<8x1x32xf32>
    %297 = vector.shape_cast %296 : vector<8x1x32xf32> to vector<8x32xf32>
    %c0_151 = arith.constant 0 : index
    %c480 = arith.constant 480 : index
    %298 = vector.load %arg19[%c0_151, %c480] : memref<8x1024xf32, #tpu.memory_space<vmem>>, vector<8x32xf32>
    tpu.vector_store %arg19[%c0_151, %c480], %297 {strides = array<i32>} : memref<8x1024xf32, #tpu.memory_space<vmem>>, vector<8x32xf32>,
    %c0_152 = arith.constant 0 : index
    %c16_153 = arith.constant 16 : index
    %c0_154 = arith.constant 0 : index
    %299 = vector.load %arg18[%c0_152, %c16_153, %c0_154] : memref<8x32x32xf32, #tpu.memory_space<vmem>>, vector<8x1x32xf32>
    %300 = vector.shape_cast %299 : vector<8x1x32xf32> to vector<8x32xf32>
    %c0_155 = arith.constant 0 : index
    %c512 = arith.constant 512 : index
    %301 = vector.load %arg19[%c0_155, %c512] : memref<8x1024xf32, #tpu.memory_space<vmem>>, vector<8x32xf32>
    tpu.vector_store %arg19[%c0_155, %c512], %300 {strides = array<i32>} : memref<8x1024xf32, #tpu.memory_space<vmem>>, vector<8x32xf32>,
    %c0_156 = arith.constant 0 : index
    %c17 = arith.constant 17 : index
    %c0_157 = arith.constant 0 : index
    %302 = vector.load %arg18[%c0_156, %c17, %c0_157] : memref<8x32x32xf32, #tpu.memory_space<vmem>>, vector<8x1x32xf32>
    %303 = vector.shape_cast %302 : vector<8x1x32xf32> to vector<8x32xf32>
    %c0_158 = arith.constant 0 : index
    %c544 = arith.constant 544 : index
    %304 = vector.load %arg19[%c0_158, %c544] : memref<8x1024xf32, #tpu.memory_space<vmem>>, vector<8x32xf32>
    tpu.vector_store %arg19[%c0_158, %c544], %303 {strides = array<i32>} : memref<8x1024xf32, #tpu.memory_space<vmem>>, vector<8x32xf32>,
    %c0_159 = arith.constant 0 : index
    %c18 = arith.constant 18 : index
    %c0_160 = arith.constant 0 : index
    %305 = vector.load %arg18[%c0_159, %c18, %c0_160] : memref<8x32x32xf32, #tpu.memory_space<vmem>>, vector<8x1x32xf32>
    %306 = vector.shape_cast %305 : vector<8x1x32xf32> to vector<8x32xf32>
    %c0_161 = arith.constant 0 : index
    %c576 = arith.constant 576 : index
    %307 = vector.load %arg19[%c0_161, %c576] : memref<8x1024xf32, #tpu.memory_space<vmem>>, vector<8x32xf32>
    tpu.vector_store %arg19[%c0_161, %c576], %306 {strides = array<i32>} : memref<8x1024xf32, #tpu.memory_space<vmem>>, vector<8x32xf32>,
    %c0_162 = arith.constant 0 : index
    %c19 = arith.constant 19 : index
    %c0_163 = arith.constant 0 : index
    %308 = vector.load %arg18[%c0_162, %c19, %c0_163] : memref<8x32x32xf32, #tpu.memory_space<vmem>>, vector<8x1x32xf32>
    %309 = vector.shape_cast %308 : vector<8x1x32xf32> to vector<8x32xf32>
    %c0_164 = arith.constant 0 : index
    %c608 = arith.constant 608 : index
    %310 = vector.load %arg19[%c0_164, %c608] : memref<8x1024xf32, #tpu.memory_space<vmem>>, vector<8x32xf32>
    tpu.vector_store %arg19[%c0_164, %c608], %309 {strides = array<i32>} : memref<8x1024xf32, #tpu.memory_space<vmem>>, vector<8x32xf32>,
    %c0_165 = arith.constant 0 : index
    %c20 = arith.constant 20 : index
    %c0_166 = arith.constant 0 : index
    %311 = vector.load %arg18[%c0_165, %c20, %c0_166] : memref<8x32x32xf32, #tpu.memory_space<vmem>>, vector<8x1x32xf32>
    %312 = vector.shape_cast %311 : vector<8x1x32xf32> to vector<8x32xf32>
    %c0_167 = arith.constant 0 : index
    %c640 = arith.constant 640 : index
    %313 = vector.load %arg19[%c0_167, %c640] : memref<8x1024xf32, #tpu.memory_space<vmem>>, vector<8x32xf32>
    tpu.vector_store %arg19[%c0_167, %c640], %312 {strides = array<i32>} : memref<8x1024xf32, #tpu.memory_space<vmem>>, vector<8x32xf32>,
    %c0_168 = arith.constant 0 : index
    %c21 = arith.constant 21 : index
    %c0_169 = arith.constant 0 : index
    %314 = vector.load %arg18[%c0_168, %c21, %c0_169] : memref<8x32x32xf32, #tpu.memory_space<vmem>>, vector<8x1x32xf32>
    %315 = vector.shape_cast %314 : vector<8x1x32xf32> to vector<8x32xf32>
    %c0_170 = arith.constant 0 : index
    %c672 = arith.constant 672 : index
    %316 = vector.load %arg19[%c0_170, %c672] : memref<8x1024xf32, #tpu.memory_space<vmem>>, vector<8x32xf32>
    tpu.vector_store %arg19[%c0_170, %c672], %315 {strides = array<i32>} : memref<8x1024xf32, #tpu.memory_space<vmem>>, vector<8x32xf32>,
    %c0_171 = arith.constant 0 : index
    %c22 = arith.constant 22 : index
    %c0_172 = arith.constant 0 : index
    %317 = vector.load %arg18[%c0_171, %c22, %c0_172] : memref<8x32x32xf32, #tpu.memory_space<vmem>>, vector<8x1x32xf32>
    %318 = vector.shape_cast %317 : vector<8x1x32xf32> to vector<8x32xf32>
    %c0_173 = arith.constant 0 : index
    %c704 = arith.constant 704 : index
    %319 = vector.load %arg19[%c0_173, %c704] : memref<8x1024xf32, #tpu.memory_space<vmem>>, vector<8x32xf32>
    tpu.vector_store %arg19[%c0_173, %c704], %318 {strides = array<i32>} : memref<8x1024xf32, #tpu.memory_space<vmem>>, vector<8x32xf32>,
    %c0_174 = arith.constant 0 : index
    %c23 = arith.constant 23 : index
    %c0_175 = arith.constant 0 : index
    %320 = vector.load %arg18[%c0_174, %c23, %c0_175] : memref<8x32x32xf32, #tpu.memory_space<vmem>>, vector<8x1x32xf32>
    %321 = vector.shape_cast %320 : vector<8x1x32xf32> to vector<8x32xf32>
    %c0_176 = arith.constant 0 : index
    %c736 = arith.constant 736 : index
    %322 = vector.load %arg19[%c0_176, %c736] : memref<8x1024xf32, #tpu.memory_space<vmem>>, vector<8x32xf32>
    tpu.vector_store %arg19[%c0_176, %c736], %321 {strides = array<i32>} : memref<8x1024xf32, #tpu.memory_space<vmem>>, vector<8x32xf32>,
    %c0_177 = arith.constant 0 : index
    %c24_178 = arith.constant 24 : index
    %c0_179 = arith.constant 0 : index
    %323 = vector.load %arg18[%c0_177, %c24_178, %c0_179] : memref<8x32x32xf32, #tpu.memory_space<vmem>>, vector<8x1x32xf32>
    %324 = vector.shape_cast %323 : vector<8x1x32xf32> to vector<8x32xf32>
    %c0_180 = arith.constant 0 : index
    %c768 = arith.constant 768 : index
    %325 = vector.load %arg19[%c0_180, %c768] : memref<8x1024xf32, #tpu.memory_space<vmem>>, vector<8x32xf32>
    tpu.vector_store %arg19[%c0_180, %c768], %324 {strides = array<i32>} : memref<8x1024xf32, #tpu.memory_space<vmem>>, vector<8x32xf32>,
    %c0_181 = arith.constant 0 : index
    %c25 = arith.constant 25 : index
    %c0_182 = arith.constant 0 : index
    %326 = vector.load %arg18[%c0_181, %c25, %c0_182] : memref<8x32x32xf32, #tpu.memory_space<vmem>>, vector<8x1x32xf32>
    %327 = vector.shape_cast %326 : vector<8x1x32xf32> to vector<8x32xf32>
    %c0_183 = arith.constant 0 : index
    %c800 = arith.constant 800 : index
    %328 = vector.load %arg19[%c0_183, %c800] : memref<8x1024xf32, #tpu.memory_space<vmem>>, vector<8x32xf32>
    tpu.vector_store %arg19[%c0_183, %c800], %327 {strides = array<i32>} : memref<8x1024xf32, #tpu.memory_space<vmem>>, vector<8x32xf32>,
    %c0_184 = arith.constant 0 : index
    %c26 = arith.constant 26 : index
    %c0_185 = arith.constant 0 : index
    %329 = vector.load %arg18[%c0_184, %c26, %c0_185] : memref<8x32x32xf32, #tpu.memory_space<vmem>>, vector<8x1x32xf32>
    %330 = vector.shape_cast %329 : vector<8x1x32xf32> to vector<8x32xf32>
    %c0_186 = arith.constant 0 : index
    %c832 = arith.constant 832 : index
    %331 = vector.load %arg19[%c0_186, %c832] : memref<8x1024xf32, #tpu.memory_space<vmem>>, vector<8x32xf32>
    tpu.vector_store %arg19[%c0_186, %c832], %330 {strides = array<i32>} : memref<8x1024xf32, #tpu.memory_space<vmem>>, vector<8x32xf32>,
    %c0_187 = arith.constant 0 : index
    %c27 = arith.constant 27 : index
    %c0_188 = arith.constant 0 : index
    %332 = vector.load %arg18[%c0_187, %c27, %c0_188] : memref<8x32x32xf32, #tpu.memory_space<vmem>>, vector<8x1x32xf32>
    %333 = vector.shape_cast %332 : vector<8x1x32xf32> to vector<8x32xf32>
    %c0_189 = arith.constant 0 : index
    %c864 = arith.constant 864 : index
    %334 = vector.load %arg19[%c0_189, %c864] : memref<8x1024xf32, #tpu.memory_space<vmem>>, vector<8x32xf32>
    tpu.vector_store %arg19[%c0_189, %c864], %333 {strides = array<i32>} : memref<8x1024xf32, #tpu.memory_space<vmem>>, vector<8x32xf32>,
    %c0_190 = arith.constant 0 : index
    %c28 = arith.constant 28 : index
    %c0_191 = arith.constant 0 : index
    %335 = vector.load %arg18[%c0_190, %c28, %c0_191] : memref<8x32x32xf32, #tpu.memory_space<vmem>>, vector<8x1x32xf32>
    %336 = vector.shape_cast %335 : vector<8x1x32xf32> to vector<8x32xf32>
    %c0_192 = arith.constant 0 : index
    %c896 = arith.constant 896 : index
    %337 = vector.load %arg19[%c0_192, %c896] : memref<8x1024xf32, #tpu.memory_space<vmem>>, vector<8x32xf32>
    tpu.vector_store %arg19[%c0_192, %c896], %336 {strides = array<i32>} : memref<8x1024xf32, #tpu.memory_space<vmem>>, vector<8x32xf32>,
    %c0_193 = arith.constant 0 : index
    %c29 = arith.constant 29 : index
    %c0_194 = arith.constant 0 : index
    %338 = vector.load %arg18[%c0_193, %c29, %c0_194] : memref<8x32x32xf32, #tpu.memory_space<vmem>>, vector<8x1x32xf32>
    %339 = vector.shape_cast %338 : vector<8x1x32xf32> to vector<8x32xf32>
    %c0_195 = arith.constant 0 : index
    %c928 = arith.constant 928 : index
    %340 = vector.load %arg19[%c0_195, %c928] : memref<8x1024xf32, #tpu.memory_space<vmem>>, vector<8x32xf32>
    tpu.vector_store %arg19[%c0_195, %c928], %339 {strides = array<i32>} : memref<8x1024xf32, #tpu.memory_space<vmem>>, vector<8x32xf32>,
    %c0_196 = arith.constant 0 : index
    %c30 = arith.constant 30 : index
    %c0_197 = arith.constant 0 : index
    %341 = vector.load %arg18[%c0_196, %c30, %c0_197] : memref<8x32x32xf32, #tpu.memory_space<vmem>>, vector<8x1x32xf32>
    %342 = vector.shape_cast %341 : vector<8x1x32xf32> to vector<8x32xf32>
    %c0_198 = arith.constant 0 : index
    %c960 = arith.constant 960 : index
    %343 = vector.load %arg19[%c0_198, %c960] : memref<8x1024xf32, #tpu.memory_space<vmem>>, vector<8x32xf32>
    tpu.vector_store %arg19[%c0_198, %c960], %342 {strides = array<i32>} : memref<8x1024xf32, #tpu.memory_space<vmem>>, vector<8x32xf32>,
    %c0_199 = arith.constant 0 : index
    %c31 = arith.constant 31 : index
    %c0_200 = arith.constant 0 : index
    %344 = vector.load %arg18[%c0_199, %c31, %c0_200] : memref<8x32x32xf32, #tpu.memory_space<vmem>>, vector<8x1x32xf32>
    %345 = vector.shape_cast %344 : vector<8x1x32xf32> to vector<8x32xf32>
    %c0_201 = arith.constant 0 : index
    %c992 = arith.constant 992 : index
    %346 = vector.load %arg19[%c0_201, %c992] : memref<8x1024xf32, #tpu.memory_space<vmem>>, vector<8x32xf32>
    tpu.vector_store %arg19[%c0_201, %c992], %345 {strides = array<i32>} : memref<8x1024xf32, #tpu.memory_space<vmem>>, vector<8x32xf32>,
    %c0_202 = arith.constant 0 : index
    %c0_203 = arith.constant 0 : index
    %347 = vector.load %arg19[%c0_202, %c0_203] : memref<8x1024xf32, #tpu.memory_space<vmem>>, vector<8x1024xf32>
    %348 = arith.truncf %347 : vector<8x1024xf32> to vector<8x1024xbf16>
    %c0_204 = arith.constant 0 : index
    %c0_205 = arith.constant 0 : index
    %349 = vector.load %arg14[%c0_204, %c0_205] : memref<1024x128xbf16, #tpu.memory_space<vmem>>, vector<1024x128xbf16>
    %cst_206 = arith.constant dense<0.000000e+00> : vector<8x128xf32>
    %350 = tpu.matmul %348, %349, %cst_206 {dimension_numbers = #tpu.dot_dimension_numbers<[1], [0], [0], [1], [0, 0, 1, 1], [], []>} : vector<8x1024xbf16>, vector<1024x128xbf16>, vector<8x128xf32> -> vector<8x128xf32>
    %c0_207 = arith.constant 0 : index
    %c0_208 = arith.constant 0 : index
    %351 = vector.load %arg15[%c0_207, %c0_208] : memref<1x128xf32, #tpu.memory_space<vmem>>, vector<1x128xf32>
    %352 = vector.broadcast %351 : vector<1x128xf32> to vector<8x128xf32>
    %353 = arith.addf %350, %352 : vector<8x128xf32>
    %cst_209 = arith.constant dense<0xFF800000> : vector<8xf32>
    %354 = vector.multi_reduction <maximumf>, %353, %cst_209 [1] : vector<8x128xf32> to vector<8xf32>
    %355 = vector.shape_cast %354 : vector<8xf32> to vector<8x1xf32>
    %356 = vector.broadcast %355 : vector<8x1xf32> to vector<8x128xf32>
    %357 = arith.subf %353, %356 : vector<8x128xf32>
    %358 = math.exp %357 : vector<8x128xf32>
    %cst_210 = arith.constant dense<0.000000e+00> : vector<8xf32>
    %359 = vector.multi_reduction <add>, %358, %cst_210 [1] : vector<8x128xf32> to vector<8xf32>
    %360 = vector.shape_cast %359 : vector<8xf32> to vector<8x1xf32>
    %361 = math.log %360 : vector<8x1xf32>
    %362 = arith.addf %355, %361 : vector<8x1xf32>
    %363 = vector.broadcast %362 : vector<8x1xf32> to vector<8x128xf32>
    %364 = arith.subf %353, %363 : vector<8x128xf32>
    %c0_211 = arith.constant 0 : index
    %c0_212 = arith.constant 0 : index
    %365 = vector.load %arg16[%c0_211, %c0_212] : memref<8x128xf32, #tpu.memory_space<vmem>>, vector<8x128xf32>
    tpu.vector_store %arg16[%c0_211, %c0_212], %364 {strides = array<i32>} : memref<8x128xf32, #tpu.memory_space<vmem>>, vector<8x128xf32>,
    return
  }
  func.func @transform_0(%arg0: i32) -> (i32, i32) {
    %c0_i32 = arith.constant 0 : i32
    %c0_i32_0 = arith.constant 0 : i32
    return %arg0, %c0_i32 : i32, i32
  }
  func.func @transform_1(%arg0: i32) -> (i32, i32) {
    %c0_i32 = arith.constant 0 : i32
    %c0_i32_0 = arith.constant 0 : i32
    %c0_i32_1 = arith.constant 0 : i32
    return %c0_i32, %c0_i32_0 : i32, i32
  }
  func.func @transform_2(%arg0: i32) -> (i32, i32) {
    %c0_i32 = arith.constant 0 : i32
    %c0_i32_0 = arith.constant 0 : i32
    %c0_i32_1 = arith.constant 0 : i32
    return %c0_i32, %c0_i32_0 : i32, i32
  }
  func.func @transform_3(%arg0: i32) -> (i32, i32) {
    %c0_i32 = arith.constant 0 : i32
    %c0_i32_0 = arith.constant 0 : i32
    %c0_i32_1 = arith.constant 0 : i32
    return %c0_i32, %c0_i32_0 : i32, i32
  }
  func.func @transform_4(%arg0: i32) -> (i32, i32) {
    %c0_i32 = arith.constant 0 : i32
    %c0_i32_0 = arith.constant 0 : i32
    %c0_i32_1 = arith.constant 0 : i32
    return %c0_i32, %c0_i32_0 : i32, i32
  }
  func.func @transform_5(%arg0: i32) -> (i32, i32) {
    %c0_i32 = arith.constant 0 : i32
    %c0_i32_0 = arith.constant 0 : i32
    %c0_i32_1 = arith.constant 0 : i32
    return %c0_i32, %c0_i32_0 : i32, i32
  }
  func.func @transform_6(%arg0: i32) -> (i32, i32) {
    %c0_i32 = arith.constant 0 : i32
    %c0_i32_0 = arith.constant 0 : i32
    %c0_i32_1 = arith.constant 0 : i32
    return %c0_i32, %c0_i32_0 : i32, i32
  }
  func.func @transform_7(%arg0: i32) -> (i32, i32) {
    %c0_i32 = arith.constant 0 : i32
    %c0_i32_0 = arith.constant 0 : i32
    %c0_i32_1 = arith.constant 0 : i32
    return %c0_i32, %c0_i32_0 : i32, i32
  }
  func.func @transform_8(%arg0: i32) -> (i32, i32) {
    %c0_i32 = arith.constant 0 : i32
    %c0_i32_0 = arith.constant 0 : i32
    %c0_i32_1 = arith.constant 0 : i32
    return %c0_i32, %c0_i32_0 : i32, i32
  }
  func.func @transform_9(%arg0: i32) -> (i32, i32) {
    %c0_i32 = arith.constant 0 : i32
    %c0_i32_0 = arith.constant 0 : i32
    %c0_i32_1 = arith.constant 0 : i32
    return %c0_i32, %c0_i32_0 : i32, i32
  }
  func.func @transform_10(%arg0: i32) -> (i32, i32) {
    %c0_i32 = arith.constant 0 : i32
    %c0_i32_0 = arith.constant 0 : i32
    %c0_i32_1 = arith.constant 0 : i32
    return %c0_i32, %c0_i32_0 : i32, i32
  }
  func.func @transform_11(%arg0: i32) -> (i32, i32) {
    %c0_i32 = arith.constant 0 : i32
    %c0_i32_0 = arith.constant 0 : i32
    %c0_i32_1 = arith.constant 0 : i32
    return %c0_i32, %c0_i32_0 : i32, i32
  }
  func.func @transform_12(%arg0: i32) -> (i32, i32) {
    %c0_i32 = arith.constant 0 : i32
    %c0_i32_0 = arith.constant 0 : i32
    %c0_i32_1 = arith.constant 0 : i32
    return %c0_i32, %c0_i32_0 : i32, i32
  }
  func.func @transform_13(%arg0: i32) -> (i32, i32) {
    %c0_i32 = arith.constant 0 : i32
    %c0_i32_0 = arith.constant 0 : i32
    %c0_i32_1 = arith.constant 0 : i32
    return %c0_i32, %c0_i32_0 : i32, i32
  }
  func.func @transform_14(%arg0: i32) -> (i32, i32) {
    %c0_i32 = arith.constant 0 : i32
    %c0_i32_0 = arith.constant 0 : i32
    %c0_i32_1 = arith.constant 0 : i32
    return %c0_i32, %c0_i32_0 : i32, i32
  }
  func.func @transform_15(%arg0: i32) -> (i32, i32) {
    %c0_i32 = arith.constant 0 : i32
    %c0_i32_0 = arith.constant 0 : i32
    return %arg0, %c0_i32 : i32, i32
  }
}

</mosaic_0001>

<bundles_post_ra>
// kernel: tpu_custom_call.1
= control target key start
LH: loop header
LB: loop body
LE: loop exit
PB: predicated region body
PF: predicated region fallthrough
CT: control target
= control target key end

     0   :  { %20 = vsyncpa [#allocation6], 0  ;;  %s9453_s0 = inlined_call_operand.vmem [shape: bf16[128,16], index: 0, kind: input, shape index: {}]   ;;  %s9454_s1 = inlined_call_operand.vmem [shape: bf16[16,32], index: 1, kind: input, shape index: {}]   ;;  %s9455_s2 = inlined_call_operand.vmem [shape: f32[1,32], index: 2, kind: input, shape index: {}]   ;;  %s9456_s3 = inlined_call_operand.vmem [shape: bf16[8,32], index: 3, kind: input, shape index: {}]   ;;  %s9457_s4 = inlined_call_operand.vmem [shape: f32[1,32], index: 4, kind: input, shape index: {}]   ;;  %s9458_s5 = inlined_call_operand.vmem [shape: bf16[32,32], index: 5, kind: input, shape index: {}]   ;;  %s9459_s6 = inlined_call_operand.vmem [shape: f32[1,32], index: 6, kind: input, shape index: {}]   ;;  %s9460_s7 = inlined_call_operand.vmem [shape: bf16[32,32], index: 7, kind: input, shape index: {}]   ;;  %s9461_s8 = inlined_call_operand.vmem [shape: f32[1,32], index: 8, kind: input, shape index: {}]   ;;  %s9462_s9 = inlined_call_operand.vmem [shape: bf16[32,32], index: 9, kind: input, shape index: {}]   ;;  %s9463_s10 = inlined_call_operand.vmem [shape: f32[1,32], index: 10, kind: input, shape index: {}]   ;;  %s9464_s11 = inlined_call_operand.vmem [shape: bf16[32,32], index: 11, kind: input, shape index: {}]   ;;  %s9465_s12 = inlined_call_operand.vmem [shape: f32[1,32], index: 12, kind: input, shape index: {}]   ;;  %s9466_s13 = inlined_call_operand.hbm [shape: bf16[1024,128], index: 13, kind: input, shape index: {}]   ;;  %s9467_s14 = inlined_call_operand.vmem [shape: f32[1,128], index: 14, kind: input, shape index: {}]   ;;  %s9468_s15 = inlined_call_operand.hbm [shape: f32[16,128], index: 15, kind: output, shape index: {}]  }
   0x1   :  { %21 = vsyncpa [#allocation7], 0 }
   0x2   :  { %23 = vsyncpa [#allocation7 + $0x1], 0  ;;  %s7203_s18 = smov 0   ;;  %s7205_s19 = smov 0  }
   0x3   :  { %s7207_s20 = smov 0   ;;  %s7209_s21 = smov 0  }
   0x4 LB: > { %9486 = sst [smem:[#allocation11_spill]] %s7102_s18  ;;  %s7224_s22 = sadd.s32 4294967295, %s7114_s21   ;;  %s7114_s21 = sphi %s7209_s21, %s9656_s21   ;;  %s7110_s20 = sphi %s7207_s20, %s9658_s20   ;;  %s7106_s19 = sphi %s7205_s19, %s9660_s19   ;;  %s7102_s18 = sphi %s7203_s18, %s9659_s18  }
   0x5   : > { %9487 = sst [smem:[#allocation12_spill]] %s7110_s20  ;;  %s5783_s23 = sadd.s32 4294967294, %s7114_s21  }
   0x6   : > { %s7228_s24 = sadd.s32 1, %s7114_s21   ;;  %s356_s25 = sadd.s32 1, %s7110_s20 }
   0x7   : > { %9488 = sst [smem:[#allocation13_spill]] %s7228_s24  ;;  %s353_s26 = ssub.s32 %s7114_s21, %s7228_s24 }
   0x8   : > { %p366_p0 = scmp.ne.s32.totalorder %s7110_s20, %s7106_s19  ;;  %p354_p1 = scmp.eq.s32.totalorder %s353_s26, 0 }
   0x9   : > { %p367_p2 = scmp.eq.s32.totalorder %s7224_s22, 1  ;;  %p372_p3 = scmp.ne.s32.totalorder %s7106_s19, %s7102_s18 }
   0xa   : > { %p373_p4 = scmp.eq.s32.totalorder %s5783_s23, 1  ;;  %p5784_p7 = scmp.ge.s32.totalorder %s7114_s21, 1 }
   0xb   : > { %s7239_s27 = scalar_select %p354_p1, %s7110_s20, %s356_s25  }
   0xc   : > { %p7241_p5 = por %p367_p2, %p366_p0  ;;  %p7245_p6 = por %p373_p4, %p372_p3 }
   0xd   : > { %9489 = sst [smem:[#allocation14_spill]] %s7239_s27  ;;  %p380_p8 = scmp.lt.s32.totalorder %s7114_s21, 3 }
   0xe   : > { %s9490_s28 = scalar_select %p7241_p5, 1, 0 }
   0xf   : > { %s9491_s29 = scalar_select %p7245_p6, 1, 0 }
  0x10   : > { %p9474_p9 = scmp.eq.s32.totalorder %s7224_s22, 0  ;;  %p7252_p10 = pnand %p5784_p7, %p380_p8 }
  0x11   : > { %9492 = sst [smem:[#allocation15_spill]] %s9491_s29  ;;  %s7116_s16 = smov [#allocation5]  }
  0x12   : > { %s9493_s30 = scalar_select %p7252_p10, 1, 0 }
  0x13   : > { %s428_s17 = sshll.u32 %s7116_s16, 4  ;;  %p6537_p11 = pneg %p7252_p10  ;;  %s429_s17 = int_to_ptr.vmem [resolvable:$true] %s428_s17 }
  0x14   : > { %s7020_s27 = scalar_lea.hbm %s9466_s13, 8192 }
  0x15   : > { %p7260_p12 = pnand %p9474_p9, %p6537_p11  ;;  %p7021_p13 = scmp.ne.s32.totalorder %s9466_s13, %s7020_s27 }
  0x16   : > { %p7027_p3 = scmp.lt.u32.totalorder %s7020_s27, %s9466_s13 }
  0x17   : > { %p7022_p0 = pneg %p7260_p12 }
  0x19   : > { %p7023_p1 = pnand %p7022_p0, %p7021_p13 }
  0x1b   : > { %p7024_p2 = pneg %p7023_p1 }
  0x1d   : > { %p7029_p4 = pnand %p7027_p3, %p7024_p2 }
  0x1f   : > { %7032 = shalt.err (!%p7029_p4)
}
  0x20   : > { %s7033_s18 = scalar_lea.vmem %s429_s17, 8192  ;;  %p7041_p9 = scmp.lt.s32.totalorder %s429_s17, %s429_s17 }
  0x21   : > { %p7034_p7 = scmp.ne.s32.totalorder %s429_s17, %s7033_s18  ;;  %p7042_p6 = scmp.lt.s32.totalorder %s7033_s18, %s7033_s18 }
  0x23   : > { %p7036_p8 = pnand %p7034_p7, %p7022_p0  ;;  %p7043_p5 = por %p7042_p6, %p7041_p9 }
  0x25   : > { %p7037_p11 = pneg %p7036_p8 }
  0x27   : > { %p7044_p10 = pnand %p7043_p5, %p7037_p11 }
  0x29   : > { %7047 = shalt.err (!%p7044_p10)
}
  0x2a   : > { %s7117_s20 = smov 64   ;;  %s7118_s24 = smov 4  }
  0x2b   : > { %6540 = dma.hbm_to_vmem [thread:$0]  (!%p7260_p12), %s9466_s13, 8192, %s429_s17, [#allocation6], %s7117_s20, %s7117_s20, %s7118_s24  }
  0x2c   : > { %p9495_p13 = scmp.ne.s32.totalorder %s9493_s30, 0 }
  0x2e   : > { %456 = sbr.rel (%p9495_p13) target bundleno = 9860 (0x2684), region = 80 }
  0x35   : > { %p9496_p1 = scmp.eq.s32.totalorder %s7224_s22, 0 }
  0x37   : > { %7093 = dma.done.wait (%p9496_p1), [#allocation6], 8192   ;;  %p9497_p0 = pmov %p9496_p1 }
  0x38   : > { %s5790_s18 = sshll.u32 %s7224_s22, 3  ;;  %v6587_v0 = vld [vmem:[%s9454_s1] sm:$0xff]   ;;  %vm576_vm0 = vcmask 130048   ;;  %vm701_vm1 = vcmask 1043456   ;;  %vm666_vm2 = vcmask 261120   ;;  %vm694_vm3 = vcmask 64512  }
  0x39   : > { %7095 = vsyncadd (%p9497_p0), [#allocation6], 4294959104  ;;  %p505_p5 = scmp.lt.s32.totalorder %s5790_s18, 15  ;;  %6209 = vmatprep.subr.bf16.mxu0 %v6587_v0  ;;  %v7302_v3 = vld [vmem:[%s9455_s2] ss:$0 sm:$0xff]  ;;  %v7332_v24 = vld [vmem:[%s9458_s5 + $0x8] sm:$0xff]  }
  0x3a   : > { %6210 = vmatpush3.bf16.msra.mxu0 %v6587_v0  ;;  %v7308_v7 = vld [vmem:[%s9456_s3] sm:$0xf]  ;;  %v7371_v47 = vld [vmem:[%s9460_s7 + $0x8] sm:$0xff]   ;;  %vm3926_vm4 = vcmask 1041409   ;;  %vm3929_vm5 = vcmask 1042434   ;;  %vm3932_vm6 = vcmask 1043459  }
  0x3b   : > { %s9662_s18 = smov (!%p505_p5, %s5790_s18), 15  ;;  %6523 = vmatprep.subr.msk.bf16.mxu1 %vm701_vm1, %v7308_v7  ;;  %v7315_v10 = vsel %vm701_vm1, %v7308_v7, 0  ;;  %v7327_v23 = vld [vmem:[%s9458_s5] sm:$0xff]   ;;  %vm3935_vm7 = vcmask 1044484   ;;  %vm3938_vm8 = vcmask 1045509   ;;  %vm3941_vm9 = vcmask 1046534  }
  0x3c   : > { %s5791_s27 = sshll.u32 %s9662_s18, 2  ;;  %6220 = vmatpush3.bf16.msra.mxu1 %v7315_v10  ;;  %v7341_v25 = vld [vmem:[%s9457_s4] ss:$0 sm:$0xff]  ;;  %vm3944_vm10 = vcmask 1047559   ;;  %s7119_s23 = smov 32   ;;  %vm3981_vm11 = vcmask 523520  }
  0x3d   : > { %s7290_s16 = scalar_lea.vmem %s9453_s0, %s5791_s27  ;;  %6225 = vmatprep.subr.bf16.mxu1 %v7327_v23  ;;  %v7364_v44 = vld [vmem:[%s9460_s7] sm:$0xff]   ;;  %s7120_s17 = smov 64   ;;  %vm4016_vm12 = vcmask 785920   ;;  %vm4051_vm13 = vcmask 1048320  }
  0x3e   : > { %v6588_v1 = vld [vmem:[%s7290_s16] sm:$0xff]   ;;  %v6589_v2 = vld [vmem:[%s7290_s16 + $0x8] sm:$0xff]   ;;  %v6593_v45 = vld [vmem:[%s7290_s16 + $0x10] sm:$0xff]   ;;  %6233 = vmatprep.subr.bf16.mxu0 %v7364_v44  ;;  %s7121_s20 = smov 96   ;;  %s501_s25 = sand.u32 1, %s7106_s19  }
  0x3f   : > { %6211 = vmatprep.mubr.msk.bf16.mxu0 %vm576_vm0, %v6588_v1  ;;  %v6594_v46 = vld [vmem:[%s7290_s16 + $0x18] sm:$0xff]   ;;  %v7382_v48 = vld [vmem:[%s9459_s6] ss:$0 sm:$0xff]  ;;  %s5789_s26 = sshll.u32 %s501_s25, 3  ;;  %s5961_s18 = sshll.u32 %s7224_s22, 7 }
  0x40   : > { %6212 = vmatmul.mubr.msk.bf16.vlgmr.msra.gmra.mrb[0].mxu0 %vm576_vm0, %v6589_v2  ;;  %s503_s27 = scalar_lea.vmem [#allocation8], %s5789_s26  ;;  %p9652_p9 = scmp.ne.s32.totalorder %s9490_s28, 0 }
  0x41   : > { %6215 = vmatprep.mubr.msk.bf16.mxu0 %vm576_vm0, %v6593_v45  ;;  %6234 = vmatpush3.bf16.msra.mxu0 %v7364_v44  ;;  %s5712_s16 = sshll.u32 %s503_s27, 4  ;;  %s7122_s22 = smov [#allocation8]   ;;  %s9413_s16 = int_to_ptr.vmem [resolvable:$true] %s5712_s16 }
  0x42   : > { %6235 = vmatprep.subr.bf16.mxu0 %v7371_v47  ;;  %s7048_s30 = scalar_lea.vmem %s9413_s16, 128  ;;  %s7052_s24 = sshll.u32 %s7122_s22, 4  ;;  %s7053_s24 = int_to_ptr.vmem [resolvable:$false] %s7052_s24 }
  0x43   : > { %p7049_p6 = scmp.ne.s32.totalorder %s9413_s16, %s7048_s30  ;;  %s7054_s26 = scalar_lea.vmem %s7053_s24, 256 }
  0x44   : > { %p7055_p2 = scmp.lt.s32.totalorder %s9413_s16, %s7053_s24  ;;  %p7056_p3 = scmp.lt.s32.totalorder %s7054_s26, %s7048_s30 }
  0x45   : > { %6236 = vmatpush3.bf16.msra.mxu0 %v7371_v47  ;;  %p7050_p10 = pnand %p7049_p6, %p9652_p9 }
  0x46   : > { %p7057_p4 = por %p7056_p3, %p7055_p2 }
  0x47   : > { %p7051_p12 = pneg %p7050_p10 }
  0x48   : > { %6216 = vmatmul.mubr.msk.bf16.gmra.mrb[4].mxu0 %vm576_vm0, %v6594_v46  ;;  %v7433_v46 = vld [vmem:[%s9464_s11] sm:$0xff]  }
  0x49   : > { %6249 = vmatprep.subr.bf16.mxu0 %v7433_v46  ;;  %p7058_p7 = pnand %p7057_p4, %p7051_p12 }
 0x113   : > { %v6213_v4 = vpop.f32.mrb[0].mxu0 }
 0x114   : > { %v632_v5 = vadd.f32 %v6213_v4, %v7302_v3  ;;  %v623_v6 = vpop.f32.mrb[1].mxu0 }
 0x115   : > { %v624_v8 = vadd.f32 %v7302_v3, %v623_v6  ;;  %v6214_v9 = vpop.f32.mrb[2].mxu0 }
 0x116   : > { %6664 = vtanh.f32 %v632_v5  ;;  %v635_v11 = vadd.f32 %v6214_v9, %v7302_v3  ;;  %v626_v12 = vpop.f32.mrb[3].mxu0 }
 0x117   : > { %6666 = vtanh.f32 %v624_v8  ;;  %v627_v13 = vadd.f32 %v7302_v3, %v626_v12 }
 0x118   : > { %6668 = vtanh.f32 %v635_v11 }
 0x119   : > { %6670 = vtanh.f32 %v627_v13 }
 0x11b   : > { %v6217_v63 = vpop.f32.mrb[4].mxu0 }
 0x11c   : > { %v648_v0 = vadd.f32 %v6217_v63, %v7302_v3  ;;  %v639_v1 = vpop.f32.mrb[5].mxu0 }
 0x11d   : > { %v640_v2 = vadd.f32 %v7302_v3, %v639_v1  ;;  %v6218_v4 = vpop.f32.mrb[6].mxu0 }
 0x11e   : > { %v651_v5 = vadd.f32 %v6218_v4, %v7302_v3  ;;  %v642_v6 = vpop.f32.mrb[7].mxu0 }
 0x11f   : > { %v643_v8 = vadd.f32 %v7302_v3, %v642_v6  ;;  %v7399_v3 = vld [vmem:[%s9462_s9] sm:$0xff]  }
 0x120   : > { %v6665_v14 = vpop.eup %6664 }
 0x121   : > { %v6667_v15 = vpop.eup %6666 }
 0x122   : > { %v6669_v16 = vpop.eup %6668 }
 0x123   : > { %v6671_v17 = vpop.eup %6670  ;;  %v663_v18 = vpack.c.bf16 %v6669_v16, %v6665_v14 }
 0x124   : > { %v662_v19 = vpack.c.bf16 %v6671_v17, %v6667_v15 }
 0x125   : > { %668 = vst.msk [vmem:[#allocation2 + $0x8] sm:$0xff] %vm666_vm2, %v663_v18  ;;  %v7404_v18 = vld [vmem:[%s9462_s9 + $0x8] sm:$0xff]  }
 0x126   : > { %667 = vst.msk [vmem:[#allocation2] sm:$0xff] %vm666_vm2, %v662_v19  ;;  %v7415_v19 = vld [vmem:[%s9461_s8] ss:$0 sm:$0xff] }
 0x12d   : > { %v671_v20 = vld [vmem:[#allocation2] sm:$0xf]  ;;  %v1146_v40 = vld [vmem:[#allocation2] sm:$0xf0] }
 0x12e   : > { %678 = vxpose.xlu0.c.b16.start.end [1/1] (short) (narrow) %v671_v20, 32  ;;  %v1148_v41 = vrot.slane %v1146_v40, 4 }
 0x194   : > { %v686_v21 = vpop.trf.xlu0 }
 0x195   : > { %6221 = vmatprep.mubr.msk.bf16.mxu1 %vm694_vm3, %v686_v21 }
 0x198   : > { %v687_v22 = vpop.trf.xlu0 }
 0x199   : > { %6222 = vmatmul.mubr.msk.bf16.vlgmr.msra.gmra.mrb[0].mxu1 %vm694_vm3, %v687_v22 }
 0x19a   : > { %6226 = vmatpush3.bf16.msra.mxu1 %v7327_v23 }
 0x19b   : > { %6227 = vmatprep.subr.bf16.mxu1 %v7332_v24 }
 0x19e   : > { %6228 = vmatpush3.bf16.msra.mxu1 %v7332_v24 }
 0x19f   : > { %6241 = vmatprep.subr.bf16.mxu1 %v7399_v3 }
 0x26c   : > { %v6223_v26 = vpop.f32.mrb[0].mxu1 }
 0x26d   : > { %v739_v27 = vpop.f32.mrb[1].mxu1  ;;  %v748_v33 = vadd.f32 %v6223_v26, %v7341_v25 }
 0x26e   : > { %v740_v28 = vadd.f32 %v7341_v25, %v739_v27  ;;  %v6224_v29 = vpop.f32.mrb[2].mxu1 }
 0x26f   : > { %v742_v30 = vpop.f32.mrb[3].mxu1  ;;  %v751_v31 = vadd.f32 %v6224_v29, %v7341_v25 }
 0x270   : > { %v743_v32 = vadd.f32 %v7341_v25, %v742_v30  ;;  %6672 = vtanh.f32 %v740_v28 }
 0x272   : > { %6674 = vtanh.f32 %v743_v32 }
 0x273   : > { %6676 = vtanh.f32 %v751_v31 }
 0x274   : > { %6678 = vtanh.f32 %v748_v33 }
 0x27a   : > { %v7347_v34 = vpop.eup %6672 }
 0x27c   : > { %v7349_v35 = vpop.eup %6674 }
 0x27d   : > { %v758_v36 = vpack.c.bf16 %v7349_v35, %v7347_v34  ;;  %v7353_v37 = vpop.eup %6676 }
 0x27e   : > { %v7355_v38 = vpop.eup %6678 }
 0x27f   : > { %766 = vxpose.xlu0.c.b16.start [1/2] (short) (narrow) %v758_v36, 32  ;;  %v759_v39 = vpack.c.bf16 %v7353_v37, %v7355_v38 }
 0x283   : > { %767 = vxpose.xlu0.c.b16.end [2/2] (short) (narrow) %v759_v39, 32 }
 0x287   : > { %1150 = vxpose.xlu0.c.b16.start.end [1/1] (short) (narrow) %v1148_v41, 32 }
 0x2e5   : > { %v774_v42 = vpop.trf.xlu0 }
 0x2e6   : > { %6229 = vmatprep.mubr.msk.bf16.mxu1 %vm666_vm2, %v774_v42 }
 0x2e9   : > { %v775_v43 = vpop.trf.xlu0 }
 0x2ea   : > { %6230 = vmatmul.mubr.msk.bf16.vlgmr.msra.gmra.mrb[4].mxu1 %vm666_vm2, %v775_v43 }
 0x2eb   : > { %6242 = vmatpush3.bf16.msra.mxu1 %v7399_v3 }
 0x2ec   : > { %6243 = vmatprep.subr.bf16.mxu1 %v7404_v18 }
 0x2ed   : > { %v1158_v42 = vpop.trf.xlu0 }
 0x2ef   : > { %6244 = vmatpush3.bf16.msra.mxu1 %v7404_v18 }
 0x2f0   : > { %6524 = vmatprep.subr.msk.bf16.mxu1 %vm701_vm1, %v7308_v7 }
 0x2f1   : > { %v1159_v45 = vpop.trf.xlu0 }
 0x3bd   : > { %v6231_v49 = vpop.f32.mrb[4].mxu1 }
 0x3be   : > { %v843_v50 = vadd.f32 %v6231_v49, %v7382_v48  ;;  %v834_v51 = vpop.f32.mrb[5].mxu1  ;;  %v7438_v49 = vld [vmem:[%s9464_s11 + $0x8] sm:$0xff]  }
 0x3bf   : > { %v835_v52 = vadd.f32 %v7382_v48, %v834_v51  ;;  %v6232_v53 = vpop.f32.mrb[6].mxu1 }
 0x3c0   : > { %6680 = vtanh.f32 %v843_v50  ;;  %v846_v54 = vadd.f32 %v6232_v53, %v7382_v48  ;;  %v837_v55 = vpop.f32.mrb[7].mxu1  ;;  %v7449_v50 = vld [vmem:[%s9463_s10] ss:$0 sm:$0xff] }
 0x3c1   : > { %6682 = vtanh.f32 %v835_v52  ;;  %v838_v56 = vadd.f32 %v7382_v48, %v837_v55 }
 0x3c2   : > { %6684 = vtanh.f32 %v846_v54 }
 0x3c3   : > { %6686 = vtanh.f32 %v838_v56 }
 0x3c4   : > { %6688 = vtanh.f32 %v648_v0 }
 0x3c5   : > { %6690 = vtanh.f32 %v640_v2 }
 0x3c6   : > { %6692 = vtanh.f32 %v651_v5 }
 0x3c7   : > { %6694 = vtanh.f32 %v643_v8 }
 0x3ca   : > { %v6681_v57 = vpop.eup %6680 }
 0x3cb   : > { %v6683_v58 = vpop.eup %6682 }
 0x3cc   : > { %v6685_v59 = vpop.eup %6684 }
 0x3cd   : > { %v6687_v60 = vpop.eup %6686  ;;  %v854_v61 = vpack.c.bf16 %v6685_v59, %v6681_v57 }
 0x3ce   : > { %v853_v62 = vpack.c.bf16 %v6687_v60, %v6683_v58  ;;  %v6689_v11 = vpop.eup %6688 }
 0x3cf   : > { %v6691_v12 = vpop.eup %6690 }
 0x3d0   : > { %861 = vxpose.xlu1.c.b16.start [1/2] (short) (narrow) %v853_v62, 32  ;;  %v6693_v13 = vpop.eup %6692 }
 0x3d1   : > { %v6695_v15 = vpop.eup %6694  ;;  %v665_v16 = vpack.c.bf16 %v6693_v13, %v6689_v11 }
 0x3d2   : > { %v664_v17 = vpack.c.bf16 %v6695_v15, %v6691_v12 }
 0x3d3   : > { %670 = vst.msk [vmem:[#allocation2 + $0x18] sm:$0xff] %vm666_vm2, %v665_v16 }
 0x3d4   : > { %862 = vxpose.xlu1.c.b16.end [2/2] (short) (narrow) %v854_v61, 32  ;;  %669 = vst.msk [vmem:[#allocation2 + $0x10] sm:$0xff] %vm666_vm2, %v664_v17 }
 0x436   : > { %v869_v9 = vpop.trf.xlu1 }
 0x437   : > { %6237 = vmatprep.mubr.msk.bf16.mxu0 %vm666_vm2, %v869_v9 }
 0x43a   : > { %v870_v14 = vpop.trf.xlu1 }
 0x43b   : > { %6238 = vmatmul.mubr.msk.bf16.vlgmr.msra.gmra.mrb[8].mxu0 %vm666_vm2, %v870_v14 }
 0x43c   : > { %6250 = vmatpush3.bf16.msra.mxu0 %v7433_v46 }
 0x43d   : > { %6251 = vmatprep.subr.bf16.mxu0 %v7438_v49 }
 0x440   : > { %6252 = vmatpush3.bf16.msra.mxu0 %v7438_v49 }
 0x441   : > { %6263 = vmatprep.subr.bf16.mxu0 %v7327_v23 }
 0x50e   : > { %v6239_v20 = vpop.f32.mrb[8].mxu0 }
 0x50f   : > { %v938_v21 = vadd.f32 %v6239_v20, %v7415_v19  ;;  %v929_v22 = vpop.f32.mrb[9].mxu0 }
 0x510   : > { %v930_v26 = vadd.f32 %v7415_v19, %v929_v22  ;;  %v6240_v27 = vpop.f32.mrb[10].mxu0 }
 0x511   : > { %6696 = vtanh.f32 %v938_v21  ;;  %v941_v28 = vadd.f32 %v6240_v27, %v7415_v19  ;;  %v932_v29 = vpop.f32.mrb[11].mxu0  ;;  %v7487_v27 = vld [vmem:[%s9465_s12] ss:$0 sm:$0xff] }
 0x512   : > { %6698 = vtanh.f32 %v930_v26  ;;  %v933_v30 = vadd.f32 %v7415_v19, %v932_v29 }
 0x513   : > { %6700 = vtanh.f32 %v941_v28 }
 0x514   : > { %6702 = vtanh.f32 %v933_v30 }
 0x51b   : > { %v6697_v31 = vpop.eup %6696 }
 0x51c   : > { %v6699_v32 = vpop.eup %6698 }
 0x51d   : > { %v6701_v33 = vpop.eup %6700 }
 0x51e   : > { %v6703_v36 = vpop.eup %6702  ;;  %v949_v39 = vpack.c.bf16 %v6701_v33, %v6697_v31 }
 0x51f   : > { %v948_v40 = vpack.c.bf16 %v6703_v36, %v6699_v32 }
 0x521   : > { %956 = vxpose.xlu1.c.b16.start [1/2] (short) (narrow) %v948_v40, 32 }
 0x525   : > { %957 = vxpose.xlu1.c.b16.end [2/2] (short) (narrow) %v949_v39, 32 }
 0x587   : > { %v964_v41 = vpop.trf.xlu1 }
 0x588   : > { %6245 = vmatprep.mubr.msk.bf16.mxu1 %vm666_vm2, %v964_v41 }
 0x58b   : > { %v965_v43 = vpop.trf.xlu1 }
 0x58c   : > { %6246 = vmatmul.mubr.msk.bf16.vlgmr.msra.gmra.mrb[8].mxu1 %vm666_vm2, %v965_v43 }
 0x58d   : > { %6258 = vmatpush3.bf16.msra.mxu1 %v7315_v10  ;;  %6259 = vmatprep.mubr.msk.bf16.mxu1 %vm694_vm3, %v1158_v42 }
 0x58e   : > { %6271 = vmatprep.subr.bf16.mxu1 %v7364_v44 }
 0x594   : > { %6260 = vmatmul.mubr.msk.bf16.vlgmr.msra.gmra.mrb[12].mxu1 %vm694_vm3, %v1159_v45 }
 0x595   : > { %6272 = vmatpush3.bf16.msra.mxu1 %v7364_v44 }
 0x596   : > { %6273 = vmatprep.subr.bf16.mxu1 %v7371_v47 }
 0x599   : > { %6274 = vmatpush3.bf16.msra.mxu1 %v7371_v47 }
 0x59a   : > { %6287 = vmatprep.subr.bf16.mxu1 %v7433_v46 }
 0x65f   : > { %v6247_v51 = vpop.f32.mrb[8].mxu1 }
 0x660   : > { %v1033_v52 = vadd.f32 %v6247_v51, %v7449_v50  ;;  %v1024_v53 = vpop.f32.mrb[9].mxu1 }
 0x661   : > { %v1025_v54 = vadd.f32 %v7449_v50, %v1024_v53  ;;  %v6248_v55 = vpop.f32.mrb[10].mxu1 }
 0x662   : > { %6704 = vtanh.f32 %v1033_v52  ;;  %v1036_v56 = vadd.f32 %v6248_v55, %v7449_v50  ;;  %v1027_v57 = vpop.f32.mrb[11].mxu1 }
 0x663   : > { %6706 = vtanh.f32 %v1025_v54  ;;  %v1028_v58 = vadd.f32 %v7449_v50, %v1027_v57 }
 0x664   : > { %6708 = vtanh.f32 %v1036_v56 }
 0x665   : > { %6710 = vtanh.f32 %v1028_v58 }
 0x667   : > { %v6261_v59 = vpop.f32.mrb[12].mxu1 }
 0x668   : > { %v1206_v60 = vpop.f32.mrb[13].mxu1  ;;  %v1215_v5 = vadd.f32 %v6261_v59, %v7341_v25 }
 0x669   : > { %v1207_v61 = vadd.f32 %v7341_v25, %v1206_v60  ;;  %v6262_v62 = vpop.f32.mrb[14].mxu1 }
 0x66a   : > { %v1209_v63 = vpop.f32.mrb[15].mxu1  ;;  %v1218_v0 = vadd.f32 %v6262_v62, %v7341_v25 }
 0x66b   : > { %v1210_v1 = vadd.f32 %v7341_v25, %v1209_v63  ;;  %6712 = vtanh.f32 %v1207_v61 }
 0x66c   : > { %v6705_v2 = vpop.eup %6704 }
 0x66d   : > { %v6707_v4 = vpop.eup %6706  ;;  %6714 = vtanh.f32 %v1210_v1 }
 0x66e   : > { %v6709_v6 = vpop.eup %6708  ;;  %6716 = vtanh.f32 %v1218_v0 }
 0x66f   : > { %v6711_v8 = vpop.eup %6710  ;;  %v1044_v9 = vpack.c.bf16 %v6709_v6, %v6705_v2  ;;  %6718 = vtanh.f32 %v1215_v5 }
 0x670   : > { %v1043_v11 = vpack.c.bf16 %v6711_v8, %v6707_v4 }
 0x672   : > { %1051 = vxpose.xlu1.c.b16.start [1/2] (short) (narrow) %v1043_v11, 32 }
 0x675   : > { %v7459_v12 = vpop.eup %6712 }
 0x676   : > { %1052 = vxpose.xlu1.c.b16.end [2/2] (short) (narrow) %v1044_v9, 32 }
 0x677   : > { %v7461_v13 = vpop.eup %6714 }
 0x678   : > { %v1225_v14 = vpack.c.bf16 %v7461_v13, %v7459_v12  ;;  %v7465_v15 = vpop.eup %6716 }
 0x679   : > { %v7467_v16 = vpop.eup %6718 }
 0x67a   : > { %1227 = vxpose.xlu0.c.b16.start [1/2] (short) (narrow) %v1225_v14, 32  ;;  %v1226_v17 = vpack.c.bf16 %v7465_v15, %v7467_v16 }
 0x67e   : > { %1228 = vxpose.xlu0.c.b16.end [2/2] (short) (narrow) %v1226_v17, 32 }
 0x6d8   : > { %v1059_v20 = vpop.trf.xlu1 }
 0x6d9   : > { %6253 = vmatprep.mubr.msk.bf16.mxu0 %vm666_vm2, %v1059_v20 }
 0x6dc   : > { %v1060_v21 = vpop.trf.xlu1 }
 0x6dd   : > { %6254 = vmatmul.mubr.msk.bf16.vlgmr.msra.gmra.mrb[12].mxu0 %vm666_vm2, %v1060_v21 }
 0x6de   : > { %6264 = vmatpush3.bf16.msra.mxu0 %v7327_v23 }
 0x6df   : > { %6265 = vmatprep.subr.bf16.mxu0 %v7332_v24 }
 0x6e0   : > { %v1235_v22 = vpop.trf.xlu0 }
 0x6e1   : > { %6267 = vmatprep.mubr.msk.bf16.mxu0 %vm666_vm2, %v1235_v22 }
 0x6e2   : > { %6266 = vmatpush3.bf16.msra.mxu0 %v7332_v24 }
 0x6e3   : > { %6279 = vmatprep.subr.bf16.mxu0 %v7399_v3 }
 0x6e4   : > { %v1236_v26 = vpop.trf.xlu0 }
 0x6e5   : > { %6268 = vmatmul.mubr.msk.bf16.vlgmr.msra.gmra.mrb[16].mxu0 %vm666_vm2, %v1236_v26 }
 0x6e6   : > { %6280 = vmatpush3.bf16.msra.mxu0 %v7399_v3 }
 0x6e7   : > { %6281 = vmatprep.subr.bf16.mxu0 %v7404_v18 }
 0x6ea   : > { %6282 = vmatpush3.bf16.msra.mxu0 %v7404_v18 }
 0x6eb   : > { %6525 = vmatprep.subr.msk.bf16.mxu0 %vm701_vm1, %v7308_v7 }
 0x7b0   : > { %v6255_v28 = vpop.f32.mrb[12].mxu0 }
 0x7b1   : > { %v1128_v29 = vadd.f32 %v6255_v28, %v7487_v27  ;;  %v1119_v30 = vpop.f32.mrb[13].mxu0 }
 0x7b2   : > { %v1120_v31 = vadd.f32 %v7487_v27, %v1119_v30  ;;  %v6256_v32 = vpop.f32.mrb[14].mxu0 }
 0x7b3   : > { %6720 = vtanh.f32 %v1128_v29  ;;  %v1131_v33 = vadd.f32 %v6256_v32, %v7487_v27  ;;  %v1122_v36 = vpop.f32.mrb[15].mxu0 }
 0x7b4   : > { %6722 = vtanh.f32 %v1120_v31  ;;  %v1123_v39 = vadd.f32 %v7487_v27, %v1122_v36 }
 0x7b5   : > { %6724 = vtanh.f32 %v1131_v33 }
 0x7b6   : > { %6726 = vtanh.f32 %v1123_v39 }
 0x7b8   : > { %v6269_v40 = vpop.f32.mrb[16].mxu0 }
 0x7b9   : > { %v1292_v41 = vadd.f32 %v6269_v40, %v7382_v48  ;;  %v1283_v42 = vpop.f32.mrb[17].mxu0 }
 0x7ba   : > { %v1284_v43 = vadd.f32 %v7382_v48, %v1283_v42  ;;  %v6270_v45 = vpop.f32.mrb[18].mxu0 }
 0x7bb   : > { %6728 = vtanh.f32 %v1292_v41  ;;  %v1295_v51 = vadd.f32 %v6270_v45, %v7382_v48  ;;  %v1286_v52 = vpop.f32.mrb[19].mxu0 }
 0x7bc   : > { %6730 = vtanh.f32 %v1284_v43  ;;  %v1287_v53 = vadd.f32 %v7382_v48, %v1286_v52 }
 0x7bd   : > { %v6721_v54 = vpop.eup %6720  ;;  %6732 = vtanh.f32 %v1295_v51 }
 0x7be   : > { %v6723_v55 = vpop.eup %6722  ;;  %v1140_v56 = vadd.f32 %v6721_v54, %v7355_v38  ;;  %6734 = vtanh.f32 %v1287_v53 }
 0x7bf   : > { %v6725_v57 = vpop.eup %6724  ;;  %v1138_v58 = vadd.f32 %v6723_v55, %v7347_v34  ;;  %v1542_v34 = vld [vmem:[#allocation2 + $0x8] sm:$0xf] }
 0x7c0   : > { %v6727_v59 = vpop.eup %6726  ;;  %1144 = vst.msk [vmem:[#allocation3 + $0x10] sm:$0xff] %vm666_vm2, %v1140_v56  ;;  %v1141_v60 = vadd.f32 %v6725_v57, %v7353_v37 }
 0x7c1   : > { %1142 = vst.msk [vmem:[#allocation3] sm:$0xff] %vm666_vm2, %v1138_v58  ;;  %v1139_v61 = vadd.f32 %v6727_v59, %v7349_v35 }
 0x7c2   : > { %1145 = vst.msk [vmem:[#allocation3 + $0x18] sm:$0xff] %vm666_vm2, %v1141_v60 }
 0x7c3   : > { %1143 = vst.msk [vmem:[#allocation3 + $0x8] sm:$0xff] %vm666_vm2, %v1139_v61 }
 0x7c5   : > { %v6729_v62 = vpop.eup %6728 }
 0x7c6   : > { %v6731_v63 = vpop.eup %6730 }
 0x7c7   : > { %v6733_v38 = vpop.eup %6732 }
 0x7c8   : > { %v6735_v0 = vpop.eup %6734  ;;  %v1303_v1 = vpack.c.bf16 %v6733_v38, %v6729_v62 }
 0x7c9   : > { %v1302_v2 = vpack.c.bf16 %v6735_v0, %v6731_v63 }
 0x7cb   : > { %1304 = vxpose.xlu1.c.b16.start [1/2] (short) (narrow) %v1302_v2, 32 }
 0x7cf   : > { %1305 = vxpose.xlu1.c.b16.end [2/2] (short) (narrow) %v1303_v1, 32 }
 0x7d3   : > { %1543 = vxpose.xlu1.c.b16.start.end [1/1] (short) (narrow) %v1542_v34, 32 }
 0x831   : > { %v1312_v4 = vpop.trf.xlu1 }
 0x832   : > { %6275 = vmatprep.mubr.msk.bf16.mxu1 %vm666_vm2, %v1312_v4 }
 0x835   : > { %v1313_v37 = vpop.trf.xlu1 }
 0x836   : > { %6276 = vmatmul.mubr.msk.bf16.vlgmr.msra.gmra.mrb[16].mxu1 %vm666_vm2, %v1313_v37 }
 0x837   : > { %6288 = vmatpush3.bf16.msra.mxu1 %v7433_v46 }
 0x838   : > { %6289 = vmatprep.subr.bf16.mxu1 %v7438_v49 }
 0x839   : > { %v1551_v31 = vpop.trf.xlu1 }
 0x83b   : > { %6290 = vmatpush3.bf16.msra.mxu1 %v7438_v49 }
 0x83c   : > { %6301 = vmatprep.subr.bf16.mxu1 %v7327_v23 }
 0x83d   : > { %v1552_v33 = vpop.trf.xlu1 }
 0x909   : > { %v6277_v35 = vpop.f32.mrb[16].mxu1 }
 0x90a   : > { %v1369_v5 = vadd.f32 %v6277_v35, %v7415_v19  ;;  %v1360_v6 = vpop.f32.mrb[17].mxu1 }
 0x90b   : > { %v1361_v8 = vadd.f32 %v7415_v19, %v1360_v6  ;;  %v6278_v9 = vpop.f32.mrb[18].mxu1 }
 0x90c   : > { %6736 = vtanh.f32 %v1369_v5  ;;  %v1372_v11 = vadd.f32 %v6278_v9, %v7415_v19  ;;  %v1363_v14 = vpop.f32.mrb[19].mxu1 }
 0x90d   : > { %6738 = vtanh.f32 %v1361_v8  ;;  %v1364_v17 = vadd.f32 %v7415_v19, %v1363_v14 }
 0x90e   : > { %6740 = vtanh.f32 %v1372_v11 }
 0x90f   : > { %6742 = vtanh.f32 %v1364_v17 }
 0x916   : > { %v6737_v20 = vpop.eup %6736 }
 0x917   : > { %v6739_v21 = vpop.eup %6738 }
 0x918   : > { %v6741_v22 = vpop.eup %6740 }
 0x919   : > { %v6743_v26 = vpop.eup %6742  ;;  %v1380_v28 = vpack.c.bf16 %v6741_v22, %v6737_v20 }
 0x91a   : > { %v1379_v29 = vpack.c.bf16 %v6743_v26, %v6739_v21 }
 0x91c   : > { %1381 = vxpose.xlu0.c.b16.start [1/2] (short) (narrow) %v1379_v29, 32 }
 0x920   : > { %1382 = vxpose.xlu0.c.b16.end [2/2] (short) (narrow) %v1380_v28, 32 }
 0x982   : > { %v1389_v30 = vpop.trf.xlu0 }
 0x983   : > { %6283 = vmatprep.mubr.msk.bf16.mxu0 %vm666_vm2, %v1389_v30 }
 0x986   : > { %v1390_v32 = vpop.trf.xlu0 }
 0x987   : > { %6284 = vmatmul.mubr.msk.bf16.vlgmr.msra.gmra.mrb[20].mxu0 %vm666_vm2, %v1390_v32 }
 0x988   : > { %6296 = vmatpush3.bf16.msra.mxu0 %v7315_v10  ;;  %6297 = vmatprep.mubr.msk.bf16.mxu0 %vm694_vm3, %v1551_v31 }
 0x989   : > { %6309 = vmatprep.subr.bf16.mxu0 %v7364_v44 }
 0x98f   : > { %6298 = vmatmul.mubr.msk.bf16.vlgmr.msra.gmra.mrb[24].mxu0 %vm694_vm3, %v1552_v33 }
 0x990   : > { %6310 = vmatpush3.bf16.msra.mxu0 %v7364_v44 }
 0x991   : > { %6311 = vmatprep.subr.bf16.mxu0 %v7371_v47 }
 0x994   : > { %6312 = vmatpush3.bf16.msra.mxu0 %v7371_v47 }
 0x995   : > { %6325 = vmatprep.subr.bf16.mxu0 %v7433_v46 }
 0xa5a   : > { %v6285_v36 = vpop.f32.mrb[20].mxu0 }
 0xa5b   : > { %v1446_v39 = vadd.f32 %v6285_v36, %v7449_v50  ;;  %v1437_v40 = vpop.f32.mrb[21].mxu0 }
 0xa5c   : > { %v1438_v41 = vadd.f32 %v7449_v50, %v1437_v40  ;;  %v6286_v42 = vpop.f32.mrb[22].mxu0 }
 0xa5d   : > { %6744 = vtanh.f32 %v1446_v39  ;;  %v1449_v43 = vadd.f32 %v6286_v42, %v7449_v50  ;;  %v1440_v45 = vpop.f32.mrb[23].mxu0 }
 0xa5e   : > { %6746 = vtanh.f32 %v1438_v41  ;;  %v1441_v51 = vadd.f32 %v7449_v50, %v1440_v45 }
 0xa5f   : > { %6748 = vtanh.f32 %v1449_v43 }
 0xa60   : > { %6750 = vtanh.f32 %v1441_v51 }
 0xa62   : > { %v6299_v52 = vpop.f32.mrb[24].mxu0 }
 0xa63   : > { %v1599_v53 = vpop.f32.mrb[25].mxu0  ;;  %v1608_v61 = vadd.f32 %v6299_v52, %v7341_v25 }
 0xa64   : > { %v1600_v54 = vadd.f32 %v7341_v25, %v1599_v53  ;;  %v6300_v55 = vpop.f32.mrb[26].mxu0 }
 0xa65   : > { %v1602_v56 = vpop.f32.mrb[27].mxu0  ;;  %v1611_v57 = vadd.f32 %v6300_v55, %v7341_v25 }
 0xa66   : > { %v1603_v58 = vadd.f32 %v7341_v25, %v1602_v56  ;;  %6752 = vtanh.f32 %v1600_v54 }
 0xa67   : > { %v6745_v59 = vpop.eup %6744 }
 0xa68   : > { %v6747_v60 = vpop.eup %6746  ;;  %6754 = vtanh.f32 %v1603_v58 }
 0xa69   : > { %v6749_v62 = vpop.eup %6748  ;;  %6756 = vtanh.f32 %v1611_v57 }
 0xa6a   : > { %v6751_v63 = vpop.eup %6750  ;;  %v1457_v38 = vpack.c.bf16 %v6749_v62, %v6745_v59  ;;  %6758 = vtanh.f32 %v1608_v61 }
 0xa6b   : > { %v1456_v0 = vpack.c.bf16 %v6751_v63, %v6747_v60 }
 0xa6d   : > { %1458 = vxpose.xlu0.c.b16.start [1/2] (short) (narrow) %v1456_v0, 32 }
 0xa70   : > { %v7533_v1 = vpop.eup %6752 }
 0xa71   : > { %1459 = vxpose.xlu0.c.b16.end [2/2] (short) (narrow) %v1457_v38, 32 }
 0xa72   : > { %v7535_v2 = vpop.eup %6754 }
 0xa73   : > { %v1618_v34 = vpack.c.bf16 %v7535_v2, %v7533_v1  ;;  %v7539_v4 = vpop.eup %6756 }
 0xa74   : > { %v7541_v37 = vpop.eup %6758 }
 0xa75   : > { %1620 = vxpose.xlu1.c.b16.start [1/2] (short) (narrow) %v1618_v34, 32  ;;  %v1619_v35 = vpack.c.bf16 %v7539_v4, %v7541_v37 }
 0xa79   : > { %1621 = vxpose.xlu1.c.b16.end [2/2] (short) (narrow) %v1619_v35, 32 }
 0xad3   : > { %v1466_v5 = vpop.trf.xlu0 }
 0xad4   : > { %6291 = vmatprep.mubr.msk.bf16.mxu1 %vm666_vm2, %v1466_v5 }
 0xad7   : > { %v1467_v6 = vpop.trf.xlu0 }
 0xad8   : > { %6292 = vmatmul.mubr.msk.bf16.vlgmr.msra.gmra.mrb[20].mxu1 %vm666_vm2, %v1467_v6 }
 0xad9   : > { %6302 = vmatpush3.bf16.msra.mxu1 %v7327_v23 }
 0xada   : > { %6303 = vmatprep.subr.bf16.mxu1 %v7332_v24 }
 0xadb   : > { %v1628_v8 = vpop.trf.xlu1 }
 0xadc   : > { %6305 = vmatprep.mubr.msk.bf16.mxu1 %vm666_vm2, %v1628_v8 }
 0xadd   : > { %6304 = vmatpush3.bf16.msra.mxu1 %v7332_v24 }
 0xade   : > { %6317 = vmatprep.subr.bf16.mxu1 %v7399_v3 }
 0xadf   : > { %v1629_v9 = vpop.trf.xlu1 }
 0xae0   : > { %6306 = vmatmul.mubr.msk.bf16.vlgmr.msra.gmra.mrb[24].mxu1 %vm666_vm2, %v1629_v9 }
 0xae1   : > { %6318 = vmatpush3.bf16.msra.mxu1 %v7399_v3 }
 0xae2   : > { %6319 = vmatprep.subr.bf16.mxu1 %v7404_v18 }
 0xae5   : > { %6320 = vmatpush3.bf16.msra.mxu1 %v7404_v18 }
 0xae6   : > { %6526 = vmatprep.subr.msk.bf16.mxu1 %vm701_vm1, %v7308_v7 }
 0xbab   : > { %v6293_v11 = vpop.f32.mrb[20].mxu1 }
 0xbac   : > { %v1523_v14 = vadd.f32 %v6293_v11, %v7487_v27  ;;  %v1514_v17 = vpop.f32.mrb[21].mxu1 }
 0xbad   : > { %v1515_v20 = vadd.f32 %v7487_v27, %v1514_v17  ;;  %v6294_v21 = vpop.f32.mrb[22].mxu1 }
 0xbae   : > { %6760 = vtanh.f32 %v1523_v14  ;;  %v1526_v22 = vadd.f32 %v6294_v21, %v7487_v27  ;;  %v1517_v26 = vpop.f32.mrb[23].mxu1 }
 0xbaf   : > { %6762 = vtanh.f32 %v1515_v20  ;;  %v1518_v28 = vadd.f32 %v7487_v27, %v1517_v26 }
 0xbb0   : > { %6764 = vtanh.f32 %v1526_v22 }
 0xbb1   : > { %6766 = vtanh.f32 %v1518_v28 }
 0xbb3   : > { %v6307_v29 = vpop.f32.mrb[24].mxu1 }
 0xbb4   : > { %v1685_v30 = vadd.f32 %v6307_v29, %v7382_v48  ;;  %v1676_v7 = vpop.f32.mrb[25].mxu1 }
 0xbb5   : > { %v1677_v31 = vadd.f32 %v7382_v48, %v1676_v7  ;;  %v6308_v32 = vpop.f32.mrb[26].mxu1 }
 0xbb6   : > { %6768 = vtanh.f32 %v1685_v30  ;;  %v1688_v33 = vadd.f32 %v6308_v32, %v7382_v48  ;;  %v1679_v36 = vpop.f32.mrb[27].mxu1 }
 0xbb7   : > { %6770 = vtanh.f32 %v1677_v31  ;;  %v1680_v39 = vadd.f32 %v7382_v48, %v1679_v36 }
 0xbb8   : > { %v6761_v40 = vpop.eup %6760  ;;  %6772 = vtanh.f32 %v1688_v33 }
 0xbb9   : > { %v6763_v41 = vpop.eup %6762  ;;  %v1535_v42 = vadd.f32 %v6761_v40, %v7467_v16  ;;  %6774 = vtanh.f32 %v1680_v39 }
 0xbba   : > { %v6765_v43 = vpop.eup %6764  ;;  %v1533_v45 = vadd.f32 %v6763_v41, %v7459_v12  ;;  %v1935_v12 = vld [vmem:[#allocation2 + $0x8] sm:$0xf0] }
 0xbbb   : > { %v6767_v51 = vpop.eup %6766  ;;  %1540 = vst.msk [vmem:[#allocation3 + $0x30] sm:$0xff] %vm666_vm2, %v1535_v42  ;;  %v1536_v52 = vadd.f32 %v6765_v43, %v7465_v15  ;;  %v1937_v59 = vrot.slane %v1935_v12, 4 }
 0xbbc   : > { %1538 = vst.msk [vmem:[#allocation3 + $0x20] sm:$0xff] %vm666_vm2, %v1533_v45  ;;  %v1534_v53 = vadd.f32 %v6767_v51, %v7461_v13 }
 0xbbd   : > { %1541 = vst.msk [vmem:[#allocation3 + $0x38] sm:$0xff] %vm666_vm2, %v1536_v52 }
 0xbbe   : > { %1539 = vst.msk [vmem:[#allocation3 + $0x28] sm:$0xff] %vm666_vm2, %v1534_v53 }
 0xbc0   : > { %v6769_v54 = vpop.eup %6768 }
 0xbc1   : > { %v6771_v55 = vpop.eup %6770 }
 0xbc2   : > { %v6773_v16 = vpop.eup %6772 }
 0xbc3   : > { %v6775_v56 = vpop.eup %6774  ;;  %v1696_v57 = vpack.c.bf16 %v6773_v16, %v6769_v54 }
 0xbc4   : > { %v1695_v58 = vpack.c.bf16 %v6775_v56, %v6771_v55 }
 0xbc6   : > { %1697 = vxpose.xlu0.c.b16.start [1/2] (short) (narrow) %v1695_v58, 32 }
 0xbca   : > { %1698 = vxpose.xlu0.c.b16.end [2/2] (short) (narrow) %v1696_v57, 32 }
 0xbce   : > { %1939 = vxpose.xlu0.c.b16.start.end [1/1] (short) (narrow) %v1937_v59, 32 }
 0xc2c   : > { %v1705_v15 = vpop.trf.xlu0 }
 0xc2d   : > { %6313 = vmatprep.mubr.msk.bf16.mxu0 %vm666_vm2, %v1705_v15 }
 0xc30   : > { %v1706_v60 = vpop.trf.xlu0 }
 0xc31   : > { %6314 = vmatmul.mubr.msk.bf16.vlgmr.msra.gmra.mrb[28].mxu0 %vm666_vm2, %v1706_v60 }
 0xc32   : > { %6326 = vmatpush3.bf16.msra.mxu0 %v7433_v46 }
 0xc33   : > { %6327 = vmatprep.subr.bf16.mxu0 %v7438_v49 }
 0xc34   : > { %v1947_v20 = vpop.trf.xlu0 }
 0xc36   : > { %6328 = vmatpush3.bf16.msra.mxu0 %v7438_v49 }
 0xc37   : > { %6339 = vmatprep.subr.bf16.mxu0 %v7327_v23 }
 0xc38   : > { %v1948_v22 = vpop.trf.xlu0 }
 0xd04   : > { %v6315_v13 = vpop.f32.mrb[28].mxu0 }
 0xd05   : > { %v1762_v61 = vadd.f32 %v6315_v13, %v7415_v19  ;;  %v1753_v62 = vpop.f32.mrb[29].mxu0 }
 0xd06   : > { %v1754_v63 = vadd.f32 %v7415_v19, %v1753_v62  ;;  %v6316_v38 = vpop.f32.mrb[30].mxu0 }
 0xd07   : > { %6776 = vtanh.f32 %v1762_v61  ;;  %v1765_v0 = vadd.f32 %v6316_v38, %v7415_v19  ;;  %v1756_v34 = vpop.f32.mrb[31].mxu0 }
 0xd08   : > { %6778 = vtanh.f32 %v1754_v63  ;;  %v1757_v35 = vadd.f32 %v7415_v19, %v1756_v34 }
 0xd09   : > { %6780 = vtanh.f32 %v1765_v0 }
 0xd0a   : > { %6782 = vtanh.f32 %v1757_v35 }
 0xd11   : > { %v6777_v5 = vpop.eup %6776 }
 0xd12   : > { %v6779_v6 = vpop.eup %6778 }
 0xd13   : > { %v6781_v8 = vpop.eup %6780 }
 0xd14   : > { %v6783_v9 = vpop.eup %6782  ;;  %v1773_v11 = vpack.c.bf16 %v6781_v8, %v6777_v5 }
 0xd15   : > { %v1772_v14 = vpack.c.bf16 %v6783_v9, %v6779_v6 }
 0xd17   : > { %1774 = vxpose.xlu1.c.b16.start [1/2] (short) (narrow) %v1772_v14, 32 }
 0xd1b   : > { %1775 = vxpose.xlu1.c.b16.end [2/2] (short) (narrow) %v1773_v11, 32 }
 0xd7d   : > { %v1782_v17 = vpop.trf.xlu1 }
 0xd7e   : > { %6321 = vmatprep.mubr.msk.bf16.mxu1 %vm666_vm2, %v1782_v17 }
 0xd81   : > { %v1783_v21 = vpop.trf.xlu1 }
 0xd82   : > { %6322 = vmatmul.mubr.msk.bf16.vlgmr.msra.gmra.mrb[28].mxu1 %vm666_vm2, %v1783_v21 }
 0xd83   : > { %6334 = vmatpush3.bf16.msra.mxu1 %v7315_v10  ;;  %6335 = vmatprep.mubr.msk.bf16.mxu1 %vm694_vm3, %v1947_v20 }
 0xd84   : > { %6347 = vmatprep.subr.bf16.mxu1 %v7364_v44 }
 0xd8a   : > { %6336 = vmatmul.mubr.msk.bf16.vlgmr.msra.gmra.mrb[32].mxu1 %vm694_vm3, %v1948_v22 }
 0xd8b   : > { %6348 = vmatpush3.bf16.msra.mxu1 %v7364_v44 }
 0xd8c   : > { %6349 = vmatprep.subr.bf16.mxu1 %v7371_v47 }
 0xd8f   : > { %6350 = vmatpush3.bf16.msra.mxu1 %v7371_v47 }
 0xd90   : > { %6363 = vmatprep.subr.bf16.mxu1 %v7433_v46 }
 0xe55   : > { %v6323_v26 = vpop.f32.mrb[28].mxu1 }
 0xe56   : > { %v1839_v28 = vadd.f32 %v6323_v26, %v7449_v50  ;;  %v1830_v29 = vpop.f32.mrb[29].mxu1 }
 0xe57   : > { %v1831_v30 = vadd.f32 %v7449_v50, %v1830_v29  ;;  %v6324_v7 = vpop.f32.mrb[30].mxu1 }
 0xe58   : > { %6784 = vtanh.f32 %v1839_v28  ;;  %v1842_v31 = vadd.f32 %v6324_v7, %v7449_v50  ;;  %v1833_v32 = vpop.f32.mrb[31].mxu1 }
 0xe59   : > { %6786 = vtanh.f32 %v1831_v30  ;;  %v1834_v44 = vadd.f32 %v7449_v50, %v1833_v32 }
 0xe5a   : > { %6788 = vtanh.f32 %v1842_v31 }
 0xe5b   : > { %6790 = vtanh.f32 %v1834_v44 }
 0xe5d   : > { %v6337_v33 = vpop.f32.mrb[32].mxu1 }
 0xe5e   : > { %v1995_v47 = vpop.f32.mrb[33].mxu1  ;;  %v2004_v51 = vadd.f32 %v6337_v33, %v7341_v25 }
 0xe5f   : > { %v1996_v36 = vadd.f32 %v7341_v25, %v1995_v47  ;;  %v6338_v39 = vpop.f32.mrb[34].mxu1 }
 0xe60   : > { %v1998_v40 = vpop.f32.mrb[35].mxu1  ;;  %v2007_v41 = vadd.f32 %v6338_v39, %v7341_v25 }
 0xe61   : > { %v1999_v42 = vadd.f32 %v7341_v25, %v1998_v40  ;;  %6792 = vtanh.f32 %v1996_v36 }
 0xe62   : > { %v6785_v43 = vpop.eup %6784 }
 0xe63   : > { %v6787_v45 = vpop.eup %6786  ;;  %6794 = vtanh.f32 %v1999_v42 }
 0xe64   : > { %v6789_v52 = vpop.eup %6788  ;;  %6796 = vtanh.f32 %v2007_v41 }
 0xe65   : > { %v6791_v53 = vpop.eup %6790  ;;  %v1850_v54 = vpack.c.bf16 %v6789_v52, %v6785_v43  ;;  %6798 = vtanh.f32 %v2004_v51 }
 0xe66   : > { %v1849_v55 = vpack.c.bf16 %v6791_v53, %v6787_v45 }
 0xe68   : > { %1851 = vxpose.xlu1.c.b16.start [1/2] (short) (narrow) %v1849_v55, 32 }
 0xe6b   : > { %v7602_v16 = vpop.eup %6792 }
 0xe6c   : > { %1852 = vxpose.xlu1.c.b16.end [2/2] (short) (narrow) %v1850_v54, 32 }
 0xe6d   : > { %v7604_v56 = vpop.eup %6794 }
 0xe6e   : > { %v2014_v57 = vpack.c.bf16 %v7604_v56, %v7602_v16  ;;  %v7608_v58 = vpop.eup %6796 }
 0xe6f   : > { %v7610_v25 = vpop.eup %6798 }
 0xe70   : > { %2016 = vxpose.xlu0.c.b16.start [1/2] (short) (narrow) %v2014_v57, 32  ;;  %v2015_v12 = vpack.c.bf16 %v7608_v58, %v7610_v25 }
 0xe74   : > { %2017 = vxpose.xlu0.c.b16.end [2/2] (short) (narrow) %v2015_v12, 32 }
 0xece   : > { %v1859_v59 = vpop.trf.xlu1 }
 0xecf   : > { %6329 = vmatprep.mubr.msk.bf16.mxu0 %vm666_vm2, %v1859_v59 }
 0xed2   : > { %v1860_v15 = vpop.trf.xlu1 }
 0xed3   : > { %6330 = vmatmul.mubr.msk.bf16.vlgmr.msra.gmra.mrb[32].mxu0 %vm666_vm2, %v1860_v15 }
 0xed4   : > { %6340 = vmatpush3.bf16.msra.mxu0 %v7327_v23  ;;  %v7628_v23 = vld [vmem:[%s9456_s3] sm:$0xf] }
 0xed5   : > { %6341 = vmatprep.subr.bf16.mxu0 %v7332_v24 }
 0xed6   : > { %v2024_v60 = vpop.trf.xlu0 }
 0xed7   : > { %6343 = vmatprep.mubr.msk.bf16.mxu0 %vm666_vm2, %v2024_v60  ;;  %v7678_v60 = vld [vmem:[%s9460_s7 + $0x8] sm:$0xff]  }
 0xed8   : > { %6342 = vmatpush3.bf16.msra.mxu0 %v7332_v24 }
 0xed9   : > { %6355 = vmatprep.subr.bf16.mxu0 %v7399_v3 }
 0xeda   : > { %v2025_v13 = vpop.trf.xlu0 }
 0xedb   : > { %6344 = vmatmul.mubr.msk.bf16.vlgmr.msra.gmra.mrb[36].mxu0 %vm666_vm2, %v2025_v13 }
 0xedc   : > { %6356 = vmatpush3.bf16.msra.mxu0 %v7399_v3 }
 0xedd   : > { %6357 = vmatprep.subr.bf16.mxu0 %v7404_v18 }
 0xee0   : > { %6358 = vmatpush3.bf16.msra.mxu0 %v7404_v18 }
 0xee1   : > { %6527 = vmatprep.subr.msk.bf16.mxu0 %vm701_vm1, %v7628_v23 }
 0xfa6   : > { %v6331_v24 = vpop.f32.mrb[32].mxu0 }
 0xfa7   : > { %v1916_v61 = vadd.f32 %v6331_v24, %v7487_v27  ;;  %v1907_v62 = vpop.f32.mrb[33].mxu0 }
 0xfa8   : > { %v1908_v63 = vadd.f32 %v7487_v27, %v1907_v62  ;;  %v6332_v38 = vpop.f32.mrb[34].mxu0 }
 0xfa9   : > { %6800 = vtanh.f32 %v1916_v61  ;;  %v1919_v3 = vadd.f32 %v6332_v38, %v7487_v27  ;;  %v1910_v0 = vpop.f32.mrb[35].mxu0 }
 0xfaa   : > { %6802 = vtanh.f32 %v1908_v63  ;;  %v1911_v18 = vadd.f32 %v7487_v27, %v1910_v0 }
 0xfab   : > { %6804 = vtanh.f32 %v1919_v3 }
 0xfac   : > { %6806 = vtanh.f32 %v1911_v18 }
 0xfae   : > { %v6345_v34 = vpop.f32.mrb[36].mxu0 }
 0xfaf   : > { %v2081_v35 = vadd.f32 %v6345_v34, %v7382_v48  ;;  %v2072_v5 = vpop.f32.mrb[37].mxu0 }
 0xfb0   : > { %v2073_v6 = vadd.f32 %v7382_v48, %v2072_v5  ;;  %v6346_v8 = vpop.f32.mrb[38].mxu0 }
 0xfb1   : > { %6808 = vtanh.f32 %v2081_v35  ;;  %v2084_v9 = vadd.f32 %v6346_v8, %v7382_v48  ;;  %v2075_v11 = vpop.f32.mrb[39].mxu0 }
 0xfb2   : > { %6810 = vtanh.f32 %v2073_v6  ;;  %v2076_v14 = vadd.f32 %v7382_v48, %v2075_v11 }
 0xfb3   : > { %v6801_v17 = vpop.eup %6800  ;;  %6812 = vtanh.f32 %v2084_v9 }
 0xfb4   : > { %v6803_v20 = vpop.eup %6802  ;;  %v1928_v21 = vadd.f32 %v6801_v17, %v7541_v37  ;;  %6814 = vtanh.f32 %v2076_v14 }
 0xfb5   : > { %v6805_v22 = vpop.eup %6804  ;;  %v1926_v26 = vadd.f32 %v6803_v20, %v7533_v1  ;;  %v2331_v1 = vld [vmem:[#allocation2 + $0x10] sm:$0xf] }
 0xfb6   : > { %v6807_v28 = vpop.eup %6806  ;;  %1933 = vst.msk [vmem:[#allocation3 + $0x50] sm:$0xff] %vm666_vm2, %v1928_v21  ;;  %v1929_v29 = vadd.f32 %v6805_v22, %v7539_v4 }
 0xfb7   : > { %1931 = vst.msk [vmem:[#allocation3 + $0x40] sm:$0xff] %vm666_vm2, %v1926_v26  ;;  %v1927_v30 = vadd.f32 %v6807_v28, %v7535_v2  ;;  %v7656_v2 = vld [vmem:[%s9458_s5] sm:$0xff]  }
 0xfb8   : > { %1934 = vst.msk [vmem:[#allocation3 + $0x58] sm:$0xff] %vm666_vm2, %v1929_v29 }
 0xfb9   : > { %1932 = vst.msk [vmem:[#allocation3 + $0x48] sm:$0xff] %vm666_vm2, %v1927_v30 }
 0xfbb   : > { %v6809_v48 = vpop.eup %6808 }
 0xfbc   : > { %v6811_v7 = vpop.eup %6810 }
 0xfbd   : > { %v6813_v37 = vpop.eup %6812 }
 0xfbe   : > { %v6815_v31 = vpop.eup %6814  ;;  %v2092_v32 = vpack.c.bf16 %v6813_v37, %v6809_v48 }
 0xfbf   : > { %v2091_v44 = vpack.c.bf16 %v6815_v31, %v6811_v7 }
 0xfc1   : > { %2093 = vxpose.xlu1.c.b16.start [1/2] (short) (narrow) %v2091_v44, 32 }
 0xfc5   : > { %2094 = vxpose.xlu1.c.b16.end [2/2] (short) (narrow) %v2092_v32, 32  ;;  %v7714_v32 = vld [vmem:[%s9458_s5 + $0x8] sm:$0xff]  }
 0xfc9   : > { %2332 = vxpose.xlu1.c.b16.start.end [1/1] (short) (narrow) %v2331_v1, 32  ;;  %v7722_v1 = vld [vmem:[%s9462_s9] sm:$0xff]  }
0x1027   : > { %v2101_v33 = vpop.trf.xlu1 }
0x1028   : > { %6351 = vmatprep.mubr.msk.bf16.mxu1 %vm666_vm2, %v2101_v33 }
0x102b   : > { %v2102_v4 = vpop.trf.xlu1 }
0x102c   : > { %6352 = vmatmul.mubr.msk.bf16.vlgmr.msra.gmra.mrb[36].mxu1 %vm666_vm2, %v2102_v4  ;;  %v7730_v4 = vld [vmem:[%s9462_s9 + $0x8] sm:$0xff]  }
0x102d   : > { %6364 = vmatpush3.bf16.msra.mxu1 %v7433_v46 }
0x102e   : > { %6365 = vmatprep.subr.bf16.mxu1 %v7438_v49 }
0x102f   : > { %v2340_v12 = vpop.trf.xlu1 }
0x1031   : > { %6366 = vmatpush3.bf16.msra.mxu1 %v7438_v49 }
0x1032   : > { %6377 = vmatprep.subr.bf16.mxu1 %v7656_v2 }
0x1033   : > { %v2341_v15 = vpop.trf.xlu1 }
0x10ff   : > { %v6353_v47 = vpop.f32.mrb[36].mxu1 }
0x1100   : > { %v2158_v36 = vadd.f32 %v6353_v47, %v7415_v19  ;;  %v2149_v39 = vpop.f32.mrb[37].mxu1 }
0x1101   : > { %v2150_v40 = vadd.f32 %v7415_v19, %v2149_v39  ;;  %v6354_v41 = vpop.f32.mrb[38].mxu1 }
0x1102   : > { %6816 = vtanh.f32 %v2158_v36  ;;  %v2161_v42 = vadd.f32 %v6354_v41, %v7415_v19  ;;  %v2152_v43 = vpop.f32.mrb[39].mxu1 }
0x1103   : > { %6818 = vtanh.f32 %v2150_v40  ;;  %v2153_v49 = vadd.f32 %v7415_v19, %v2152_v43  ;;  %v7670_v19 = vld [vmem:[%s9460_s7] sm:$0xff]  }
0x1104   : > { %6820 = vtanh.f32 %v2161_v42 }
0x1105   : > { %6822 = vtanh.f32 %v2153_v49 }
0x110c   : > { %v6817_v45 = vpop.eup %6816 }
0x110d   : > { %v6819_v51 = vpop.eup %6818 }
0x110e   : > { %v6821_v52 = vpop.eup %6820 }
0x110f   : > { %v6823_v53 = vpop.eup %6822  ;;  %v2169_v54 = vpack.c.bf16 %v6821_v52, %v6817_v45 }
0x1110   : > { %v2168_v55 = vpack.c.bf16 %v6823_v53, %v6819_v51  ;;  %v7743_v51 = vld [vmem:[%s9459_s6] ss:$0 sm:$0xff] }
0x1112   : > { %2170 = vxpose.xlu0.c.b16.start [1/2] (short) (narrow) %v2168_v55, 32 }
0x1116   : > { %2171 = vxpose.xlu0.c.b16.end [2/2] (short) (narrow) %v2169_v54, 32 }
0x1178   : > { %v2178_v57 = vpop.trf.xlu0 }
0x1179   : > { %6359 = vmatprep.mubr.msk.bf16.mxu0 %vm666_vm2, %v2178_v57 }
0x117c   : > { %v2179_v59 = vpop.trf.xlu0 }
0x117d   : > { %6360 = vmatmul.mubr.msk.bf16.vlgmr.msra.gmra.mrb[40].mxu0 %vm666_vm2, %v2179_v59 }
0x117e   : > { %6372 = vmatpush3.bf16.msra.mxu0 %v7315_v10  ;;  %6373 = vmatprep.mubr.msk.bf16.mxu0 %vm694_vm3, %v2340_v12 }
0x117f   : > { %6385 = vmatprep.subr.bf16.mxu0 %v7670_v19 }
0x1185   : > { %6374 = vmatmul.mubr.msk.bf16.vlgmr.msra.gmra.mrb[44].mxu0 %vm694_vm3, %v2341_v15 }
0x1186   : > { %6386 = vmatpush3.bf16.msra.mxu0 %v7670_v19 }
0x1187   : > { %6387 = vmatprep.subr.bf16.mxu0 %v7678_v60 }
0x118a   : > { %6388 = vmatpush3.bf16.msra.mxu0 %v7678_v60 }
0x118b   : > { %6401 = vmatprep.subr.bf16.mxu0 %v7433_v46  ;;  %v7690_v46 = vld [vmem:[%s9457_s4] ss:$0 sm:$0xff] }
0x1250   : > { %v6361_v13 = vpop.f32.mrb[40].mxu0 }
0x1251   : > { %v2235_v24 = vadd.f32 %v6361_v13, %v7449_v50  ;;  %v2226_v61 = vpop.f32.mrb[41].mxu0 }
0x1252   : > { %v2227_v62 = vadd.f32 %v7449_v50, %v2226_v61  ;;  %v6362_v63 = vpop.f32.mrb[42].mxu0 }
0x1253   : > { %6824 = vtanh.f32 %v2235_v24  ;;  %v2238_v38 = vadd.f32 %v6362_v63, %v7449_v50  ;;  %v2229_v3 = vpop.f32.mrb[43].mxu0 }
0x1254   : > { %6826 = vtanh.f32 %v2227_v62  ;;  %v2230_v0 = vadd.f32 %v7449_v50, %v2229_v3 }
0x1255   : > { %6828 = vtanh.f32 %v2238_v38 }
0x1256   : > { %6830 = vtanh.f32 %v2230_v0 }
0x1258   : > { %v6375_v18 = vpop.f32.mrb[44].mxu0 }
0x1259   : > { %v2388_v34 = vpop.f32.mrb[45].mxu0  ;;  %v2397_v14 = vadd.f32 %v7690_v46, %v6375_v18 }
0x125a   : > { %v2389_v35 = vadd.f32 %v7690_v46, %v2388_v34  ;;  %v6376_v5 = vpop.f32.mrb[46].mxu0 }
0x125b   : > { %v2391_v6 = vpop.f32.mrb[47].mxu0  ;;  %v2400_v8 = vadd.f32 %v7690_v46, %v6376_v5 }
0x125c   : > { %v2392_v9 = vadd.f32 %v7690_v46, %v2391_v6  ;;  %6832 = vtanh.f32 %v2389_v35 }
0x125d   : > { %v6825_v11 = vpop.eup %6824 }
0x125e   : > { %v6827_v50 = vpop.eup %6826  ;;  %6834 = vtanh.f32 %v2392_v9 }
0x125f   : > { %v6829_v17 = vpop.eup %6828  ;;  %6836 = vtanh.f32 %v2400_v8  ;;  %v7768_v8 = vld [vmem:[%s9464_s11 + $0x8] sm:$0xff]  }
0x1260   : > { %v6831_v20 = vpop.eup %6830  ;;  %v2246_v21 = vpack.c.bf16 %v6829_v17, %v6825_v11  ;;  %6838 = vtanh.f32 %v2397_v14  ;;  %v7776_v11 = vld [vmem:[%s9461_s8] ss:$0 sm:$0xff] }
0x1261   : > { %v2245_v22 = vpack.c.bf16 %v6831_v20, %v6827_v50 }
0x1263   : > { %2247 = vxpose.xlu0.c.b16.start [1/2] (short) (narrow) %v2245_v22, 32 }
0x1266   : > { %v7696_v26 = vpop.eup %6832 }
0x1267   : > { %2248 = vxpose.xlu0.c.b16.end [2/2] (short) (narrow) %v2246_v21, 32 }
0x1268   : > { %v7698_v28 = vpop.eup %6834 }
0x1269   : > { %v2407_v29 = vpack.c.bf16 %v7698_v28, %v7696_v26  ;;  %v7702_v30 = vpop.eup %6836 }
0x126a   : > { %v7704_v48 = vpop.eup %6838 }
0x126b   : > { %2409 = vxpose.xlu1.c.b16.start [1/2] (short) (narrow) %v2407_v29, 32  ;;  %v2408_v7 = vpack.c.bf16 %v7702_v30, %v7704_v48 }
0x126f   : > { %2410 = vxpose.xlu1.c.b16.end [2/2] (short) (narrow) %v2408_v7, 32 }
0x12c9   : > { %v2255_v37 = vpop.trf.xlu0 }
0x12ca   : > { %6367 = vmatprep.mubr.msk.bf16.mxu1 %vm666_vm2, %v2255_v37 }
0x12cd   : > { %v2256_v31 = vpop.trf.xlu0 }
0x12ce   : > { %6368 = vmatmul.mubr.msk.bf16.vlgmr.msra.gmra.mrb[40].mxu1 %vm666_vm2, %v2256_v31 }
0x12cf   : > { %6378 = vmatpush3.bf16.msra.mxu1 %v7656_v2 }
0x12d0   : > { %6379 = vmatprep.subr.bf16.mxu1 %v7714_v32 }
0x12d1   : > { %v2417_v44 = vpop.trf.xlu1 }
0x12d2   : > { %6381 = vmatprep.mubr.msk.bf16.mxu1 %vm666_vm2, %v2417_v44 }
0x12d3   : > { %6380 = vmatpush3.bf16.msra.mxu1 %v7714_v32 }
0x12d4   : > { %6393 = vmatprep.subr.bf16.mxu1 %v7722_v1 }
0x12d5   : > { %v2418_v33 = vpop.trf.xlu1 }
0x12d6   : > { %6382 = vmatmul.mubr.msk.bf16.vlgmr.msra.gmra.mrb[44].mxu1 %vm666_vm2, %v2418_v33 }
0x12d7   : > { %6394 = vmatpush3.bf16.msra.mxu1 %v7722_v1 }
0x12d8   : > { %6395 = vmatprep.subr.bf16.mxu1 %v7730_v4 }
0x12db   : > { %6396 = vmatpush3.bf16.msra.mxu1 %v7730_v4 }
0x12dc   : > { %6528 = vmatprep.subr.msk.bf16.mxu1 %vm701_vm1, %v7628_v23 }
0x13a1   : > { %v6369_v47 = vpop.f32.mrb[40].mxu1 }
0x13a2   : > { %v2312_v36 = vadd.f32 %v6369_v47, %v7487_v27  ;;  %v2303_v39 = vpop.f32.mrb[41].mxu1 }
0x13a3   : > { %v2304_v40 = vadd.f32 %v7487_v27, %v2303_v39  ;;  %v6370_v41 = vpop.f32.mrb[42].mxu1 }
0x13a4   : > { %6840 = vtanh.f32 %v2312_v36  ;;  %v2315_v42 = vadd.f32 %v6370_v41, %v7487_v27  ;;  %v2306_v43 = vpop.f32.mrb[43].mxu1 }
0x13a5   : > { %6842 = vtanh.f32 %v2304_v40  ;;  %v2307_v49 = vadd.f32 %v7487_v27, %v2306_v43  ;;  %v7795_v43 = vld [vmem:[%s9463_s10] ss:$0 sm:$0xff] }
0x13a6   : > { %6844 = vtanh.f32 %v2315_v42 }
0x13a7   : > { %6846 = vtanh.f32 %v2307_v49 }
0x13a9   : > { %v6383_v45 = vpop.f32.mrb[44].mxu1 }
0x13aa   : > { %v2474_v52 = vadd.f32 %v7743_v51, %v6383_v45  ;;  %v2465_v53 = vpop.f32.mrb[45].mxu1 }
0x13ab   : > { %v2466_v54 = vadd.f32 %v7743_v51, %v2465_v53  ;;  %v6384_v55 = vpop.f32.mrb[46].mxu1 }
0x13ac   : > { %6848 = vtanh.f32 %v2474_v52  ;;  %v2477_v57 = vadd.f32 %v7743_v51, %v6384_v55  ;;  %v2468_v12 = vpop.f32.mrb[47].mxu1 }
0x13ad   : > { %6850 = vtanh.f32 %v2466_v54  ;;  %v2469_v27 = vadd.f32 %v7743_v51, %v2468_v12 }
0x13ae   : > { %v6841_v59 = vpop.eup %6840  ;;  %6852 = vtanh.f32 %v2477_v57 }
0x13af   : > { %v6843_v15 = vpop.eup %6842  ;;  %v2324_v13 = vadd.f32 %v6841_v59, %v7610_v25  ;;  %6854 = vtanh.f32 %v2469_v27 }
0x13b0   : > { %v6845_v24 = vpop.eup %6844  ;;  %v2322_v61 = vadd.f32 %v6843_v15, %v7602_v16  ;;  %v2724_v16 = vld [vmem:[#allocation2 + $0x10] sm:$0xf0] }
0x13b1   : > { %v6847_v62 = vpop.eup %6846  ;;  %2329 = vst.msk [vmem:[#allocation3 + $0x70] sm:$0xff] %vm666_vm2, %v2324_v13  ;;  %v2325_v63 = vadd.f32 %v6845_v24, %v7608_v58  ;;  %v2726_v5 = vrot.slane %v2724_v16, 4 }
0x13b2   : > { %2327 = vst.msk [vmem:[#allocation3 + $0x60] sm:$0xff] %vm666_vm2, %v2322_v61  ;;  %v2323_v38 = vadd.f32 %v6847_v62, %v7604_v56  ;;  %v7762_v56 = vld [vmem:[%s9464_s11] sm:$0xff]  }
0x13b3   : > { %2330 = vst.msk [vmem:[#allocation3 + $0x78] sm:$0xff] %vm666_vm2, %v2325_v63 }
0x13b4   : > { %2328 = vst.msk [vmem:[#allocation3 + $0x68] sm:$0xff] %vm666_vm2, %v2323_v38 }
0x13b6   : > { %v6849_v3 = vpop.eup %6848 }
0x13b7   : > { %v6851_v0 = vpop.eup %6850 }
0x13b8   : > { %v6853_v25 = vpop.eup %6852 }
0x13b9   : > { %v6855_v18 = vpop.eup %6854  ;;  %v2485_v34 = vpack.c.bf16 %v6853_v25, %v6849_v3 }
0x13ba   : > { %v2484_v35 = vpack.c.bf16 %v6855_v18, %v6851_v0 }
0x13bc   : > { %2486 = vxpose.xlu0.c.b16.start [1/2] (short) (narrow) %v2484_v35, 32 }
0x13c0   : > { %2487 = vxpose.xlu0.c.b16.end [2/2] (short) (narrow) %v2485_v34, 32 }
0x13c4   : > { %2728 = vxpose.xlu0.c.b16.start.end [1/1] (short) (narrow) %v2726_v5, 32 }
0x1422   : > { %v2494_v58 = vpop.trf.xlu0 }
0x1423   : > { %6389 = vmatprep.mubr.msk.bf16.mxu0 %vm666_vm2, %v2494_v58 }
0x1426   : > { %v2495_v6 = vpop.trf.xlu0 }
0x1427   : > { %6390 = vmatmul.mubr.msk.bf16.vlgmr.msra.gmra.mrb[48].mxu0 %vm666_vm2, %v2495_v6 }
0x1428   : > { %6402 = vmatpush3.bf16.msra.mxu0 %v7762_v56 }
0x1429   : > { %6403 = vmatprep.subr.bf16.mxu0 %v7768_v8 }
0x142a   : > { %v2736_v39 = vpop.trf.xlu0 }
0x142c   : > { %6404 = vmatpush3.bf16.msra.mxu0 %v7768_v8 }
0x142d   : > { %6415 = vmatprep.subr.bf16.mxu0 %v7656_v2 }
0x142e   : > { %v2737_v41 = vpop.trf.xlu0 }
0x14fa   : > { %v6391_v9 = vpop.f32.mrb[48].mxu0 }
0x14fb   : > { %v2551_v50 = vadd.f32 %v7776_v11, %v6391_v9  ;;  %v2542_v14 = vpop.f32.mrb[49].mxu0 }
0x14fc   : > { %v2543_v17 = vadd.f32 %v7776_v11, %v2542_v14  ;;  %v6392_v20 = vpop.f32.mrb[50].mxu0 }
0x14fd   : > { %6856 = vtanh.f32 %v2551_v50  ;;  %v2554_v21 = vadd.f32 %v7776_v11, %v6392_v20  ;;  %v2545_v22 = vpop.f32.mrb[51].mxu0 }
0x14fe   : > { %6858 = vtanh.f32 %v2543_v17  ;;  %v2546_v29 = vadd.f32 %v7776_v11, %v2545_v22 }
0x14ff   : > { %6860 = vtanh.f32 %v2554_v21  ;;  %v7833_v21 = vld [vmem:[%s9465_s12] ss:$0 sm:$0xff] }
0x1500   : > { %6862 = vtanh.f32 %v2546_v29 }
0x1507   : > { %v6857_v7 = vpop.eup %6856 }
0x1508   : > { %v6859_v37 = vpop.eup %6858 }
0x1509   : > { %v6861_v31 = vpop.eup %6860 }
0x150a   : > { %v6863_v44 = vpop.eup %6862  ;;  %v2562_v33 = vpack.c.bf16 %v6861_v31, %v6857_v7 }
0x150b   : > { %v2561_v47 = vpack.c.bf16 %v6863_v44, %v6859_v37 }
0x150d   : > { %2563 = vxpose.xlu1.c.b16.start [1/2] (short) (narrow) %v2561_v47, 32 }
0x1511   : > { %2564 = vxpose.xlu1.c.b16.end [2/2] (short) (narrow) %v2562_v33, 32 }
0x1573   : > { %v2571_v36 = vpop.trf.xlu1 }
0x1574   : > { %6397 = vmatprep.mubr.msk.bf16.mxu1 %vm666_vm2, %v2571_v36 }
0x1577   : > { %v2572_v40 = vpop.trf.xlu1 }
0x1578   : > { %6398 = vmatmul.mubr.msk.bf16.vlgmr.msra.gmra.mrb[48].mxu1 %vm666_vm2, %v2572_v40 }
0x1579   : > { %6410 = vmatpush3.bf16.msra.mxu1 %v7315_v10  ;;  %6411 = vmatprep.mubr.msk.bf16.mxu1 %vm694_vm3, %v2736_v39 }
0x157a   : > { %6423 = vmatprep.subr.bf16.mxu1 %v7670_v19 }
0x1580   : > { %6412 = vmatmul.mubr.msk.bf16.vlgmr.msra.gmra.mrb[52].mxu1 %vm694_vm3, %v2737_v41 }
0x1581   : > { %6424 = vmatpush3.bf16.msra.mxu1 %v7670_v19 }
0x1582   : > { %6425 = vmatprep.subr.bf16.mxu1 %v7678_v60 }
0x1585   : > { %6426 = vmatpush3.bf16.msra.mxu1 %v7678_v60 }
0x1586   : > { %6439 = vmatprep.subr.bf16.mxu1 %v7762_v56 }
0x164b   : > { %v6399_v42 = vpop.f32.mrb[48].mxu1 }
0x164c   : > { %v2628_v49 = vadd.f32 %v7795_v43, %v6399_v42  ;;  %v2619_v45 = vpop.f32.mrb[49].mxu1 }
0x164d   : > { %v2620_v52 = vadd.f32 %v7795_v43, %v2619_v45  ;;  %v6400_v53 = vpop.f32.mrb[50].mxu1 }
0x164e   : > { %6864 = vtanh.f32 %v2628_v49  ;;  %v2631_v54 = vadd.f32 %v7795_v43, %v6400_v53  ;;  %v2622_v55 = vpop.f32.mrb[51].mxu1 }
0x164f   : > { %6866 = vtanh.f32 %v2620_v52  ;;  %v2623_v57 = vadd.f32 %v7795_v43, %v2622_v55 }
0x1650   : > { %6868 = vtanh.f32 %v2631_v54 }
0x1651   : > { %6870 = vtanh.f32 %v2623_v57 }
0x1653   : > { %v6413_v12 = vpop.f32.mrb[52].mxu1 }
0x1654   : > { %v2784_v27 = vpop.f32.mrb[53].mxu1  ;;  %v2793_v38 = vadd.f32 %v7690_v46, %v6413_v12 }
0x1655   : > { %v2785_v59 = vadd.f32 %v7690_v46, %v2784_v27  ;;  %v6414_v15 = vpop.f32.mrb[54].mxu1 }
0x1656   : > { %v2787_v13 = vpop.f32.mrb[55].mxu1  ;;  %v2796_v24 = vadd.f32 %v7690_v46, %v6414_v15 }
0x1657   : > { %v2788_v61 = vadd.f32 %v7690_v46, %v2787_v13  ;;  %6872 = vtanh.f32 %v2785_v59 }
0x1658   : > { %v6865_v62 = vpop.eup %6864 }
0x1659   : > { %v6867_v63 = vpop.eup %6866  ;;  %6874 = vtanh.f32 %v2788_v61 }
0x165a   : > { %v6869_v3 = vpop.eup %6868  ;;  %6876 = vtanh.f32 %v2796_v24 }
0x165b   : > { %v6871_v0 = vpop.eup %6870  ;;  %v2639_v25 = vpack.c.bf16 %v6869_v3, %v6865_v62  ;;  %6878 = vtanh.f32 %v2793_v38 }
0x165c   : > { %v2638_v18 = vpack.c.bf16 %v6871_v0, %v6867_v63 }
0x165e   : > { %2640 = vxpose.xlu1.c.b16.start [1/2] (short) (narrow) %v2638_v18, 32 }
0x1661   : > { %v7805_v34 = vpop.eup %6872 }
0x1662   : > { %2641 = vxpose.xlu1.c.b16.end [2/2] (short) (narrow) %v2639_v25, 32 }
0x1663   : > { %v7807_v35 = vpop.eup %6874 }
0x1664   : > { %v2803_v16 = vpack.c.bf16 %v7807_v35, %v7805_v34  ;;  %v7811_v5 = vpop.eup %6876 }
0x1665   : > { %v7813_v58 = vpop.eup %6878 }
0x1666   : > { %2805 = vxpose.xlu0.c.b16.start [1/2] (short) (narrow) %v2803_v16, 32  ;;  %v2804_v6 = vpack.c.bf16 %v7811_v5, %v7813_v58 }
0x166a   : > { %2806 = vxpose.xlu0.c.b16.end [2/2] (short) (narrow) %v2804_v6, 32 }
0x16c4   : > { %v2648_v9 = vpop.trf.xlu1 }
0x16c5   : > { %6405 = vmatprep.mubr.msk.bf16.mxu0 %vm666_vm2, %v2648_v9 }
0x16c8   : > { %v2649_v50 = vpop.trf.xlu1 }
0x16c9   : > { %6406 = vmatmul.mubr.msk.bf16.vlgmr.msra.gmra.mrb[52].mxu0 %vm666_vm2, %v2649_v50 }
0x16ca   : > { %6416 = vmatpush3.bf16.msra.mxu0 %v7656_v2 }
0x16cb   : > { %6417 = vmatprep.subr.bf16.mxu0 %v7714_v32 }
0x16cc   : > { %v2813_v14 = vpop.trf.xlu0 }
0x16cd   : > { %6419 = vmatprep.mubr.msk.bf16.mxu0 %vm666_vm2, %v2813_v14 }
0x16ce   : > { %6418 = vmatpush3.bf16.msra.mxu0 %v7714_v32 }
0x16cf   : > { %6431 = vmatprep.subr.bf16.mxu0 %v7722_v1 }
0x16d0   : > { %v2814_v17 = vpop.trf.xlu0 }
0x16d1   : > { %6420 = vmatmul.mubr.msk.bf16.vlgmr.msra.gmra.mrb[56].mxu0 %vm666_vm2, %v2814_v17 }
0x16d2   : > { %6432 = vmatpush3.bf16.msra.mxu0 %v7722_v1 }
0x16d3   : > { %6433 = vmatprep.subr.bf16.mxu0 %v7730_v4 }
0x16d6   : > { %6434 = vmatpush3.bf16.msra.mxu0 %v7730_v4 }
0x16d7   : > { %6529 = vmatprep.subr.msk.bf16.mxu0 %vm701_vm1, %v7628_v23 }
0x179c   : > { %v6407_v20 = vpop.f32.mrb[52].mxu0 }
0x179d   : > { %v2705_v22 = vadd.f32 %v7833_v21, %v6407_v20  ;;  %v2696_v29 = vpop.f32.mrb[53].mxu0 }
0x179e   : > { %v2697_v7 = vadd.f32 %v7833_v21, %v2696_v29  ;;  %v6408_v37 = vpop.f32.mrb[54].mxu0 }
0x179f   : > { %6880 = vtanh.f32 %v2705_v22  ;;  %v2708_v31 = vadd.f32 %v7833_v21, %v6408_v37  ;;  %v2699_v44 = vpop.f32.mrb[55].mxu0 }
0x17a0   : > { %6882 = vtanh.f32 %v2697_v7  ;;  %v2700_v33 = vadd.f32 %v7833_v21, %v2699_v44 }
0x17a1   : > { %6884 = vtanh.f32 %v2708_v31 }
0x17a2   : > { %6886 = vtanh.f32 %v2700_v33 }
0x17a4   : > { %v6421_v47 = vpop.f32.mrb[56].mxu0 }
0x17a5   : > { %v2870_v36 = vadd.f32 %v7743_v51, %v6421_v47  ;;  %v2861_v39 = vpop.f32.mrb[57].mxu0 }
0x17a6   : > { %v2862_v40 = vadd.f32 %v7743_v51, %v2861_v39  ;;  %v6422_v41 = vpop.f32.mrb[58].mxu0 }
0x17a7   : > { %6888 = vtanh.f32 %v2870_v36  ;;  %v2873_v42 = vadd.f32 %v7743_v51, %v6422_v41  ;;  %v2864_v49 = vpop.f32.mrb[59].mxu0 }
0x17a8   : > { %6890 = vtanh.f32 %v2862_v40  ;;  %v2865_v45 = vadd.f32 %v7743_v51, %v2864_v49 }
0x17a9   : > { %v6881_v52 = vpop.eup %6880  ;;  %6892 = vtanh.f32 %v2873_v42 }
0x17aa   : > { %v6883_v53 = vpop.eup %6882  ;;  %v2717_v54 = vadd.f32 %v6881_v52, %v7704_v48  ;;  %6894 = vtanh.f32 %v2865_v45 }
0x17ab   : > { %v6885_v55 = vpop.eup %6884  ;;  %v2715_v57 = vadd.f32 %v6883_v53, %v7696_v26  ;;  %v3120_v26 = vld [vmem:[#allocation2 + $0x18] sm:$0xf] }
0x17ac   : > { %v6887_v12 = vpop.eup %6886  ;;  %2722 = vst.msk [vmem:[#allocation3 + $0x90] sm:$0xff] %vm666_vm2, %v2717_v54  ;;  %v2718_v27 = vadd.f32 %v6885_v55, %v7702_v30 }
0x17ad   : > { %2720 = vst.msk [vmem:[#allocation3 + $0x80] sm:$0xff] %vm666_vm2, %v2715_v57  ;;  %v2716_v59 = vadd.f32 %v6887_v12, %v7698_v28 }
0x17ae   : > { %2723 = vst.msk [vmem:[#allocation3 + $0x98] sm:$0xff] %vm666_vm2, %v2718_v27 }
0x17af   : > { %2721 = vst.msk [vmem:[#allocation3 + $0x88] sm:$0xff] %vm666_vm2, %v2716_v59 }
0x17b1   : > { %v6889_v15 = vpop.eup %6888 }
0x17b2   : > { %v6891_v13 = vpop.eup %6890 }
0x17b3   : > { %v6893_v48 = vpop.eup %6892 }
0x17b4   : > { %v6895_v24 = vpop.eup %6894  ;;  %v2881_v61 = vpack.c.bf16 %v6893_v48, %v6889_v15 }
0x17b5   : > { %v2880_v62 = vpack.c.bf16 %v6895_v24, %v6891_v13 }
0x17b7   : > { %2882 = vxpose.xlu1.c.b16.start [1/2] (short) (narrow) %v2880_v62, 32 }
0x17bb   : > { %2883 = vxpose.xlu1.c.b16.end [2/2] (short) (narrow) %v2881_v61, 32 }
0x17bf   : > { %3121 = vxpose.xlu1.c.b16.start.end [1/1] (short) (narrow) %v3120_v26, 32 }
0x181d   : > { %v2890_v63 = vpop.trf.xlu1 }
0x181e   : > { %6427 = vmatprep.mubr.msk.bf16.mxu1 %vm666_vm2, %v2890_v63 }
0x1821   : > { %v2891_v30 = vpop.trf.xlu1 }
0x1822   : > { %6428 = vmatmul.mubr.msk.bf16.vlgmr.msra.gmra.mrb[56].mxu1 %vm666_vm2, %v2891_v30 }
0x1823   : > { %6440 = vmatpush3.bf16.msra.mxu1 %v7762_v56 }
0x1824   : > { %6441 = vmatprep.subr.bf16.mxu1 %v7768_v8 }
0x1825   : > { %v3129_v7 = vpop.trf.xlu1 }
0x1827   : > { %6442 = vmatpush3.bf16.msra.mxu1 %v7768_v8 }
0x1828   : > { %6453 = vmatprep.subr.bf16.mxu1 %v7656_v2 }
0x1829   : > { %v3130_v31 = vpop.trf.xlu1 }
0x18f5   : > { %v6429_v28 = vpop.f32.mrb[56].mxu1 }
0x18f6   : > { %v2947_v38 = vadd.f32 %v7776_v11, %v6429_v28  ;;  %v2938_v3 = vpop.f32.mrb[57].mxu1 }
0x18f7   : > { %v2939_v0 = vadd.f32 %v7776_v11, %v2938_v3  ;;  %v6430_v25 = vpop.f32.mrb[58].mxu1 }
0x18f8   : > { %6896 = vtanh.f32 %v2947_v38  ;;  %v2950_v18 = vadd.f32 %v7776_v11, %v6430_v25  ;;  %v2941_v16 = vpop.f32.mrb[59].mxu1 }
0x18f9   : > { %6898 = vtanh.f32 %v2939_v0  ;;  %v2942_v6 = vadd.f32 %v7776_v11, %v2941_v16 }
0x18fa   : > { %6900 = vtanh.f32 %v2950_v18 }
0x18fb   : > { %6902 = vtanh.f32 %v2942_v6 }
0x1902   : > { %v6897_v9 = vpop.eup %6896 }
0x1903   : > { %v6899_v50 = vpop.eup %6898 }
0x1904   : > { %v6901_v14 = vpop.eup %6900 }
0x1905   : > { %v6903_v17 = vpop.eup %6902  ;;  %v2958_v20 = vpack.c.bf16 %v6901_v14, %v6897_v9 }
0x1906   : > { %v2957_v22 = vpack.c.bf16 %v6903_v17, %v6899_v50 }
0x1908   : > { %2959 = vxpose.xlu0.c.b16.start [1/2] (short) (narrow) %v2957_v22, 32 }
0x190c   : > { %2960 = vxpose.xlu0.c.b16.end [2/2] (short) (narrow) %v2958_v20, 32 }
0x196e   : > { %v2967_v29 = vpop.trf.xlu0 }
0x196f   : > { %6435 = vmatprep.mubr.msk.bf16.mxu0 %vm666_vm2, %v2967_v29 }
0x1972   : > { %v2968_v37 = vpop.trf.xlu0 }
0x1973   : > { %6436 = vmatmul.mubr.msk.bf16.vlgmr.msra.gmra.mrb[60].mxu0 %vm666_vm2, %v2968_v37 }
0x1974   : > { %6448 = vmatpush3.bf16.msra.mxu0 %v7315_v10  ;;  %6449 = vmatprep.mubr.msk.bf16.mxu0 %vm694_vm3, %v3129_v7 }
0x1975   : > { %6461 = vmatprep.subr.bf16.mxu0 %v7670_v19 }
0x197b   : > { %6450 = vmatmul.mubr.msk.bf16.vlgmr.msra.gmra.mrb[64].mxu0 %vm694_vm3, %v3130_v31 }
0x197c   : > { %6462 = vmatpush3.bf16.msra.mxu0 %v7670_v19 }
0x197d   : > { %6463 = vmatprep.subr.bf16.mxu0 %v7678_v60 }
0x1980   : > { %6464 = vmatpush3.bf16.msra.mxu0 %v7678_v60 }
0x1981   : > { %6477 = vmatprep.subr.bf16.mxu0 %v7762_v56 }
0x1a46   : > { %v6437_v44 = vpop.f32.mrb[60].mxu0 }
0x1a47   : > { %v3024_v33 = vadd.f32 %v7795_v43, %v6437_v44  ;;  %v3015_v47 = vpop.f32.mrb[61].mxu0 }
0x1a48   : > { %v3016_v36 = vadd.f32 %v7795_v43, %v3015_v47  ;;  %v6438_v39 = vpop.f32.mrb[62].mxu0 }
0x1a49   : > { %6904 = vtanh.f32 %v3024_v33  ;;  %v3027_v40 = vadd.f32 %v7795_v43, %v6438_v39  ;;  %v3018_v41 = vpop.f32.mrb[63].mxu0 }
0x1a4a   : > { %6906 = vtanh.f32 %v3016_v36  ;;  %v3019_v42 = vadd.f32 %v7795_v43, %v3018_v41 }
0x1a4b   : > { %6908 = vtanh.f32 %v3027_v40 }
0x1a4c   : > { %6910 = vtanh.f32 %v3019_v42 }
0x1a4e   : > { %v6451_v49 = vpop.f32.mrb[64].mxu0 }
0x1a4f   : > { %v3177_v45 = vpop.f32.mrb[65].mxu0  ;;  %v3186_v59 = vadd.f32 %v7690_v46, %v6451_v49 }
0x1a50   : > { %v3178_v52 = vadd.f32 %v7690_v46, %v3177_v45  ;;  %v6452_v53 = vpop.f32.mrb[66].mxu0 }
0x1a51   : > { %v3180_v54 = vpop.f32.mrb[67].mxu0  ;;  %v3189_v55 = vadd.f32 %v7690_v46, %v6452_v53 }
0x1a52   : > { %v3181_v57 = vadd.f32 %v7690_v46, %v3180_v54  ;;  %6912 = vtanh.f32 %v3178_v52 }
0x1a53   : > { %v6905_v12 = vpop.eup %6904 }
0x1a54   : > { %v6907_v27 = vpop.eup %6906  ;;  %6914 = vtanh.f32 %v3181_v57 }
0x1a55   : > { %v6909_v15 = vpop.eup %6908  ;;  %6916 = vtanh.f32 %v3189_v55 }
0x1a56   : > { %v6911_v13 = vpop.eup %6910  ;;  %v3035_v48 = vpack.c.bf16 %v6909_v15, %v6905_v12  ;;  %6918 = vtanh.f32 %v3186_v59 }
0x1a57   : > { %v3034_v24 = vpack.c.bf16 %v6911_v13, %v6907_v27 }
0x1a59   : > { %3036 = vxpose.xlu0.c.b16.start [1/2] (short) (narrow) %v3034_v24, 32 }
0x1a5c   : > { %v7879_v61 = vpop.eup %6912 }
0x1a5d   : > { %3037 = vxpose.xlu0.c.b16.end [2/2] (short) (narrow) %v3035_v48, 32 }
0x1a5e   : > { %v7881_v62 = vpop.eup %6914 }
0x1a5f   : > { %v3196_v26 = vpack.c.bf16 %v7881_v62, %v7879_v61  ;;  %v7885_v63 = vpop.eup %6916 }
0x1a60   : > { %v7887_v30 = vpop.eup %6918 }
0x1a61   : > { %3198 = vxpose.xlu1.c.b16.start [1/2] (short) (narrow) %v3196_v26, 32  ;;  %v3197_v28 = vpack.c.bf16 %v7885_v63, %v7887_v30 }
0x1a65   : > { %3199 = vxpose.xlu1.c.b16.end [2/2] (short) (narrow) %v3197_v28, 32 }
0x1abf   : > { %v3044_v38 = vpop.trf.xlu0 }
0x1ac0   : > { %6443 = vmatprep.mubr.msk.bf16.mxu1 %vm666_vm2, %v3044_v38 }
0x1ac3   : > { %v3045_v3 = vpop.trf.xlu0 }
0x1ac4   : > { %6444 = vmatmul.mubr.msk.bf16.vlgmr.msra.gmra.mrb[60].mxu1 %vm666_vm2, %v3045_v3 }
0x1ac5   : > { %6454 = vmatpush3.bf16.msra.mxu1 %v7656_v2 }
0x1ac6   : > { %6455 = vmatprep.subr.bf16.mxu1 %v7714_v32 }
0x1ac7   : > { %v3206_v0 = vpop.trf.xlu1 }
0x1ac8   : > { %6457 = vmatprep.mubr.msk.bf16.mxu1 %vm666_vm2, %v3206_v0 }
0x1ac9   : > { %6456 = vmatpush3.bf16.msra.mxu1 %v7714_v32 }
0x1aca   : > { %6469 = vmatprep.subr.bf16.mxu1 %v7722_v1 }
0x1acb   : > { %v3207_v25 = vpop.trf.xlu1 }
0x1acc   : > { %6458 = vmatmul.mubr.msk.bf16.vlgmr.msra.gmra.mrb[64].mxu1 %vm666_vm2, %v3207_v25 }
0x1acd   : > { %6470 = vmatpush3.bf16.msra.mxu1 %v7722_v1 }
0x1ace   : > { %6471 = vmatprep.subr.bf16.mxu1 %v7730_v4 }
0x1ad1   : > { %6472 = vmatpush3.bf16.msra.mxu1 %v7730_v4 }
0x1ad2   : > { %6530 = vmatprep.subr.msk.bf16.mxu1 %vm701_vm1, %v7628_v23 }
0x1b97   : > { %v6445_v18 = vpop.f32.mrb[60].mxu1 }
0x1b98   : > { %v3101_v16 = vadd.f32 %v7833_v21, %v6445_v18  ;;  %v3092_v6 = vpop.f32.mrb[61].mxu1 }
0x1b99   : > { %v3093_v9 = vadd.f32 %v7833_v21, %v3092_v6  ;;  %v6446_v50 = vpop.f32.mrb[62].mxu1 }
0x1b9a   : > { %6920 = vtanh.f32 %v3101_v16  ;;  %v3104_v14 = vadd.f32 %v7833_v21, %v6446_v50  ;;  %v3095_v17 = vpop.f32.mrb[63].mxu1 }
0x1b9b   : > { %6922 = vtanh.f32 %v3093_v9  ;;  %v3096_v20 = vadd.f32 %v7833_v21, %v3095_v17 }
0x1b9c   : > { %6924 = vtanh.f32 %v3104_v14 }
0x1b9d   : > { %6926 = vtanh.f32 %v3096_v20 }
0x1b9f   : > { %v6459_v22 = vpop.f32.mrb[64].mxu1 }
0x1ba0   : > { %v3263_v29 = vadd.f32 %v7743_v51, %v6459_v22  ;;  %v3254_v23 = vpop.f32.mrb[65].mxu1 }
0x1ba1   : > { %v3255_v7 = vadd.f32 %v7743_v51, %v3254_v23  ;;  %v6460_v37 = vpop.f32.mrb[66].mxu1 }
0x1ba2   : > { %6928 = vtanh.f32 %v3263_v29  ;;  %v3266_v31 = vadd.f32 %v7743_v51, %v6460_v37  ;;  %v3257_v44 = vpop.f32.mrb[67].mxu1 }
0x1ba3   : > { %6930 = vtanh.f32 %v3255_v7  ;;  %v3258_v33 = vadd.f32 %v7743_v51, %v3257_v44 }
0x1ba4   : > { %v6921_v47 = vpop.eup %6920  ;;  %6932 = vtanh.f32 %v3266_v31 }
0x1ba5   : > { %v6923_v36 = vpop.eup %6922  ;;  %v3113_v39 = vadd.f32 %v6921_v47, %v7813_v58  ;;  %6934 = vtanh.f32 %v3258_v33 }
0x1ba6   : > { %v6925_v40 = vpop.eup %6924  ;;  %v3111_v41 = vadd.f32 %v6923_v36, %v7805_v34  ;;  %v3513_v34 = vld [vmem:[#allocation2 + $0x18] sm:$0xf0] }
0x1ba7   : > { %v6927_v42 = vpop.eup %6926  ;;  %3118 = vst.msk [vmem:[#allocation3 + $0xb0] sm:$0xff] %vm666_vm2, %v3113_v39  ;;  %v3114_v49 = vadd.f32 %v6925_v40, %v7811_v5  ;;  %v3515_v12 = vrot.slane %v3513_v34, 4 }
0x1ba8   : > { %3116 = vst.msk [vmem:[#allocation3 + $0xa0] sm:$0xff] %vm666_vm2, %v3111_v41  ;;  %v3112_v45 = vadd.f32 %v6927_v42, %v7807_v35 }
0x1ba9   : > { %3119 = vst.msk [vmem:[#allocation3 + $0xb8] sm:$0xff] %vm666_vm2, %v3114_v49 }
0x1baa   : > { %3117 = vst.msk [vmem:[#allocation3 + $0xa8] sm:$0xff] %vm666_vm2, %v3112_v45 }
0x1bac   : > { %v6929_v52 = vpop.eup %6928 }
0x1bad   : > { %v6931_v53 = vpop.eup %6930 }
0x1bae   : > { %v6933_v58 = vpop.eup %6932 }
0x1baf   : > { %v6935_v54 = vpop.eup %6934  ;;  %v3274_v55 = vpack.c.bf16 %v6933_v58, %v6929_v52 }
0x1bb0   : > { %v3273_v57 = vpack.c.bf16 %v6935_v54, %v6931_v53 }
0x1bb2   : > { %3275 = vxpose.xlu0.c.b16.start [1/2] (short) (narrow) %v3273_v57, 32 }
0x1bb6   : > { %3276 = vxpose.xlu0.c.b16.end [2/2] (short) (narrow) %v3274_v55, 32 }
0x1bba   : > { %3517 = vxpose.xlu0.c.b16.start.end [1/1] (short) (narrow) %v3515_v12, 32  ;;  %v7018_v12 = vld [vmem:[%s9458_s5] sm:$0xff]  }
0x1c18   : > { %v3283_v5 = vpop.trf.xlu0 }
0x1c19   : > { %6465 = vmatprep.mubr.msk.bf16.mxu0 %vm666_vm2, %v3283_v5 }
0x1c1c   : > { %v3284_v27 = vpop.trf.xlu0 }
0x1c1d   : > { %6466 = vmatmul.mubr.msk.bf16.vlgmr.msra.gmra.mrb[68].mxu0 %vm666_vm2, %v3284_v27 }
0x1c1e   : > { %6478 = vmatpush3.bf16.msra.mxu0 %v7762_v56 }
0x1c1f   : > { %6479 = vmatprep.subr.bf16.mxu0 %v7768_v8 }
0x1c20   : > { %v3525_v6 = vpop.trf.xlu0 }
0x1c22   : > { %6480 = vmatpush3.bf16.msra.mxu0 %v7768_v8 }
0x1c23   : > { %6491 = vmatprep.subr.bf16.mxu0 %v7656_v2 }
0x1c24   : > { %v3526_v50 = vpop.trf.xlu0 }
0x1cf0   : > { %v6467_v35 = vpop.f32.mrb[68].mxu0 }
0x1cf1   : > { %v3340_v59 = vadd.f32 %v7776_v11, %v6467_v35  ;;  %v3331_v15 = vpop.f32.mrb[69].mxu0 }
0x1cf2   : > { %v3332_v13 = vadd.f32 %v7776_v11, %v3331_v15  ;;  %v6468_v48 = vpop.f32.mrb[70].mxu0 }
0x1cf3   : > { %6936 = vtanh.f32 %v3340_v59  ;;  %v3343_v24 = vadd.f32 %v7776_v11, %v6468_v48  ;;  %v3334_v26 = vpop.f32.mrb[71].mxu0 }
0x1cf4   : > { %6938 = vtanh.f32 %v3332_v13  ;;  %v3335_v28 = vadd.f32 %v7776_v11, %v3334_v26 }
0x1cf5   : > { %6940 = vtanh.f32 %v3343_v24 }
0x1cf6   : > { %6942 = vtanh.f32 %v3335_v28 }
0x1cfd   : > { %v6937_v38 = vpop.eup %6936 }
0x1cfe   : > { %v6939_v3 = vpop.eup %6938 }
0x1cff   : > { %v6941_v0 = vpop.eup %6940 }
0x1d00   : > { %v6943_v2 = vpop.eup %6942  ;;  %v3351_v25 = vpack.c.bf16 %v6941_v0, %v6937_v38 }
0x1d01   : > { %v3350_v18 = vpack.c.bf16 %v6943_v2, %v6939_v3 }
0x1d03   : > { %3352 = vxpose.xlu1.c.b16.start [1/2] (short) (narrow) %v3350_v18, 32 }
0x1d07   : > { %3353 = vxpose.xlu1.c.b16.end [2/2] (short) (narrow) %v3351_v25, 32 }
0x1d69   : > { %v3360_v16 = vpop.trf.xlu1 }
0x1d6a   : > { %6473 = vmatprep.mubr.msk.bf16.mxu1 %vm666_vm2, %v3360_v16 }
0x1d6d   : > { %v3361_v9 = vpop.trf.xlu1 }
0x1d6e   : > { %6474 = vmatmul.mubr.msk.bf16.vlgmr.msra.gmra.mrb[68].mxu1 %vm666_vm2, %v3361_v9 }
0x1d6f   : > { %6486 = vmatpush3.bf16.msra.mxu1 %v7315_v10  ;;  %6487 = vmatprep.mubr.msk.bf16.mxu1 %vm694_vm3, %v3525_v6 }
0x1d70   : > { %6499 = vmatprep.subr.bf16.mxu1 %v7670_v19 }
0x1d76   : > { %6488 = vmatmul.mubr.msk.bf16.vlgmr.msra.gmra.mrb[72].mxu1 %vm694_vm3, %v3526_v50 }
0x1d77   : > { %6500 = vmatpush3.bf16.msra.mxu1 %v7670_v19 }
0x1d78   : > { %6501 = vmatprep.subr.bf16.mxu1 %v7678_v60 }
0x1d7b   : > { %6502 = vmatpush3.bf16.msra.mxu1 %v7678_v60 }
0x1d7c   : > { %6515 = vmatprep.subr.bf16.mxu1 %v7762_v56 }
0x1e41   : > { %v6475_v14 = vpop.f32.mrb[68].mxu1 }
0x1e42   : > { %v3417_v17 = vadd.f32 %v7795_v43, %v6475_v14  ;;  %v3408_v20 = vpop.f32.mrb[69].mxu1 }
0x1e43   : > { %v3409_v10 = vadd.f32 %v7795_v43, %v3408_v20  ;;  %v6476_v22 = vpop.f32.mrb[70].mxu1 }
0x1e44   : > { %6944 = vtanh.f32 %v3417_v17  ;;  %v3420_v29 = vadd.f32 %v7795_v43, %v6476_v22  ;;  %v3411_v23 = vpop.f32.mrb[71].mxu1 }
0x1e45   : > { %6946 = vtanh.f32 %v3409_v10  ;;  %v3412_v19 = vadd.f32 %v7795_v43, %v3411_v23 }
0x1e46   : > { %6948 = vtanh.f32 %v3420_v29 }
0x1e47   : > { %6950 = vtanh.f32 %v3412_v19 }
0x1e49   : > { %v6489_v7 = vpop.f32.mrb[72].mxu1 }
0x1e4a   : > { %v3573_v60 = vpop.f32.mrb[73].mxu1  ;;  %v3582_v40 = vadd.f32 %v7690_v46, %v6489_v7 }
0x1e4b   : > { %v3574_v37 = vadd.f32 %v7690_v46, %v3573_v60  ;;  %v6490_v31 = vpop.f32.mrb[74].mxu1 }
0x1e4c   : > { %v3576_v44 = vpop.f32.mrb[75].mxu1  ;;  %v3585_v33 = vadd.f32 %v7690_v46, %v6490_v31 }
0x1e4d   : > { %v3577_v47 = vadd.f32 %v7690_v46, %v3576_v44  ;;  %6952 = vtanh.f32 %v3574_v37 }
0x1e4e   : > { %v6945_v36 = vpop.eup %6944 }
0x1e4f   : > { %v6947_v39 = vpop.eup %6946  ;;  %6954 = vtanh.f32 %v3577_v47 }
0x1e50   : > { %v6949_v41 = vpop.eup %6948  ;;  %6956 = vtanh.f32 %v3585_v33 }
0x1e51   : > { %v6951_v42 = vpop.eup %6950  ;;  %v3428_v49 = vpack.c.bf16 %v6949_v41, %v6945_v36  ;;  %6958 = vtanh.f32 %v3582_v40 }
0x1e52   : > { %v3427_v45 = vpack.c.bf16 %v6951_v42, %v6947_v39 }
0x1e54   : > { %3429 = vxpose.xlu1.c.b16.start [1/2] (short) (narrow) %v3427_v45, 32 }
0x1e57   : > { %v7948_v52 = vpop.eup %6952 }
0x1e58   : > { %9498 = vst [vmem:[#allocation16_spill] sm:$0xff] %v7948_v52  ;;  %3430 = vxpose.xlu1.c.b16.end [2/2] (short) (narrow) %v3428_v49, 32 }
0x1e59   : > { %v7950_v53 = vpop.eup %6954 }
0x1e5a   : > { %9499 = vst [vmem:[#allocation17_spill] sm:$0xff] %v7950_v53  ;;  %v3592_v58 = vpack.c.bf16 %v7950_v53, %v7948_v52  ;;  %v7954_v54 = vpop.eup %6956  ;;  %v8198_v52 = vld [vmem:[#allocation3 + $0x4b] sm:$0x1] }
0x1e5b   : > { %9500 = vst [vmem:[#allocation18_spill] sm:$0xff] %v7954_v54  ;;  %v7956_v46 = vpop.eup %6958 }
0x1e5c   : > { %3594 = vxpose.xlu0.c.b16.start [1/2] (short) (narrow) %v3592_v58, 32  ;;  %9501 = vst [vmem:[#allocation19_spill] sm:$0xff] %v7956_v46  ;;  %v3593_v55 = vpack.c.bf16 %v7954_v54, %v7956_v46  ;;  %v8177_v54 = vld [vmem:[#allocation3 + $0x4e] sm:$0x1] }
0x1e60   : > { %3595 = vxpose.xlu0.c.b16.end [2/2] (short) (narrow) %v3593_v55, 32 }
0x1eba   : > { %v3437_v57 = vpop.trf.xlu1 }
0x1ebb   : > { %6481 = vmatprep.mubr.msk.bf16.mxu0 %vm666_vm2, %v3437_v57 }
0x1ebe   : > { %v3438_v34 = vpop.trf.xlu1 }
0x1ebf   : > { %6482 = vmatmul.mubr.msk.bf16.vlgmr.msra.gmra.mrb[72].mxu0 %vm666_vm2, %v3438_v34 }
0x1ec0   : > { %6492 = vmatpush3.bf16.msra.mxu0 %v7018_v12 }
0x1ec1   : > { %6493 = vmatprep.subr.bf16.mxu0 %v7714_v32 }
0x1ec2   : > { %v3602_v5 = vpop.trf.xlu0 }
0x1ec3   : > { %6495 = vmatprep.mubr.msk.bf16.mxu0 %vm666_vm2, %v3602_v5 }
0x1ec4   : > { %6494 = vmatpush3.bf16.msra.mxu0 %v7714_v32 }
0x1ec5   : > { %6507 = vmatprep.subr.bf16.mxu0 %v7722_v1 }
0x1ec6   : > { %v3603_v27 = vpop.trf.xlu0 }
0x1ec7   : > { %6496 = vmatmul.mubr.msk.bf16.vlgmr.msra.gmra.mrb[76].mxu0 %vm666_vm2, %v3603_v27 }
0x1ec8   : > { %6508 = vmatpush3.bf16.msra.mxu0 %v7722_v1 }
0x1ec9   : > { %6509 = vmatprep.subr.bf16.mxu0 %v7730_v4 }
0x1ecc   : > { %6510 = vmatpush3.bf16.msra.mxu0 %v7730_v4 }
0x1f92   : > { %v6483_v35 = vpop.f32.mrb[72].mxu0 }
0x1f93   : > { %v3494_v59 = vadd.f32 %v7833_v21, %v6483_v35  ;;  %v3485_v15 = vpop.f32.mrb[73].mxu0 }
0x1f94   : > { %v3486_v13 = vadd.f32 %v7833_v21, %v3485_v15  ;;  %v6484_v48 = vpop.f32.mrb[74].mxu0 }
0x1f95   : > { %6960 = vtanh.f32 %v3494_v59  ;;  %v3497_v32 = vadd.f32 %v7833_v21, %v6484_v48  ;;  %v3488_v24 = vpop.f32.mrb[75].mxu0 }
0x1f96   : > { %6962 = vtanh.f32 %v3486_v13  ;;  %v3489_v26 = vadd.f32 %v7833_v21, %v3488_v24  ;;  %v8008_v24 = vld [vmem:[#allocation3 + $0x21] sm:$0x1] }
0x1f97   : > { %6964 = vtanh.f32 %v3497_v32  ;;  %v8006_v32 = vld [vmem:[#allocation3 + $0x25] sm:$0x1] }
0x1f98   : > { %6966 = vtanh.f32 %v3489_v26  ;;  %v8012_v26 = vld [vmem:[#allocation3 + $0x22] sm:$0x1] }
0x1f9a   : > { %v6497_v1 = vpop.f32.mrb[76].mxu0 }
0x1f9b   : > { %v3659_v28 = vadd.f32 %v7743_v51, %v6497_v1  ;;  %v3650_v4 = vpop.f32.mrb[77].mxu0  ;;  %v8014_v1 = vld [vmem:[#allocation3 + $0x35] sm:$0x1] }
0x1f9c   : > { %v3651_v38 = vadd.f32 %v7743_v51, %v3650_v4  ;;  %v6498_v3 = vpop.f32.mrb[78].mxu0  ;;  %v6601_v4 = vld [vmem:[#allocation5] sm:$0xff]  }
0x1f9d   : > { %6968 = vtanh.f32 %v3659_v28  ;;  %v3662_v0 = vadd.f32 %v7743_v51, %v6498_v3  ;;  %v3653_v2 = vpop.f32.mrb[79].mxu0  ;;  %v6600_v28 = vld [vmem:[#allocation5 + $0x40] sm:$0xff]  }
0x1f9e   : > { %6970 = vtanh.f32 %v3651_v38  ;;  %v3654_v25 = vadd.f32 %v7743_v51, %v3653_v2  ;;  %v6602_v38 = vld [vmem:[#allocation5 + $0x48] sm:$0xff]   ;;  %v8016_v3 = vld [vmem:[#allocation3 + $0x27] sm:$0x1]  ;;  %v8020_v2 = vld [vmem:[#allocation3 + $0x23] sm:$0x1]  ;;  %6121 = vmatprep.subr.bf16.mxu0 %v6600_v28 }
0x1f9f   : > { %v6961_v18 = vpop.eup %6960  ;;  %6972 = vtanh.f32 %v3662_v0  ;;  %v8018_v0 = vld [vmem:[#allocation3 + $0x2d] sm:$0x1]  ;;  %v8096_v28 = vld [vmem:[#allocation3 + $0x38] sm:$0x1] }
0x1fa0   : > { %v6963_v16 = vpop.eup %6962  ;;  %v3506_v21 = vadd.f32 %v6961_v18, %v7887_v30  ;;  %6974 = vtanh.f32 %v3654_v25  ;;  %v8022_v25 = vld [vmem:[#allocation3 + $0x29] sm:$0x1]  ;;  %v8024_v18 = vld [vmem:[#allocation3 + $0x31] sm:$0x1] }
0x1fa1   : > { %v6965_v6 = vpop.eup %6964  ;;  %v3504_v9 = vadd.f32 %v6963_v16, %v7879_v61  ;;  %v6606_v16 = vld [vmem:[#allocation5 + $0xc0] sm:$0xff]  }
0x1fa2   : > { %v6967_v50 = vpop.eup %6966  ;;  %3511 = vst.msk [vmem:[#allocation3 + $0xd0] sm:$0xff] %vm666_vm2, %v3506_v21  ;;  %v3507_v14 = vadd.f32 %v6965_v6, %v7885_v63  ;;  %v6607_v21 = vld [vmem:[#allocation5 + $0x80] sm:$0xff]   ;;  %v4101_v6 = vrot.slane %v8006_v32, 7 }
0x1fa3   : > { %3509 = vst.msk [vmem:[#allocation3 + $0xc0] sm:$0xff] %vm666_vm2, %v3504_v9  ;;  %v3505_v17 = vadd.f32 %v6967_v50, %v7881_v62  ;;  %v8027_v9 = vld [vmem:[#allocation3 + $0x2e] sm:$0x1]  ;;  %v8029_v50 = vld [vmem:[#allocation3 + $0x2a] sm:$0x1] }
0x1fa4   : > { %3512 = vst.msk [vmem:[#allocation3 + $0xd8] sm:$0xff] %vm666_vm2, %v3507_v14  ;;  %v8031_v14 = vld [vmem:[#allocation3 + $0x36] sm:$0x1] }
0x1fa5   : > { %3510 = vst.msk [vmem:[#allocation3 + $0xc8] sm:$0xff] %vm666_vm2, %v3505_v17  ;;  %v6603_v17 = vld [vmem:[#allocation5 + $0x8] sm:$0xff]  }
0x1fa7   : > { %v6969_v51 = vpop.eup %6968 }
0x1fa8   : > { %v6971_v20 = vpop.eup %6970 }
0x1fa9   : > { %v6973_v30 = vpop.eup %6972 }
0x1faa   : > { %v6975_v10 = vpop.eup %6974  ;;  %v3670_v22 = vpack.c.bf16 %v6973_v30, %v6969_v51  ;;  %v3964_v51 = vrot.slane %v8008_v24, 7  ;;  %v8036_v30 = vld [vmem:[#allocation3 + $0x2b] sm:$0x1]  ;;  %v4387_v24 = vld [vmem:[#allocation3 + $0xe] sm:$0x1] }
0x1fab   : > { %v3669_v29 = vpack.c.bf16 %v6975_v10, %v6971_v20  ;;  %v8034_v20 = vld [vmem:[#allocation3 + $0x2f] sm:$0x1]  ;;  %v6604_v10 = vld [vmem:[#allocation5 + $0x50] sm:$0xff]   ;;  %v9506_v46 = vrot.slane %v8036_v30, 7 }
0x1fac   : > { %v9505_v53 = vrot.slane %v8034_v20, 7 }
0x1fad   : > { %3671 = vxpose.xlu1.c.b16.start [1/2] (short) (narrow) %v3669_v29, 32  ;;  %v3999_v29 = vrot.slane %v8012_v26, 7 }
0x1fb1   : > { %3672 = vxpose.xlu1.c.b16.end [2/2] (short) (narrow) %v3670_v22, 32 }
0x2013   : > { %v3679_v61 = vpop.trf.xlu1 }
0x2014   : > { %6503 = vmatprep.mubr.msk.bf16.mxu1 %vm666_vm2, %v3679_v61  ;;  %v4169_v61 = vrot.slane %v8016_v3, 7 }
0x2017   : > { %v3680_v63 = vpop.trf.xlu1 }
0x2018   : > { %6504 = vmatmul.mubr.msk.bf16.vlgmr.msra.gmra.mrb[76].mxu1 %vm666_vm2, %v3680_v63  ;;  %v4637_v63 = vrot.slane %v8014_v1, 7 }
0x2019   : > { %6516 = vmatpush3.bf16.msra.mxu1 %v7762_v56 }
0x201a   : > { %6517 = vmatprep.subr.bf16.mxu1 %v7768_v8 }
0x201d   : > { %6518 = vmatpush3.bf16.msra.mxu1 %v7768_v8 }
0x201e   : > { %6143 = vmatprep.subr.bf16.mxu1 %v6606_v16  ;;  %v4621_v16 = vld [vmem:[#allocation3 + $0x15] sm:$0x1] }
0x20eb   : > { %v6505_v62 = vpop.f32.mrb[76].mxu1 }
0x20ec   : > { %v3736_v23 = vadd.f32 %v7776_v11, %v6505_v62  ;;  %v3727_v19 = vpop.f32.mrb[77].mxu1  ;;  %v8042_v62 = vld [vmem:[#allocation3 + $0x32] sm:$0x1] }
0x20ed   : > { %v3728_v7 = vadd.f32 %v7776_v11, %v3727_v19  ;;  %v6506_v60 = vpop.f32.mrb[78].mxu1  ;;  %v4034_v19 = vrot.slane %v8020_v2, 7  ;;  %v4655_v2 = vld [vmem:[#allocation3 + $0x16] sm:$0x1] }
0x20ee   : > { %6976 = vtanh.f32 %v3736_v23  ;;  %v3739_v37 = vadd.f32 %v7776_v11, %v6506_v60  ;;  %v3730_v31 = vpop.f32.mrb[79].mxu1  ;;  %v4369_v23 = vrot.slane %v8018_v0, 7  ;;  %v4403_v60 = vrot.slane %v8027_v9, 7 }
0x20ef   : > { %6978 = vtanh.f32 %v3728_v7  ;;  %v3731_v44 = vadd.f32 %v7776_v11, %v3730_v31  ;;  %v4235_v7 = vrot.slane %v8022_v25, 7  ;;  %v4689_v31 = vld [vmem:[#allocation3 + $0x17] sm:$0x1]  ;;  %v9503_v9 = vrot.slane %v8029_v50, 7 }
0x20f0   : > { %6980 = vtanh.f32 %v3739_v37  ;;  %v8170_v0 = vsel %vm3926_vm4, %v4403_v60, %v4387_v24  ;;  %v4755_v37 = vld [vmem:[#allocation3 + $0x19] sm:$0x1] }
0x20f1   : > { %6982 = vtanh.f32 %v3731_v44  ;;  %v8158_v44 = vld [vmem:[#allocation3 + $0x43] sm:$0x1] }
0x20f8   : > { %v6977_v56 = vpop.eup %6976 }
0x20f9   : > { %v6979_v33 = vpop.eup %6978 }
0x20fa   : > { %v6981_v47 = vpop.eup %6980 }
0x20fb   : > { %v6983_v8 = vpop.eup %6982  ;;  %v3747_v36 = vpack.c.bf16 %v6981_v47, %v6977_v56  ;;  %v8120_v47 = vld [vmem:[#allocation3 + $0x42] sm:$0x1]  ;;  %v4555_v56 = vld [vmem:[#allocation3 + $0x13] sm:$0x1] }
0x20fc   : > { %v3746_v39 = vpack.c.bf16 %v6983_v8, %v6979_v33  ;;  %v6605_v33 = vld [vmem:[#allocation5 + $0x10] sm:$0xff]  }
0x20fe   : > { %3748 = vxpose.xlu0.c.b16.start [1/2] (short) (narrow) %v3746_v39, 32  ;;  %v8056_v39 = vld [vmem:[#allocation3 + $0x3d] sm:$0x1] }
0x2102   : > { %3749 = vxpose.xlu0.c.b16.end [2/2] (short) (narrow) %v3747_v36, 32  ;;  %v8054_v36 = vld [vmem:[#allocation3 + $0x37] sm:$0x1] }
0x2164   : > { %v3756_v40 = vpop.trf.xlu0 }
0x2165   : > { %6511 = vmatprep.mubr.msk.bf16.mxu0 %vm666_vm2, %v3756_v40  ;;  %v8058_v40 = vld [vmem:[#allocation3 + $0x33] sm:$0x1] }
0x2168   : > { %v3757_v41 = vpop.trf.xlu0 }
0x2169   : > { %6512 = vmatmul.mubr.msk.bf16.vlgmr.msra.gmra.mrb[80].mxu0 %vm666_vm2, %v3757_v41  ;;  %v8060_v41 = vld [vmem:[#allocation3 + $0x39] sm:$0x1] }
0x216a   : > { %6122 = vmatpush3.bf16.msra.mxu0 %v6601_v4  ;;  %v8098_v4 = vld [vmem:[#allocation3 + $0x45] sm:$0x1] }
0x216b   : > { %6123 = vmatprep.subr.bf16.mxu0 %v6602_v38  ;;  %v4153_v38 = vld [vmem:[#allocation3 + $0x7] sm:$0x1] }
0x216c   : > { %v8125_v32 = vsel %vm3926_vm4, %v4169_v61, %v4153_v38  ;;  %v4253_v61 = vld [vmem:[#allocation3 + $0xa] sm:$0x1]  ;;  %v8173_v38 = vld [vmem:[#allocation3 + $0x56] sm:$0x1] }
0x216d   : > { %9502 = vst [vmem:[#allocation20_spill] sm:$0xff] %v8173_v38  ;;  %v8184_v60 = vsel %vm3926_vm4, %v9503_v9, %v4253_v61  ;;  %v9507_v61 = vrot.slane %v8031_v14, 7  ;;  %v9509_v9 = vrot.slane %v8042_v62, 7  ;;  %v9515_v14 = vrot.slane %v8056_v39, 7  ;;  %v8264_v39 = vld [vmem:[#allocation3 + $0x5a] sm:$0x1] }
0x216e   : > { %6124 = vmatpush3.bf16.msra.mxu0 %v6603_v17  ;;  %v9518_v62 = vrot.slane %v8058_v40, 7  ;;  %v4823_v40 = vld [vmem:[#allocation3 + $0x1b] sm:$0x1] }
0x216f   : > { %6125 = vmatprep.subr.bf16.mxu0 %v6604_v10  ;;  %v8088_v10 = vld [vmem:[#allocation3 + $0x34] sm:$0x1] }
0x2172   : > { %6126 = vmatpush3.bf16.msra.mxu0 %v6605_v33  ;;  %v8090_v33 = vld [vmem:[#allocation3 + $0x30] sm:$0x1] }
0x223c   : > { %v6513_v42 = vpop.f32.mrb[80].mxu0 }
0x223d   : > { %v3813_v49 = vadd.f32 %v7795_v43, %v6513_v42  ;;  %v3804_v11 = vpop.f32.mrb[81].mxu0  ;;  %v8062_v42 = vld [vmem:[#allocation3 + $0x3e] sm:$0x1] }
0x223e   : > { %v3805_v45 = vadd.f32 %v7795_v43, %v3804_v11  ;;  %v6514_v58 = vpop.f32.mrb[82].mxu0  ;;  %v8066_v11 = vld [vmem:[#allocation3 + $0x3f] sm:$0x1] }
0x223f   : > { %6984 = vtanh.f32 %v3813_v49  ;;  %v3816_v55 = vadd.f32 %v7795_v43, %v6514_v58  ;;  %v3807_v57 = vpop.f32.mrb[83].mxu0  ;;  %v8064_v49 = vld [vmem:[#allocation3 + $0x3a] sm:$0x1] }
0x2240   : > { %6986 = vtanh.f32 %v3805_v45  ;;  %v3808_v34 = vadd.f32 %v7795_v43, %v3807_v57  ;;  %v8010_v43 = vld [vmem:[#allocation3 + $0x26] sm:$0x1]  ;;  %v8068_v45 = vld [vmem:[#allocation3 + $0x3b] sm:$0x1]  ;;  %v8072_v57 = vld [vmem:[#allocation3 + $0x24] sm:$0x1] }
0x2241   : > { %6988 = vtanh.f32 %v3816_v55  ;;  %v4135_v22 = vrot.slane %v8010_v43, 7  ;;  %v8094_v55 = vld [vmem:[#allocation3 + $0x3c] sm:$0x1]  ;;  %v8112_v43 = vld [vmem:[#allocation3 + $0x46] sm:$0x1] }
0x2242   : > { %6990 = vtanh.f32 %v3808_v34  ;;  %v8074_v34 = vld [vmem:[#allocation3 + $0x20] sm:$0x1] }
0x2249   : > { %v6985_v12 = vpop.eup %6984 }
0x224a   : > { %v6987_v5 = vpop.eup %6986 }
0x224b   : > { %v6989_v27 = vpop.eup %6988 }
0x224c   : > { %v6991_v35 = vpop.eup %6990  ;;  %v3824_v59 = vpack.c.bf16 %v6989_v27, %v6985_v12  ;;  %v8078_v27 = vld [vmem:[#allocation3 + $0x2c] sm:$0x1]  ;;  %v4018_v12 = vld [vmem:[#allocation3 + $0x3] sm:$0x1] }
0x224d   : > { %v3823_v15 = vpack.c.bf16 %v6991_v35, %v6987_v5  ;;  %v8080_v35 = vld [vmem:[#allocation3 + $0x28] sm:$0x1]  ;;  %v4353_v5 = vld [vmem:[#allocation3 + $0xd] sm:$0x1]  ;;  %v8148_v1 = vsel %vm3926_vm4, %v4034_v19, %v4018_v12  ;;  %v4521_v19 = vld [vmem:[#allocation3 + $0x12] sm:$0x1] }
0x224e   : > { %v8143_v3 = vsel %vm3926_vm4, %v4369_v23, %v4353_v5  ;;  %v4421_v23 = vld [vmem:[#allocation3 + $0xf] sm:$0x1]  ;;  %v4287_v5 = vld [vmem:[#allocation3 + $0xb] sm:$0x1]  ;;  %v4889_v12 = vld [vmem:[#allocation3 + $0x1d] sm:$0x1]  ;;  %v8215_v20 = vsel %vm3926_vm4, %v9509_v9, %v4521_v19  ;;  %v8236_v19 = vsel %vm3926_vm4, %v9518_v62, %v4555_v56 }
0x224f   : > { %3825 = vxpose.xlu1.c.b16.start [1/2] (short) (narrow) %v3823_v15, 32  ;;  %v3948_v15 = vld [vmem:[#allocation3 + $0x1] sm:$0x1]  ;;  %v8196_v25 = vsel %vm3926_vm4, %v9505_v53, %v4421_v23  ;;  %v8203_v50 = vsel %vm3926_vm4, %v9506_v46, %v4287_v5  ;;  %9510 = vst [vmem:[#allocation22_spill] sm:$0xff] %v8215_v20  ;;  %v8217_v53 = vld [vmem:[#allocation3 + $0x57] sm:$0x1]  ;;  %v8229_v5 = vsel %vm3926_vm4, %v9515_v14, %v4889_v12 }
0x2250   : > { %v8110_v58 = vsel %vm3926_vm4, %v3964_v51, %v3948_v15  ;;  %v8132_v51 = vsel %vm3926_vm4, %v4637_v63, %v4621_v16  ;;  %v8136_v15 = vld [vmem:[#allocation3 + $0x47] sm:$0x1]  ;;  %v4487_v63 = vld [vmem:[#allocation3 + $0x11] sm:$0x1]  ;;  %9511 = vst [vmem:[#allocation23_spill] sm:$0xff] %v8217_v53  ;;  %v9512_v23 = vrot.slane %v8054_v36, 7 }
0x2251   : > { %v8224_v46 = vld [vmem:[#allocation3 + $0x5d] sm:$0x1]  ;;  %9516 = vst [vmem:[#allocation26_spill] sm:$0xff] %v8229_v5  ;;  %9519 = vst [vmem:[#allocation28_spill] sm:$0xff] %v8236_v19  ;;  %v4923_v9 = vld [vmem:[#allocation3 + $0x1e] sm:$0x1] }
0x2252   : > { %v8222_v30 = vsel %vm3926_vm4, %v9512_v23, %v4689_v31  ;;  %9514 = vst [vmem:[#allocation25_spill] sm:$0xff] %v8224_v46  ;;  %v4789_v23 = vld [vmem:[#allocation3 + $0x1a] sm:$0x1]  ;;  %v4957_v14 = vld [vmem:[#allocation3 + $0x1f] sm:$0x1]  ;;  %v9523_v12 = vrot.slane %v8064_v49, 7 }
0x2253   : > { %3826 = vxpose.xlu1.c.b16.end [2/2] (short) (narrow) %v3824_v59, 32  ;;  %v4085_v59 = vld [vmem:[#allocation3 + $0x5] sm:$0x1]  ;;  %9513 = vst [vmem:[#allocation24_spill] sm:$0xff] %v8222_v30  ;;  %v3909_v31 = vld [vmem:[#allocation3] sm:$0x1] }
0x2254   : > { %v8103_v17 = vsel %vm3926_vm4, %v4101_v6, %v4085_v59  ;;  %v4219_v6 = vld [vmem:[#allocation3 + $0x9] sm:$0x1]  ;;  %v8127_v59 = vld [vmem:[#allocation3 + $0x55] sm:$0x1]  ;;  %v8255_v30 = vld [vmem:[#allocation3 + $0x59] sm:$0x1]  ;;  %v8269_v19 = vsel %vm3926_vm4, %v9523_v12, %v4789_v23 }
0x2255   : > { %v8165_v16 = vsel %vm3926_vm4, %v4235_v7, %v4219_v6  ;;  %v8179_v7 = vld [vmem:[#allocation3 + $0x4a] sm:$0x1]  ;;  %v9504_v6 = vrot.slane %v8024_v18, 7  ;;  %v8208_v18 = vsel %vm3926_vm4, %v9507_v61, %v4655_v2  ;;  %v8231_v2 = vld [vmem:[#allocation3 + $0x53] sm:$0x1]  ;;  %v9525_v53 = vrot.slane %v8068_v45, 7 }
0x2256   : > { %9508 = vst [vmem:[#allocation21_spill] sm:$0xff] %v8208_v18  ;;  %9517 = vst [vmem:[#allocation27_spill] sm:$0xff] %v8231_v2  ;;  %v4187_v61 = vld [vmem:[#allocation3 + $0x8] sm:$0x1]  ;;  %v4589_v56 = vld [vmem:[#allocation3 + $0x14] sm:$0x1] }
0x2257   : > { %v8189_v24 = vsel %vm3926_vm4, %v9504_v6, %v4487_v63  ;;  %v8210_v63 = vld [vmem:[#allocation3 + $0x52] sm:$0x1]  ;;  %v9520_v6 = vrot.slane %v8060_v41, 7  ;;  %v4455_v62 = vld [vmem:[#allocation3 + $0x10] sm:$0x1]  ;;  %v9524_v2 = vrot.slane %v8066_v11, 7 }
0x2258   : > { %v4857_v20 = vld [vmem:[#allocation3 + $0x1c] sm:$0x1]  ;;  %v4723_v41 = vld [vmem:[#allocation3 + $0x18] sm:$0x1]  ;;  %v8257_v18 = vld [vmem:[#allocation3 + $0x5e] sm:$0x1] }
0x2259   : > { %v8241_v36 = vsel %vm3926_vm4, %v9520_v6, %v4755_v37  ;;  %v4053_v6 = vld [vmem:[#allocation3 + $0x4] sm:$0x1]  ;;  %v9522_v37 = vrot.slane %v8062_v42, 7  ;;  %v8271_v5 = vld [vmem:[#allocation3 + $0x5f] sm:$0x1]  ;;  %v8276_v46 = vsel %vm3926_vm4, %v9524_v2, %v4957_v14  ;;  %v8281_v42 = vsel %vm3926_vm4, %v9525_v53, %v4823_v40 }
0x225a   : > { %9521 = vst [vmem:[#allocation29_spill] sm:$0xff] %v8241_v36  ;;  %v4321_v36 = vld [vmem:[#allocation3 + $0xc] sm:$0x1]  ;;  %v9526_v49 = vrot.slane %v8072_v57, 7  ;;  %v8292_v23 = vld [vmem:[#allocation3 + $0x40] sm:$0x1] }
0x225b   : > { %v8262_v38 = vsel %vm3926_vm4, %v9522_v37, %v4923_v9  ;;  %v8283_v9 = vld [vmem:[#allocation3 + $0x5b] sm:$0x1]  ;;  %v8285_v37 = vld [vmem:[#allocation3 + $0x44] sm:$0x1]  ;;  %v9527_v11 = vrot.slane %v8074_v34, 7  ;;  %v9528_v45 = vrot.slane %v8078_v27, 7 }
0x225c   : > { %v8290_v12 = vsel %vm3926_vm4, %v9526_v49, %v4053_v6  ;;  %v9529_v14 = vrot.slane %v8080_v35, 7  ;;  %v8309_v57 = vld [vmem:[#allocation3 + $0x4c] sm:$0x1]  ;;  %v8311_v6 = vld [vmem:[#allocation3 + $0x48] sm:$0x1]  ;;  %v9530_v34 = vrot.slane %v8088_v10, 7 }
0x225d   : > { %v8297_v2 = vsel %vm3926_vm4, %v9527_v11, %v3909_v31  ;;  %v8302_v53 = vsel %vm3926_vm4, %v9528_v45, %v4321_v36  ;;  %v8313_v49 = vld [vmem:[#allocation3 + $0x54] sm:$0x1]  ;;  %v9531_v27 = vrot.slane %v8090_v33, 7  ;;  %v9532_v35 = vrot.slane %v8094_v55, 7 }
0x225e   : > { %v8307_v40 = vsel %vm3926_vm4, %v9529_v14, %v4187_v61  ;;  %v8318_v31 = vsel %vm3926_vm4, %v9530_v34, %v4589_v56  ;;  %v9533_v11 = vrot.slane %v8096_v28, 7  ;;  %v9534_v10 = vrot.slane %v8098_v4, 6  ;;  %v8349_v28 = vld [vmem:[#allocation3 + $0x50] sm:$0x1]  ;;  %v9561_v34 = vld [vmem:[#allocation23_spill] sm:$0xff] }
0x225f   : > { %v8323_v36 = vsel %vm3926_vm4, %v9531_v27, %v4455_v62  ;;  %v8328_v61 = vsel %vm3926_vm4, %v9532_v35, %v4857_v20  ;;  %v4773_v55 = vrot.slane %v8255_v30, 6  ;;  %v4807_v14 = vrot.slane %v8264_v39, 6  ;;  %v8377_v30 = vld [vmem:[#allocation3 + $0x58] sm:$0x1]  ;;  %v8379_v27 = vld [vmem:[#allocation3 + $0x65] sm:$0x1] }
0x2260   : > { %v8333_v45 = vsel %vm3926_vm4, %v9533_v11, %v4723_v41  ;;  %v8339_v56 = vsel %vm3929_vm5, %v9534_v10, %v8103_v17  ;;  %v8351_v41 = vld [vmem:[#allocation3 + $0x5c] sm:$0x1]  ;;  %v4975_v4 = vrot.slane %v8271_v5, 6  ;;  %v4841_v17 = vrot.slane %v8283_v9, 6  ;;  %v8373_v9 = vld [vmem:[#allocation3 + $0x75] sm:$0x1] }
0x2261   : > { %v9536_v35 = vrot.slane %v8112_v43, 6  ;;  %v9537_v5 = vrot.slane %v8120_v47, 6  ;;  %v8381_v43 = vld [vmem:[#allocation3 + $0x61] sm:$0x1]  ;;  %v9538_v47 = vrot.slane %v8136_v15, 6  ;;  %v9562_v20 = vrot.slane %v9561_v34, 6 }
0x2262   : > { %v8514_v34 = vld [vmem:[#allocation3 + $0x77] sm:$0x1] }
0x22b5   : > { %v3833_v13 = vpop.trf.xlu1 }
0x22b6   : > { %6519 = vmatprep.mubr.msk.bf16.mxu1 %vm666_vm2, %v3833_v13  ;;  %v4119_v13 = vld [vmem:[#allocation3 + $0x6] sm:$0x1] }
0x22b7   : > { %v8115_v26 = vsel %vm3926_vm4, %v4135_v22, %v4119_v13  ;;  %v8138_v13 = vld [vmem:[#allocation3 + $0x4d] sm:$0x1]  ;;  %v8155_v22 = vld [vmem:[#allocation3 + $0x51] sm:$0x1] }
0x22b8   : > { %v8365_v11 = vsel %vm3929_vm5, %v9536_v35, %v8115_v26  ;;  %v8383_v26 = vld [vmem:[#allocation3 + $0x66] sm:$0x1]  ;;  %v9539_v35 = vrot.slane %v8138_v13, 6  ;;  %v8413_v13 = vld [vmem:[#allocation3 + $0x6d] sm:$0x1] }
0x22b9   : > { %v3834_v48 = vpop.trf.xlu1 }
0x22ba   : > { %6520 = vmatmul.mubr.msk.bf16.vlgmr.msra.gmra.mrb[80].mxu1 %vm666_vm2, %v3834_v48  ;;  %v3983_v48 = vld [vmem:[#allocation3 + $0x2] sm:$0x1] }
0x22bb   : > { %6144 = vmatpush3.bf16.msra.mxu1 %v6607_v21  ;;  %v8105_v21 = vld [vmem:[#allocation3 + $0x41] sm:$0x1]  ;;  %v8118_v8 = vsel %vm3926_vm4, %v3999_v29, %v3983_v48  ;;  %v8160_v48 = vld [vmem:[#allocation3 + $0x49] sm:$0x1]  ;;  %v8191_v29 = vld [vmem:[#allocation3 + $0x4f] sm:$0x1] }
0x22bc   : > { %v9535_v33 = vrot.slane %v8105_v21, 6  ;;  %v8371_v39 = vsel %vm3929_vm5, %v9537_v5, %v8118_v8  ;;  %v8389_v8 = vsel %vm3929_vm5, %v9538_v47, %v8125_v32  ;;  %v8395_v5 = vsel %vm3929_vm5, %v9539_v35, %v8143_v3  ;;  %v8409_v32 = vld [vmem:[#allocation3 + $0x62] sm:$0x1]  ;;  %v8411_v47 = vld [vmem:[#allocation3 + $0x67] sm:$0x1] }
0x22bd   : > { %v9542_v3 = vrot.slane %v8160_v48, 6  ;;  %v8441_v35 = vld [vmem:[#allocation3 + $0x69] sm:$0x1]  ;;  %v9558_v21 = vrot.slane %v8210_v63, 6  ;;  %v4373_v63 = vrot.slane %v8413_v13, 5 }
0x22be   : > { %v8345_v62 = vsel %vm3929_vm5, %v9535_v33, %v8110_v58  ;;  %v9540_v33 = vrot.slane %v8158_v44, 6  ;;  %v9541_v58 = vrot.slane %v8127_v59, 6 }
0x22bf   : > { %v8419_v44 = vsel %vm3929_vm5, %v9542_v3, %v8165_v16  ;;  %v8439_v16 = vld [vmem:[#allocation3 + $0x63] sm:$0x1]  ;;  %v9554_v3 = vld [vmem:[#allocation20_spill] sm:$0xff] }
0x22c0   : > { %v8401_v10 = vsel %vm3929_vm5, %v9540_v33, %v8148_v1  ;;  %v8407_v15 = vsel %vm3929_vm5, %v9541_v58, %v8132_v51  ;;  %v9543_v1 = vrot.slane %v8177_v54, 6  ;;  %v9544_v51 = vrot.slane %v8179_v7, 6  ;;  %v8443_v54 = vld [vmem:[#allocation3 + $0x6e] sm:$0x1] }
0x22c1   : > { %v9546_v33 = vrot.slane %v8155_v22, 6  ;;  %9548 = vst [vmem:[#allocation32_spill] sm:$0xff] %v8443_v54 }
0x22c2   : > { %v8425_v59 = vsel %vm3929_vm5, %v9543_v1, %v8170_v0  ;;  %v8431_v58 = vsel %vm3929_vm5, %v9544_v51, %v8184_v60  ;;  %v9549_v0 = vrot.slane %v8191_v29, 6  ;;  %v9551_v60 = vrot.slane %v8198_v52, 6 }
0x22c3   : > { %9545 = vst [vmem:[#allocation30_spill] sm:$0xff] %v8431_v58  ;;  %v8437_v48 = vsel %vm3929_vm5, %v9546_v33, %v8189_v24  ;;  %v9553_v24 = vld [vmem:[#allocation21_spill] sm:$0xff]  ;;  %v9555_v1 = vrot.slane %v9554_v3, 6  ;;  %v9557_v33 = vld [vmem:[#allocation22_spill] sm:$0xff]  ;;  %v3968_v52 = vrot.slane %v8381_v43, 5  ;;  %v4641_v3 = vrot.slane %v8373_v9, 5 }
0x22c4   : > { %9547 = vst [vmem:[#allocation31_spill] sm:$0xff] %v8437_v48  ;;  %v8449_v7 = vsel %vm3929_vm5, %v9549_v0, %v8196_v25  ;;  %v8455_v22 = vsel %vm3929_vm5, %v9551_v60, %v8203_v50  ;;  %v8467_v29 = vsel %vm3929_vm5, %v9558_v21, %v9557_v33  ;;  %v4105_v25 = vrot.slane %v8379_v27, 5  ;;  %v8482_v33 = vld [vmem:[#allocation3 + $0x6a] sm:$0x1]  ;;  %v9560_v9 = vld [vmem:[#allocation24_spill] sm:$0xff]  ;;  %v9564_v27 = vld [vmem:[#allocation25_spill] sm:$0xff] }
0x22c5   : > { %9550 = vst [vmem:[#allocation33_spill] sm:$0xff] %v8449_v7  ;;  %9552 = vst [vmem:[#allocation34_spill] sm:$0xff] %v8455_v22  ;;  %v8461_v51 = vsel %vm3929_vm5, %v9555_v1, %v9553_v24  ;;  %v4741_v50 = vrot.slane %v8377_v30, 6  ;;  %v4139_v0 = vrot.slane %v8383_v26, 5  ;;  %v4003_v60 = vrot.slane %v8409_v32, 5  ;;  %v9567_v48 = vld [vmem:[#allocation27_spill] sm:$0xff] }
0x22c6   : > { %9556 = vst [vmem:[#allocation21_spill] sm:$0xff] %v8461_v51  ;;  %9559 = vst [vmem:[#allocation20_spill] sm:$0xff] %v8467_v29  ;;  %v4173_v24 = vrot.slane %v8411_v47, 5  ;;  %v8476_v1 = vld [vmem:[#allocation3 + $0x71] sm:$0x1]  ;;  %v4038_v21 = vrot.slane %v8439_v16, 5  ;;  %v8496_v13 = vsel %vm3929_vm5, %v9562_v20, %v9560_v9 }
0x22c7   : > { %v8484_v30 = vld [vmem:[#allocation3 + $0x76] sm:$0x1]  ;;  %v8486_v26 = vld [vmem:[#allocation3 + $0x6f] sm:$0x1]  ;;  %v8488_v32 = vld [vmem:[#allocation3 + $0x6b] sm:$0x1] }
0x22c8   : > { %v8490_v47 = vld [vmem:[#allocation3 + $0x72] sm:$0x1]  ;;  %v9563_v16 = vld [vmem:[#allocation26_spill] sm:$0xff]  ;;  %v9565_v29 = vrot.slane %v9564_v27, 6  ;;  %v9568_v22 = vrot.slane %v9567_v48, 6  ;;  %v9569_v58 = vld [vmem:[#allocation29_spill] sm:$0xff]  ;;  %v8528_v48 = vsel %vm3929_vm5, %v4807_v14, %v8269_v19 }
0x22c9   : > { %v9566_v51 = vld [vmem:[#allocation28_spill] sm:$0xff]  ;;  %v8512_v54 = vsel %vm3929_vm5, %v4773_v55, %v9569_v58  ;;  %v8516_v20 = vld [vmem:[#allocation3 + $0x7d] sm:$0x1]  ;;  %v8532_v55 = vsel %vm3929_vm5, %v4975_v4, %v8276_v46  ;;  %v8536_v58 = vsel %vm3929_vm5, %v4841_v17, %v8281_v42  ;;  %v9572_v46 = vrot.slane %v8292_v23, 6 }
0x22ca   : > { %v8502_v43 = vsel %vm3929_vm5, %v9565_v29, %v9563_v16  ;;  %v8508_v7 = vsel %vm3929_vm5, %v9568_v22, %v9566_v51  ;;  %v8518_v9 = vld [vmem:[#allocation3 + $0x73] sm:$0x1]  ;;  %v9570_v29 = vrot.slane %v8257_v18, 6  ;;  %v8538_v22 = vld [vmem:[#allocation3 + $0x79] sm:$0x1]  ;;  %v9573_v42 = vrot.slane %v8309_v57, 6 }
0x22cb   : > { %v8540_v51 = vld [vmem:[#allocation3 + $0x7e] sm:$0x1]  ;;  %v8542_v18 = vld [vmem:[#allocation3 + $0x7a] sm:$0x1]  ;;  %v8554_v14 = vsel %vm3929_vm5, %v9572_v46, %v8297_v2  ;;  %v9574_v17 = vrot.slane %v8311_v6, 6  ;;  %v4441_v16 = vrot.slane %v8486_v26, 5 }
0x22cc   : > { %v8524_v27 = vsel %vm3929_vm5, %v9570_v29, %v8262_v38  ;;  %v9571_v38 = vrot.slane %v8285_v37, 6  ;;  %v8560_v4 = vsel %vm3929_vm5, %v9573_v42, %v8302_v53  ;;  %v4307_v23 = vrot.slane %v8488_v32, 5  ;;  %v8580_v46 = vld [vmem:[#allocation3 + $0x7f] sm:$0x1]  ;;  %v8582_v32 = vld [vmem:[#allocation3 + $0x7b] sm:$0x1] }
0x22cd   : > { %v8566_v37 = vsel %vm3929_vm5, %v9574_v17, %v8307_v40  ;;  %v4507_v2 = vrot.slane %v8476_v1, 5  ;;  %v4675_v29 = vrot.slane %v8484_v30, 5  ;;  %v4541_v57 = vrot.slane %v8490_v47, 5  ;;  %v8584_v1 = vld [vmem:[#allocation3 + $0x64] sm:$0x1] }
0x22ce   : > { %v8548_v19 = vsel %vm3929_vm5, %v9571_v38, %v8290_v12  ;;  %v4273_v12 = vrot.slane %v8482_v33, 5  ;;  %v4709_v53 = vrot.slane %v8514_v34, 5  ;;  %v4909_v38 = vrot.slane %v8516_v20, 5  ;;  %v8586_v30 = vld [vmem:[#allocation3 + $0x60] sm:$0x1] }
0x22cf   : > { %v4575_v6 = vrot.slane %v8518_v9, 5  ;;  %v4775_v40 = vrot.slane %v8538_v22, 5  ;;  %v9575_v47 = vrot.slane %v8313_v49, 6  ;;  %v9576_v20 = vrot.slane %v8349_v28, 6  ;;  %v8626_v28 = vld [vmem:[#allocation3 + $0x6c] sm:$0x1] }
0x22d0   : > { %v9577_v22 = vrot.slane %v8351_v41, 6  ;;  %v8608_v17 = vsel %vm3929_vm5, %v4741_v50, %v8333_v45  ;;  %v8612_v49 = vsel %vm3932_vm6, %v4105_v25, %v8339_v56  ;;  %v8628_v45 = vld [vmem:[#allocation3 + $0x68] sm:$0x1]  ;;  %v8630_v41 = vld [vmem:[#allocation3 + $0x74] sm:$0x1]  ;;  %v8634_v56 = vsel %vm3932_vm6, %v4173_v24, %v8389_v8 }
0x22d1   : > { %v8592_v34 = vsel %vm3929_vm5, %v9575_v47, %v8318_v31  ;;  %v8598_v9 = vsel %vm3929_vm5, %v9576_v20, %v8323_v36  ;;  %v8616_v31 = vsel %vm3932_vm6, %v3968_v52, %v8345_v62  ;;  %v8620_v36 = vsel %vm3932_vm6, %v4139_v0, %v8365_v11  ;;  %v8648_v25 = vld [vmem:[#allocation3 + $0x70] sm:$0x1]  ;;  %v8650_v52 = vld [vmem:[#allocation3 + $0x7c] sm:$0x1]  ;;  %v8652_v50 = vld [vmem:[#allocation3 + $0x78] sm:$0x1] }
0x22d2   : > { %v8604_v42 = vsel %vm3929_vm5, %v9577_v22, %v8328_v61  ;;  %v8624_v61 = vsel %vm3932_vm6, %v4003_v60, %v8371_v39  ;;  %v8638_v62 = vsel %vm3932_vm6, %v4373_v63, %v8395_v5  ;;  %v8642_v11 = vsel %vm3932_vm6, %v4038_v21, %v8401_v10  ;;  %v8658_v10 = vld [vmem:[#allocation3 + $0x85] sm:$0x1]  ;;  %v8660_v24 = vld [vmem:[#allocation3 + $0x81] sm:$0x1]  ;;  %v9579_v63 = vld [vmem:[#allocation32_spill] sm:$0xff] }
0x22d3   : > { %v8646_v39 = vsel %vm3932_vm6, %v4641_v3, %v8407_v15  ;;  %v4977_v8 = vrot.slane %v8580_v46, 5  ;;  %v9578_v15 = vrot.slane %v8441_v35, 5  ;;  %v9580_v21 = vrot.slane %v9579_v63, 5  ;;  %v9581_v63 = vld [vmem:[#allocation30_spill] sm:$0xff]  ;;  %v8696_v60 = vld [vmem:[#allocation3 + $0x95] sm:$0x1] }
0x22d4   : > { %v9583_v20 = vld [vmem:[#allocation34_spill] sm:$0xff]  ;;  %v9584_v5 = vld [vmem:[#allocation31_spill] sm:$0xff]  ;;  %v8726_v26 = vsel %vm3932_vm6, %v4709_v53, %v8496_v13 }
0x22d5   : > { %v8666_v3 = vsel %vm3932_vm6, %v9578_v15, %v8419_v44  ;;  %v8672_v46 = vsel %vm3932_vm6, %v9580_v21, %v8425_v59  ;;  %v8680_v44 = vld [vmem:[#allocation3 + $0x86] sm:$0x1]  ;;  %v8682_v15 = vld [vmem:[#allocation3 + $0x82] sm:$0x1]  ;;  %v8686_v59 = vsel %vm3932_vm6, %v4273_v12, %v9581_v63  ;;  %v9582_v21 = vld [vmem:[#allocation33_spill] sm:$0xff]  ;;  %v8694_v22 = vsel %vm3932_vm6, %v4307_v23, %v9583_v20 }
0x22d6   : > { %v8690_v47 = vsel %vm3932_vm6, %v4441_v16, %v9582_v21  ;;  %v8700_v35 = vsel %vm3932_vm6, %v4507_v2, %v9584_v5  ;;  %v8704_v12 = vld [vmem:[#allocation3 + $0x87] sm:$0x1]  ;;  %v8706_v63 = vld [vmem:[#allocation3 + $0x8d] sm:$0x1]  ;;  %v8708_v16 = vld [vmem:[#allocation3 + $0x91] sm:$0x1] }
0x22d7   : > { %9585 = vst [vmem:[#allocation22_spill] sm:$0xff] %v8700_v35  ;;  %v9586_v21 = vld [vmem:[#allocation21_spill] sm:$0xff]  ;;  %v9587_v20 = vld [vmem:[#allocation20_spill] sm:$0xff]  ;;  %v8718_v2 = vld [vmem:[#allocation3 + $0x83] sm:$0x1]  ;;  %v8730_v35 = vsel %vm3932_vm6, %v4909_v38, %v8502_v43  ;;  %v9592_v43 = vrot.slane %v8540_v51, 5  ;;  %v8765_v51 = vsel %vm3932_vm6, %v4977_v8, %v8532_v55 }
0x22d8   : > { %v8712_v23 = vsel %vm3932_vm6, %v4675_v29, %v9586_v21  ;;  %v8716_v33 = vsel %vm3932_vm6, %v4541_v57, %v9587_v20  ;;  %v8720_v5 = vld [vmem:[#allocation3 + $0x89] sm:$0x1]  ;;  %v8722_v0 = vld [vmem:[#allocation3 + $0x8e] sm:$0x1]  ;;  %9589 = vst [vmem:[#allocation23_spill] sm:$0xff] %v8730_v35  ;;  %v8734_v29 = vsel %vm3932_vm6, %v4575_v6, %v8508_v7  ;;  %v8738_v57 = vsel %vm3932_vm6, %v4775_v40, %v8512_v54 }
0x22d9   : > { %9588 = vst [vmem:[#allocation24_spill] sm:$0xff] %v8716_v33  ;;  %9590 = vst [vmem:[#allocation26_spill] sm:$0xff] %v8734_v29  ;;  %v8742_v33 = vld [vmem:[#allocation3 + $0x8a] sm:$0x1]  ;;  %v8744_v13 = vld [vmem:[#allocation3 + $0x8f] sm:$0x1]  ;;  %v8750_v53 = vsel %vm3932_vm6, %v9592_v43, %v8524_v27 }
0x22da   : > { %9591 = vst [vmem:[#allocation25_spill] sm:$0xff] %v8738_v57  ;;  %9593 = vst [vmem:[#allocation28_spill] sm:$0xff] %v8750_v53  ;;  %v9594_v7 = vrot.slane %v8542_v18, 5  ;;  %v8760_v20 = vld [vmem:[#allocation3 + $0x8b] sm:$0x1]  ;;  %v4040_v43 = vrot.slane %v8718_v2, 4 }
0x22db   : > { %9596 = vst [vmem:[#allocation29_spill] sm:$0xff] %v8765_v51  ;;  %v7019_v27 = vld [vmem:[%s9465_s12] ss:$0 sm:$0xff]  ;;  %v4409_v40 = vrot.slane %v8722_v0, 4  ;;  %v4275_v21 = vrot.slane %v8742_v33, 4  ;;  %v4443_v53 = vrot.slane %v8744_v13, 4 }
0x22dc   : > { %v8756_v54 = vsel %vm3932_vm6, %v9594_v7, %v8528_v48  ;;  %v4241_v7 = vrot.slane %v8720_v5, 4  ;;  %v9597_v2 = vrot.slane %v8582_v32, 5  ;;  %v8783_v0 = vld [vmem:[#allocation3 + $0x84] sm:$0x1]  ;;  %v9599_v13 = vrot.slane %v8584_v1, 5  ;;  %v6608_v57 = vld [vmem:[#allocation5 + $0x58] sm:$0xff]  }
0x22dd   : > { %9595 = vst [vmem:[#allocation27_spill] sm:$0xff] %v8756_v54  ;;  %v6609_v29 = vld [vmem:[#allocation5 + $0x18] sm:$0xff]   ;;  %6127 = vmatprep.subr.bf16.mxu0 %v6608_v57  ;;  %v3954_v57 = vld [vmem:[#allocation3 + $0xc1] sm:$0x1] }
0x22de   : > { %v8781_v5 = vsel %vm3932_vm6, %v9597_v2, %v8536_v58  ;;  %v8799_v58 = vld [vmem:[#allocation3 + $0x8c] sm:$0x1]  ;;  %v8803_v2 = vld [vmem:[#allocation3 + $0x94] sm:$0x1]  ;;  %6128 = vmatpush3.bf16.msra.mxu0 %v6609_v29  ;;  %v9014_v29 = vld [vmem:[#allocation3 + $0xb8] sm:$0x1] }
0x22df   : > { %9598 = vst [vmem:[#allocation32_spill] sm:$0xff] %v8781_v5  ;;  %v8973_v5 = vld [vmem:[#allocation3 + $0xb4] sm:$0x1] }
0x238d   : > { %v6521_v38 = vpop.f32.mrb[80].mxu1 }
0x238e   : > { %v3890_v18 = vadd.f32 %v7019_v27, %v6521_v38  ;;  %v3881_v48 = vpop.f32.mrb[81].mxu1  ;;  %v4309_v38 = vrot.slane %v8760_v20, 4  ;;  %v9600_v20 = vrot.slane %v8586_v30, 5 }
0x238f   : > { %v3882_v6 = vadd.f32 %v7019_v27, %v3881_v48  ;;  %v6522_v54 = vpop.f32.mrb[82].mxu1  ;;  %v8785_v48 = vld [vmem:[#allocation3 + $0x80] sm:$0x1] }
0x2390   : > { %6992 = vtanh.f32 %v3890_v18  ;;  %v3893_v8 = vadd.f32 %v7019_v27, %v6522_v54  ;;  %v3884_v51 = vpop.f32.mrb[83].mxu1  ;;  %v8791_v54 = vsel %vm3932_vm6, %v9599_v13, %v8548_v19  ;;  %v8797_v32 = vsel %vm3932_vm6, %v9600_v20, %v8554_v14  ;;  %v8801_v18 = vld [vmem:[#allocation3 + $0x88] sm:$0x1]  ;;  %v8831_v13 = vld [vmem:[#allocation3 + $0xa1] sm:$0x1] }
0x2391   : > { %6994 = vtanh.f32 %v3882_v6  ;;  %v3885_v33 = vadd.f32 %v7019_v27, %v3884_v51  ;;  %v9601_v6 = vrot.slane %v8626_v28, 5  ;;  %v9602_v19 = vrot.slane %v8628_v45, 5  ;;  %v8823_v27 = vld [vmem:[#allocation3 + $0x90] sm:$0x1]  ;;  %v8827_v28 = vld [vmem:[#allocation3 + $0x98] sm:$0x1] }
0x2392   : > { %6996 = vtanh.f32 %v3893_v8  ;;  %v9603_v14 = vrot.slane %v8630_v41, 5  ;;  %v8825_v8 = vld [vmem:[#allocation3 + $0x9c] sm:$0x1]  ;;  %v8833_v45 = vld [vmem:[#allocation3 + $0xa6] sm:$0x1] }
0x2393   : > { %v8809_v1 = vsel %vm3932_vm6, %v9601_v6, %v8560_v4  ;;  %v8815_v30 = vsel %vm3932_vm6, %v9602_v19, %v8566_v37  ;;  %6998 = vtanh.f32 %v3885_v33  ;;  %v8829_v4 = vld [vmem:[#allocation3 + $0xa5] sm:$0x1]  ;;  %v9604_v37 = vrot.slane %v8648_v25, 5  ;;  %v9614_v25 = vld [vmem:[#allocation16_spill] sm:$0xff] }
0x2394   : > { %v8821_v51 = vsel %vm3932_vm6, %v9603_v14, %v8592_v34  ;;  %v9605_v34 = vrot.slane %v8650_v52, 5  ;;  %v9606_v33 = vrot.slane %v8652_v50, 5  ;;  %v4075_v19 = vrot.slane %v8783_v0, 4 }
0x2395   : > { %v8839_v41 = vsel %vm3932_vm6, %v9604_v37, %v8598_v9  ;;  %v3934_v14 = vrot.slane %v8785_v48, 4  ;;  %v8864_v48 = vld [vmem:[#allocation3 + $0xa2] sm:$0x1]  ;;  %v9610_v0 = vrot.slane %v8682_v15, 4  ;;  %v8954_v9 = vld [vmem:[#allocation3 + $0xac] sm:$0x1] }
0x2396   : > { %v8845_v20 = vsel %vm3932_vm6, %v9605_v34, %v8604_v42  ;;  %v8851_v6 = vsel %vm3932_vm6, %v9606_v33, %v8608_v17  ;;  %v9607_v33 = vrot.slane %v8658_v10, 4  ;;  %v9608_v42 = vrot.slane %v8660_v24, 4  ;;  %v8894_v24 = vld [vmem:[#allocation3 + $0xa3] sm:$0x1] }
0x2397   : > { %v9609_v17 = vrot.slane %v8680_v44, 4  ;;  %v8888_v10 = vsel %vm3935_vm7, %v9610_v0, %v8624_v61  ;;  %v8910_v61 = vsel %vm3935_vm7, %v4040_v43, %v8642_v11  ;;  %v8930_v11 = vld [vmem:[#allocation3 + $0xaf] sm:$0x1]  ;;  %v8934_v43 = vsel %vm3935_vm7, %v4443_v53, %v8690_v47  ;;  %v8942_v0 = vld [vmem:[#allocation3 + $0xa4] sm:$0x1] }
0x2398   : > { %v8870_v55 = vsel %vm3935_vm7, %v9607_v33, %v8612_v49  ;;  %v8876_v34 = vsel %vm3935_vm7, %v9608_v42, %v8616_v31  ;;  %v8890_v49 = vld [vmem:[#allocation3 + $0xa7] sm:$0x1]  ;;  %v8892_v33 = vld [vmem:[#allocation3 + $0xad] sm:$0x1]  ;;  %v9611_v31 = vrot.slane %v8704_v12, 4 }
0x2399   : > { %v8882_v50 = vsel %vm3935_vm7, %v9609_v17, %v8620_v36  ;;  %v9612_v36 = vrot.slane %v8706_v63, 4  ;;  %v8912_v42 = vld [vmem:[#allocation3 + $0xa9] sm:$0x1]  ;;  %v8916_v17 = vsel %vm3935_vm7, %v4241_v7, %v8666_v3  ;;  %v8918_v12 = vld [vmem:[#allocation3 + $0xae] sm:$0x1]  ;;  %v8924_v63 = vsel %vm3935_vm7, %v4409_v40, %v8672_v46 }
0x239a   : > { %v8900_v44 = vsel %vm3935_vm7, %v9611_v31, %v8634_v56  ;;  %v8920_v56 = vld [vmem:[#allocation3 + $0xaa] sm:$0x1]  ;;  %v8936_v3 = vld [vmem:[#allocation3 + $0xab] sm:$0x1]  ;;  %v8940_v7 = vsel %vm3935_vm7, %v4309_v38, %v8694_v22  ;;  %v6993_v46 = vpop.eup %6992  ;;  %v9615_v22 = vld [vmem:[#allocation18_spill] sm:$0xff]  ;;  %v8964_v38 = vsel %vm3935_vm7, %v4075_v19, %v8791_v54  ;;  %v9617_v54 = vrot.slane %v8799_v58, 4 }
0x239b   : > { %v8906_v15 = vsel %vm3935_vm7, %v9612_v36, %v8638_v62  ;;  %v8928_v62 = vsel %vm3935_vm7, %v4275_v21, %v8686_v59  ;;  %v8948_v36 = vld [vmem:[#allocation3 + $0xa0] sm:$0x1]  ;;  %v6995_v47 = vpop.eup %6994  ;;  %v9613_v53 = vld [vmem:[#allocation19_spill] sm:$0xff]  ;;  %v9618_v19 = vrot.slane %v8801_v18, 4  ;;  %v9619_v58 = vrot.slane %v8803_v2, 4 }
0x239c   : > { %v3902_v52 = vadd.f32 %v6993_v46, %v9613_v53  ;;  %v6997_v40 = vpop.eup %6996  ;;  %v3900_v59 = vadd.f32 %v6995_v47, %v9614_v25  ;;  %v6610_v46 = vld [vmem:[#allocation5 + $0xc8] sm:$0xff]   ;;  %v8968_v25 = vsel %vm3935_vm7, %v3934_v14, %v8797_v32  ;;  %v3937_v47 = vrot.slane %v8948_v36, 3  ;;  %v6612_v2 = vld [vmem:[#allocation5 + $0x60] sm:$0xff]  }
0x239d   : > { %v6999_v53 = vpop.eup %6998  ;;  %v3903_v37 = vadd.f32 %v6997_v40, %v9615_v22  ;;  %v6611_v31 = vld [vmem:[#allocation5 + $0x88] sm:$0xff]   ;;  %v4091_v40 = vld [vmem:[#allocation3 + $0xc5] sm:$0x1]  ;;  %6145 = vmatprep.subr.bf16.mxu1 %v6610_v46  ;;  %v8981_v32 = vsel %vm3935_vm7, %v9617_v54, %v8809_v1  ;;  %v8987_v14 = vsel %vm3935_vm7, %v9618_v19, %v8815_v30  ;;  %v8989_v22 = vld [vmem:[#allocation3 + $0xb0] sm:$0x1]  ;;  %v9000_v1 = vsel %vm3935_vm7, %v9619_v58, %v8821_v51 }
0x239e   : > { %3907 = vst.msk [vmem:[#allocation3 + $0xf0] sm:$0xff] %vm666_vm2, %v3902_v52  ;;  %v8971_v21 = vld [vmem:[#allocation3 + $0xa8] sm:$0x1]  ;;  %3905 = vst.msk [vmem:[#allocation3 + $0xe0] sm:$0xff] %vm666_vm2, %v3900_v59  ;;  %v9616_v52 = vld [vmem:[#allocation17_spill] sm:$0xff]  ;;  %6146 = vmatpush3.bf16.msra.mxu1 %v6611_v31  ;;  %v9620_v18 = vrot.slane %v8823_v27, 4  ;;  %6129 = vmatprep.subr.bf16.mxu0 %v6612_v2 }
0x239f   : > { %v3901_v35 = vadd.f32 %v6999_v53, %v9616_v52  ;;  %v8991_v59 = vld [vmem:[#allocation3 + $0xbc] sm:$0x1]  ;;  %3908 = vst.msk [vmem:[#allocation3 + $0xf8] sm:$0xff] %vm666_vm2, %v3903_v37  ;;  %v8994_v46 = vld [vmem:[#allocation3 + $0xc6] sm:$0x1]  ;;  %v9621_v37 = vrot.slane %v8825_v8, 4 }
0x23a0   : > { %v9006_v30 = vsel %vm3935_vm7, %v9620_v18, %v8839_v41  ;;  %v6613_v31 = vld [vmem:[#allocation5 + $0x20] sm:$0xff]   ;;  %v6614_v51 = vld [vmem:[#allocation5 + $0xd0] sm:$0xff]   ;;  %v9622_v54 = vrot.slane %v8827_v28, 4  ;;  %v4111_v19 = vrot.slane %v4091_v40, 2  ;;  %v3974_v41 = vrot.slane %v3954_v57, 2 }
0x23a1   : > { %v9012_v53 = vsel %vm3935_vm7, %v9621_v37, %v8845_v20  ;;  %3906 = vst.msk [vmem:[#allocation3 + $0xe8] sm:$0xff] %vm666_vm2, %v3901_v35  ;;  %v9623_v20 = vrot.slane %v8829_v4, 3  ;;  %v9030_v58 = vld [vmem:[#allocation3 + $0xc2] sm:$0x1]  ;;  %v6615_v18 = vld [vmem:[#allocation5 + $0x90] sm:$0xff]   ;;  %v4479_v37 = vrot.slane %v8989_v22, 3  ;;  %6147 = vmatprep.subr.bf16.mxu1 %v6614_v51  ;;  %6130 = vmatpush3.bf16.msra.mxu0 %v6613_v31 }
0x23a2   : > { %v9024_v8 = vsel %vm3935_vm7, %v9622_v54, %v8851_v6  ;;  %v4145_v28 = vrot.slane %v8994_v46, 2  ;;  %v9035_v52 = vld [vmem:[#allocation3 + $0xc7] sm:$0x1]  ;;  %v9625_v40 = vrot.slane %v8833_v45, 3  ;;  %v9626_v57 = vrot.slane %v8864_v48, 3  ;;  %6148 = vmatpush3.bf16.msra.mxu1 %v6615_v18 }
0x23a3   : > { %v4110_v35 = vsel %vm3938_vm8, %v9623_v20, %v8870_v55  ;;  %v9624_v55 = vrot.slane %v8831_v13, 3  ;;  %v9050_v27 = vld [vmem:[#allocation3 + $0xcd] sm:$0x1]  ;;  %v9052_v2 = vld [vmem:[#allocation3 + $0xc3] sm:$0x1]  ;;  %v4009_v13 = vrot.slane %v9030_v58, 2 }
0x23a4   : > { %v4144_v54 = vsel %vm3938_vm8, %v9625_v40, %v8882_v50  ;;  %v4008_v20 = vsel %vm3938_vm8, %v9626_v57, %v8888_v10  ;;  %v9054_v51 = vld [vmem:[#allocation3 + $0xc9] sm:$0x1]  ;;  %v9627_v45 = vrot.slane %v8890_v49, 3  ;;  %v9628_v50 = vrot.slane %v8892_v33, 3  ;;  %v9069_v10 = vld [vmem:[#allocation3 + $0xce] sm:$0x1] }
0x23a5   : > { %v3973_v6 = vsel %vm3938_vm8, %v9624_v55, %v8876_v34  ;;  %v9071_v55 = vld [vmem:[#allocation3 + $0xca] sm:$0x1]  ;;  %v4092_v31 = vld [vmem:[#allocation3 + $0xe5] sm:$0x1]  ;;  %v4112_v18 = vsel %vm3941_vm9, %v4111_v19, %v4110_v35  ;;  %v3955_v58 = vld [vmem:[#allocation3 + $0xe1] sm:$0x1] }
0x23a6   : > { %v9061_v34 = vsel %vm3938_vm8, %v9627_v45, %v8900_v44  ;;  %v9067_v48 = vsel %vm3938_vm8, %v9628_v50, %v8906_v15  ;;  %v4126_v40 = vld [vmem:[#allocation3 + $0xe6] sm:$0x1]  ;;  %v9629_v49 = vrot.slane %v8894_v24, 3  ;;  %v9630_v33 = vrot.slane %v8912_v42, 3  ;;  %v3990_v24 = vld [vmem:[#allocation3 + $0xe2] sm:$0x1] }
0x23a7   : > { %v9631_v57 = vrot.slane %v8918_v12, 3  ;;  %v4113_v35 = vrot.slane %v4092_v31, 1  ;;  %v3975_v19 = vsel %vm3941_vm9, %v3974_v41, %v3973_v6  ;;  %v3976_v50 = vrot.slane %v3955_v58, 1  ;;  %v9098_v4 = vld [vmem:[#allocation3 + $0xcf] sm:$0x1] }
0x23a8   : > { %v9078_v44 = vsel %vm3938_vm8, %v9629_v49, %v8910_v61  ;;  %v9084_v15 = vsel %vm3938_vm8, %v9630_v33, %v8916_v17  ;;  %v4179_v61 = vrot.slane %v9035_v52, 2  ;;  %v4379_v49 = vrot.slane %v9050_v27, 2  ;;  %v9102_v6 = vld [vmem:[#allocation3 + $0xcb] sm:$0x1]  ;;  %v9104_v58 = vld [vmem:[#allocation3 + $0xc4] sm:$0x1] }
0x23a9   : > { %v9090_v45 = vsel %vm3938_vm8, %v9631_v57, %v8924_v63  ;;  %v4044_v42 = vrot.slane %v9052_v2, 2  ;;  %v4245_v17 = vrot.slane %v9054_v51, 2  ;;  %v4413_v33 = vrot.slane %v9069_v10, 2  ;;  %v6616_v52 = vld [vmem:[#allocation5 + $0x68] sm:$0xff]   ;;  %v4160_v27 = vld [vmem:[#allocation3 + $0xe7] sm:$0x1] }
0x23aa   : > { %v4114_v12 = vsel %vm3944_vm10, %v4113_v35, %v4112_v18  ;;  %v3977_v63 = vsel %vm3944_vm10, %v3976_v50, %v3975_v19  ;;  %v4147_v31 = vrot.slane %v4126_v40, 1  ;;  %v4011_v41 = vrot.slane %v3990_v24, 1  ;;  %v4360_v2 = vld [vmem:[#allocation3 + $0xed] sm:$0x1]  ;;  %v9121_v50 = vld [vmem:[#allocation3 + $0xc0] sm:$0x1]  ;;  %6131 = vmatprep.subr.bf16.mxu0 %v6616_v52 }
0x23ab   : > { %4115 = vrot.lane.b32.xlu0 %v4114_v12, %s7119_s23  ;;  %3978 = vrot.lane.b32.xlu1 %v3977_v63, %s7119_s23  ;;  %v9632_v57 = vrot.slane %v8920_v56, 3  ;;  %v4279_v40 = vrot.slane %v9071_v55, 2  ;;  %v9633_v35 = vrot.slane %v8942_v0, 3  ;;  %v9127_v24 = vsel %vm3938_vm8, %v3937_v47, %v8968_v25  ;;  %v6617_v56 = vld [vmem:[#allocation5 + $0x28] sm:$0xff]   ;;  %v6618_v0 = vld [vmem:[#allocation5 + $0xd8] sm:$0xff]  }
0x23ac   : > { %v9129_v12 = vld [vmem:[#allocation3 + $0xcc] sm:$0x1]  ;;  %v9636_v25 = vrot.slane %v8973_v5, 3  ;;  %6132 = vmatpush3.bf16.msra.mxu0 %v6617_v56  ;;  %v6619_v52 = vld [vmem:[#allocation5 + $0x98] sm:$0xff]   ;;  %v9162_v5 = vld [vmem:[#allocation3 + $0xd4] sm:$0x1]  ;;  %6149 = vmatprep.subr.bf16.mxu1 %v6618_v0  ;;  %v4380_v56 = vsel %vm3941_vm9, %v4379_v49, %v9067_v48 }
0x23ad   : > { %v9112_v18 = vsel %vm3938_vm8, %v9632_v57, %v8928_v62  ;;  %v9119_v19 = vsel %vm3938_vm8, %v9633_v35, %v8964_v38  ;;  %v9634_v62 = vrot.slane %v8954_v9, 3  ;;  %v9137_v38 = vld [vmem:[#allocation3 + $0xc8] sm:$0x1]  ;;  %v9635_v57 = vrot.slane %v8971_v21, 3  ;;  %v4226_v35 = vld [vmem:[#allocation3 + $0xe9] sm:$0x1]  ;;  %6150 = vmatpush3.bf16.msra.mxu1 %v6619_v52 }
0x23ae   : > { %v9149_v47 = vsel %vm3938_vm8, %v9636_v25, %v9000_v1  ;;  %v9155_v9 = vsel %vm3938_vm8, %v4479_v37, %v9006_v30  ;;  %v4010_v21 = vsel %vm3941_vm9, %v4009_v13, %v4008_v20  ;;  %v9164_v1 = vld [vmem:[#allocation3 + $0xd0] sm:$0x1]  ;;  %v9637_v22 = vrot.slane %v8991_v59, 3  ;;  %v4025_v20 = vld [vmem:[#allocation3 + $0xe3] sm:$0x1] }
0x23af   : > { %v9135_v63 = vsel %vm3938_vm8, %v9634_v62, %v8981_v32  ;;  %v9143_v36 = vsel %vm3938_vm8, %v9635_v57, %v8987_v14  ;;  %v4146_v32 = vsel %vm3941_vm9, %v4145_v28, %v4144_v54  ;;  %v4447_v14 = vrot.slane %v9098_v4, 2  ;;  %v6620_v13 = vld [vmem:[#allocation5 + $0x70] sm:$0xff]   ;;  %v9199_v48 = vld [vmem:[#allocation3 + $0xdc] sm:$0x1] }
0x23b0   : > { %v9170_v30 = vsel %vm3938_vm8, %v9637_v22, %v9012_v53  ;;  %v4148_v46 = vsel %vm3944_vm10, %v4147_v31, %v4146_v32  ;;  %v4012_v37 = vsel %vm3944_vm10, %v4011_v41, %v4010_v21  ;;  %v4181_v28 = vrot.slane %v4160_v27, 1  ;;  %v9178_v53 = vld [vmem:[#allocation3 + $0xee] sm:$0x1]  ;;  %6133 = vmatprep.subr.bf16.mxu0 %v6620_v13  ;;  %v9204_v32 = vld [vmem:[#allocation3 + $0xd8] sm:$0x1] }
0x23b1   : > { %v4381_v54 = vrot.slane %v4360_v2, 1  ;;  %4149 = vrot.lane.b32.xlu0 %v4148_v46, %s7120_s17  ;;  %4013 = vrot.lane.b32.xlu1 %v4012_v37, %s7120_s17  ;;  %v4180_v59 = vsel %vm3941_vm9, %v4179_v61, %v9061_v34  ;;  %v4313_v31 = vrot.slane %v9102_v6, 2  ;;  %v4079_v41 = vrot.slane %v9104_v58, 2  ;;  %v9192_v34 = vld [vmem:[#allocation3 + $0xea] sm:$0x1]  ;;  %v6621_v58 = vld [vmem:[#allocation5 + $0x30] sm:$0xff]  }
0x23b2   : > { %v9638_v27 = vrot.slane %v9014_v29, 3  ;;  %v4045_v62 = vsel %vm3941_vm9, %v4044_v42, %v9078_v44  ;;  %v3940_v61 = vrot.slane %v9121_v50, 2  ;;  %v4347_v0 = vrot.slane %v9129_v12, 2  ;;  %6134 = vmatpush3.bf16.msra.mxu0 %v6621_v58  ;;  %v6622_v12 = vld [vmem:[#allocation5 + $0xe0] sm:$0xff]   ;;  %v9221_v46 = vld [vmem:[#allocation3 + $0xef] sm:$0x1] }
0x23b3   : > { %v4046_v57 = vrot.slane %v4025_v20, 1  ;;  %v4213_v29 = vrot.slane %v9137_v38, 2  ;;  %v4481_v25 = vrot.slane %v9164_v1, 2  ;;  %v4182_v44 = vsel %vm3944_vm10, %v4181_v28, %v4180_v59  ;;  %v4060_v37 = vld [vmem:[#allocation3 + $0xe4] sm:$0x1]  ;;  %6151 = vmatprep.subr.bf16.mxu1 %v6622_v12  ;;  %v6625_v59 = vld [vmem:[#allocation5 + $0x38] sm:$0xff]  }
0x23b4   : > { %v9186_v2 = vsel %vm3938_vm8, %v9638_v27, %v9024_v8  ;;  %v4615_v8 = vrot.slane %v9162_v5, 2  ;;  %v4382_v49 = vsel %vm3944_vm10, %v4381_v54, %v4380_v56  ;;  %v4247_v42 = vrot.slane %v4226_v35, 1  ;;  %v3916_v28 = vld [vmem:[#allocation3 + $0xe0] sm:$0x1]  ;;  %v6627_v35 = vld [vmem:[#allocation5 + $0xa8] sm:$0xff]  }
0x23b5   : > { %v4415_v50 = vrot.slane %v9178_v53, 1  ;;  %4183 = vrot.lane.b32.xlu0 %v4182_v44, %s7121_s20  ;;  %4383 = vrot.lane.b32.xlu1 %v4382_v49, %s7119_s23  ;;  %v4246_v38 = vsel %vm3941_vm9, %v4245_v17, %v9084_v15  ;;  %v4414_v21 = vsel %vm3941_vm9, %v4413_v33, %v9090_v45  ;;  %v4280_v52 = vsel %vm3941_vm9, %v4279_v40, %v9112_v18  ;;  %v6623_v54 = vld [vmem:[#allocation5 + $0xa0] sm:$0xff]   ;;  %v4328_v45 = vld [vmem:[#allocation3 + $0xec] sm:$0x1]  ;;  %v4194_v17 = vld [vmem:[#allocation3 + $0xe8] sm:$0x1] }
0x23b6   : > { %v4281_v22 = vrot.slane %v9192_v34, 1  ;;  %v4080_v51 = vsel %vm3941_vm9, %v4079_v41, %v9119_v19  ;;  %v4081_v15 = vrot.slane %v4060_v37, 1  ;;  %v3942_v10 = vsel %vm3941_vm9, %v3940_v61, %v9127_v24  ;;  %v6624_v33 = vld [vmem:[#allocation5 + $0x78] sm:$0xff]   ;;  %6152 = vmatpush3.bf16.msra.mxu1 %v6623_v54  ;;  %v6626_v19 = vld [vmem:[#allocation5 + $0xe8] sm:$0xff]   ;;  %v9237_v27 = vld [vmem:[#allocation3 + $0xb1] sm:$0x1] }
0x23b7   : > { %v4348_v55 = vsel %vm3941_vm9, %v4347_v0, %v9135_v63  ;;  %v3943_v18 = vrot.slane %v3916_v28, 1  ;;  %v4349_v40 = vrot.slane %v4328_v45, 1  ;;  %v4214_v20 = vsel %vm3941_vm9, %v4213_v29, %v9143_v36  ;;  %v9233_v41 = vld [vmem:[#allocation3 + $0xeb] sm:$0x1]  ;;  %v9235_v63 = vld [vmem:[#allocation3 + $0xb5] sm:$0x1]  ;;  %6135 = vmatprep.subr.bf16.mxu0 %v6624_v33  ;;  %6153 = vmatprep.subr.bf16.mxu1 %v6626_v19 }
0x23b8   : > { %v4215_v13 = vrot.slane %v4194_v17, 1  ;;  %v4047_v53 = vsel %vm3944_vm10, %v4046_v57, %v4045_v62  ;;  %v4248_v24 = vsel %vm3944_vm10, %v4247_v42, %v4246_v38  ;;  %v4082_v56 = vsel %vm3944_vm10, %v4081_v15, %v4080_v51  ;;  %v6628_v34 = vld [vmem:[#allocation5 + $0x140] sm:$0xff]   ;;  %v6629_v36 = vld [vmem:[#allocation5 + $0xf0] sm:$0xff]   ;;  %6136 = vmatpush3.bf16.msra.mxu0 %v6625_v59  ;;  %v4864_v51 = vld [vmem:[#allocation3 + $0xfc] sm:$0x1] }
0x23b9   : > { %v4883_v61 = vrot.slane %v9199_v48, 2  ;;  %4048 = vrot.lane.b32.xlu0 %v4047_v53, %s7121_s20  ;;  %4249 = vrot.lane.b32.xlu1 %v4248_v24, %s7119_s23  ;;  %4084 = vst.msk [vmem:[#allocation4 + $0x8] sm:$0xff] %vm666_vm2, %v4082_v56  ;;  %v3945_v62 = vsel %vm3944_vm10, %v3943_v18, %v3942_v10  ;;  %v4350_v0 = vsel %vm3944_vm10, %v4349_v40, %v4348_v55  ;;  %v4596_v57 = vld [vmem:[#allocation3 + $0xf4] sm:$0x1]  ;;  %v4462_v29 = vld [vmem:[#allocation3 + $0xf0] sm:$0x1] }
0x23ba   : > { %v4216_v58 = vsel %vm3944_vm10, %v4215_v13, %v4214_v20  ;;  %v4749_v44 = vrot.slane %v9204_v32, 2  ;;  %v4449_v49 = vrot.slane %v9221_v46, 1  ;;  %v9249_v42 = vld [vmem:[#allocation3 + $0xd5] sm:$0x1]  ;;  %3947 = vst.msk [vmem:[#allocation4] sm:$0xff] %vm666_vm2, %v3945_v62  ;;  %4352 = vst.msk [vmem:[#allocation4 + $0x18] sm:$0xff] %vm666_vm2, %v4350_v0  ;;  %v4616_v48 = vsel %vm3941_vm9, %v4615_v8, %v9149_v47  ;;  %6154 = vmatpush3.bf16.msra.mxu1 %v6627_v35 }
0x23bb   : > { %4218 = vst.msk [vmem:[#allocation4 + $0x10] sm:$0xff] %vm666_vm2, %v4216_v58  ;;  %v4617_v12 = vrot.slane %v4596_v57, 1  ;;  %v4483_v38 = vrot.slane %v4462_v29, 1  ;;  %v4416_v32 = vsel %vm3944_vm10, %v4415_v50, %v4414_v21  ;;  %v4282_v46 = vsel %vm3944_vm10, %v4281_v22, %v4280_v52  ;;  %6165 = vmatprep.subr.bf16.mxu0 %v6628_v34  ;;  %v6631_v28 = vld [vmem:[#allocation5 + $0xb0] sm:$0xff]   ;;  %v4730_v5 = vld [vmem:[#allocation3 + $0xf8] sm:$0x1]  ;;  %6155 = vmatprep.subr.bf16.mxu1 %v6629_v36 }
0x23bc   : > { %v4315_v37 = vrot.slane %v9233_v41, 1  ;;  %v4482_v54 = vsel %vm3941_vm9, %v4481_v25, %v9155_v9  ;;  %v4493_v15 = vld [vmem:[#allocation3 + $0xd1] sm:$0x1]  ;;  %v9265_v47 = vld [vmem:[#allocation3 + $0x96] sm:$0x1]  ;;  %v6633_v21 = vld [vmem:[#allocation5 + $0xf8] sm:$0xff]   ;;  %v4884_v45 = vsel %vm3941_vm9, %v4883_v61, %v9170_v30  ;;  %v4750_v55 = vsel %vm3941_vm9, %v4749_v44, %v9186_v2 }
0x23bd   : > { %v4618_v8 = vsel %vm3944_vm10, %v4617_v12, %v4616_v48  ;;  %v4484_v50 = vsel %vm3944_vm10, %v4483_v38, %v4482_v54  ;;  %v4885_v52 = vrot.slane %v4864_v51, 1  ;;  %v4751_v22 = vrot.slane %v4730_v5, 1  ;;  %4417 = vrot.lane.b32.xlu0 %v4416_v32, %s7120_s17  ;;  %4283 = vrot.lane.b32.xlu1 %v4282_v46, %s7120_s17  ;;  %v4628_v1 = vld [vmem:[#allocation3 + $0xf5] sm:$0x1]  ;;  %v4494_v25 = vld [vmem:[#allocation3 + $0xf1] sm:$0x1] }
0x23be   : > { %v4645_v9 = vrot.slane %v9235_v63, 3  ;;  %v4511_v10 = vrot.slane %v9237_v27, 3  ;;  %4620 = vst.msk [vmem:[#allocation4 + $0x28] sm:$0xff] %vm666_vm2, %v4618_v8  ;;  %4486 = vst.msk [vmem:[#allocation4 + $0x20] sm:$0xff] %vm666_vm2, %v4484_v50  ;;  %v9639_v17 = vrot.slane %v8930_v11, 3  ;;  %v9640_v18 = vrot.slane %v8936_v3, 3  ;;  %6156 = vmatpush3.bf16.msra.mxu1 %v6631_v28 }
0x23bf   : > { %v4660_v20 = vld [vmem:[#allocation3 + $0xb6] sm:$0x1]  ;;  %v4525_v13 = vld [vmem:[#allocation3 + $0x92] sm:$0x1]  ;;  %v4886_v19 = vsel %vm3944_vm10, %v4885_v52, %v4884_v45  ;;  %v4752_v30 = vsel %vm3944_vm10, %v4751_v22, %v4750_v55  ;;  %v4513_v3 = vrot.slane %v4493_v15, 2  ;;  %v4649_v24 = vrot.slane %v4628_v1, 1  ;;  %6157 = vmatprep.subr.bf16.mxu1 %v6633_v21 }
0x23c0   : > { %v4446_v33 = vsel %vm3938_vm8, %v9639_v17, %v8934_v43  ;;  %v4312_v40 = vsel %vm3938_vm8, %v9640_v18, %v8940_v7  ;;  %v4526_v59 = vld [vmem:[#allocation3 + $0xb2] sm:$0x1]  ;;  %v4647_v43 = vrot.slane %v9249_v42, 2  ;;  %v4661_v35 = vld [vmem:[#allocation3 + $0xd6] sm:$0x1]  ;;  %v6635_v7 = vld [vmem:[#allocation5 + $0xb8] sm:$0xff]  }
0x23c1   : > { %v4448_v2 = vsel %vm3941_vm9, %v4447_v14, %v4446_v33  ;;  %v4314_v11 = vsel %vm3941_vm9, %v4313_v31, %v4312_v40  ;;  %4888 = vst.msk [vmem:[#allocation4 + $0x38] sm:$0xff] %vm666_vm2, %v4886_v19  ;;  %4754 = vst.msk [vmem:[#allocation4 + $0x30] sm:$0xff] %vm666_vm2, %v4752_v30  ;;  %v4515_v14 = vrot.slane %v4494_v25, 1  ;;  %v4527_v41 = vld [vmem:[#allocation3 + $0xd2] sm:$0x1]  ;;  %v6638_v6 = vld [vmem:[#allocation5 + $0x1c0] sm:$0xff]  }
0x23c2   : > { %v4450_v53 = vsel %vm3944_vm10, %v4449_v49, %v4448_v2  ;;  %v4316_v4 = vsel %vm3944_vm10, %v4315_v37, %v4314_v11  ;;  %v9641_v31 = vrot.slane %v8696_v60, 4  ;;  %v9642_v27 = vld [vmem:[#allocation22_spill] sm:$0xff]  ;;  %v9643_v56 = vrot.slane %v8708_v16, 4  ;;  %v4662_v36 = vld [vmem:[#allocation3 + $0xf6] sm:$0x1]  ;;  %6158 = vmatpush3.bf16.msra.mxu1 %v6635_v7 }
0x23c3   : > { %4451 = vrot.lane.b32.xlu0 %v4450_v53, %s7121_s20  ;;  %4317 = vrot.lane.b32.xlu1 %v4316_v4, %s7121_s20  ;;  %v4677_v61 = vrot.slane %v9265_v47, 4  ;;  %v4528_v62 = vld [vmem:[#allocation3 + $0xf2] sm:$0x1]  ;;  %v4543_v0 = vrot.slane %v4525_v13, 4  ;;  %v4679_v29 = vrot.slane %v4660_v20, 3  ;;  %v4545_v44 = vrot.slane %v4526_v59, 3 }
0x23c4   : > { %v4644_v63 = vsel %vm3935_vm7, %v9641_v31, %v8646_v39  ;;  %v4510_v34 = vsel %vm3935_vm7, %v9643_v56, %v9642_v27  ;;  %v4693_v49 = vld [vmem:[#allocation3 + $0x97] sm:$0x1]  ;;  %v4893_v60 = vld [vmem:[#allocation3 + $0x9d] sm:$0x1]  ;;  %v4681_v16 = vrot.slane %v4661_v35, 2  ;;  %v4547_v48 = vrot.slane %v4527_v41, 2  ;;  %6187 = vmatprep.subr.bf16.mxu1 %v6638_v6 }
0x23c5   : > { %v4646_v58 = vsel %vm3938_vm8, %v4645_v9, %v4644_v63  ;;  %v4512_v57 = vsel %vm3938_vm8, %v4511_v10, %v4510_v34  ;;  %v4694_v12 = vld [vmem:[#allocation3 + $0xb7] sm:$0x1]  ;;  %v4894_v38 = vld [vmem:[#allocation3 + $0xbd] sm:$0x1]  ;;  %v4683_v37 = vrot.slane %v4662_v36, 1  ;;  %v4549_v28 = vrot.slane %v4528_v62, 1 }
0x23c6   : > { %v4648_v39 = vsel %vm3941_vm9, %v4647_v43, %v4646_v58  ;;  %v4514_v42 = vsel %vm3941_vm9, %v4513_v3, %v4512_v57  ;;  %v4695_v54 = vld [vmem:[#allocation3 + $0xd7] sm:$0x1]  ;;  %v4895_v51 = vld [vmem:[#allocation3 + $0xdd] sm:$0x1]  ;;  %v4678_v5 = vsel %vm3935_vm7, %v4677_v61, %v8712_v23  ;;  %v4711_v50 = vrot.slane %v4693_v49, 4  ;;  %v9645_v43 = vld [vmem:[#allocation23_spill] sm:$0xff] }
0x23c7   : > { %v4650_v32 = vsel %vm3944_vm10, %v4649_v24, %v4648_v39  ;;  %v4516_v46 = vsel %vm3944_vm10, %v4515_v14, %v4514_v42  ;;  %v9644_v15 = vld [vmem:[#allocation24_spill] sm:$0xff]  ;;  %v4896_v21 = vld [vmem:[#allocation3 + $0xfd] sm:$0x1]  ;;  %v4911_v52 = vrot.slane %v4893_v60, 4  ;;  %v4680_v22 = vsel %vm3938_vm8, %v4679_v29, %v4678_v5  ;;  %v4759_v45 = vld [vmem:[#allocation3 + $0x99] sm:$0x1] }
0x23c8   : > { %4651 = vrot.lane.b32.xlu0 %v4650_v32, %s7119_s23  ;;  %4517 = vrot.lane.b32.xlu1 %v4516_v46, %s7119_s23  ;;  %v4544_v47 = vsel %vm3935_vm7, %v4543_v0, %v9644_v15  ;;  %v4696_v8 = vld [vmem:[#allocation3 + $0xf7] sm:$0x1]  ;;  %v4713_v9 = vrot.slane %v4694_v12, 3  ;;  %v4913_v25 = vrot.slane %v4894_v38, 3  ;;  %v4559_v10 = vld [vmem:[#allocation3 + $0x93] sm:$0x1]  ;;  %v4682_v55 = vsel %vm3941_vm9, %v4681_v16, %v4680_v22 }
0x23c9   : > { %v4546_v1 = vsel %vm3938_vm8, %v4545_v44, %v4544_v47  ;;  %v4715_v23 = vrot.slane %v4695_v54, 2  ;;  %v4915_v33 = vrot.slane %v4895_v51, 2  ;;  %v4560_v18 = vld [vmem:[#allocation3 + $0xb3] sm:$0x1]  ;;  %v4760_v40 = vld [vmem:[#allocation3 + $0xb9] sm:$0x1]  ;;  %v4684_v20 = vsel %vm3944_vm10, %v4683_v37, %v4682_v55 }
0x23ca   : > { %v4548_v17 = vsel %vm3941_vm9, %v4547_v48, %v4546_v1  ;;  %v4717_v59 = vrot.slane %v4696_v8, 1  ;;  %v4917_v19 = vrot.slane %v4896_v21, 1  ;;  %v4561_v30 = vld [vmem:[#allocation3 + $0xd3] sm:$0x1]  ;;  %v4761_v2 = vld [vmem:[#allocation3 + $0xd9] sm:$0x1]  ;;  %v4712_v11 = vsel %vm3935_vm7, %v4711_v50, %v8726_v26 }
0x23cb   : > { %v4550_v13 = vsel %vm3944_vm10, %v4549_v28, %v4548_v17  ;;  %v4912_v3 = vsel %vm3935_vm7, %v4911_v52, %v9645_v43  ;;  %v4562_v35 = vld [vmem:[#allocation3 + $0xf3] sm:$0x1]  ;;  %v4577_v7 = vrot.slane %v4559_v10, 4  ;;  %v4762_v53 = vld [vmem:[#allocation3 + $0xf9] sm:$0x1]  ;;  %v4777_v4 = vrot.slane %v4759_v45, 4 }
0x23cc   : > { %4685 = vrot.lane.b32.xlu0 %v4684_v20, %s7120_s17  ;;  %4551 = vrot.lane.b32.xlu1 %v4550_v13, %s7120_s17  ;;  %v4714_v24 = vsel %vm3938_vm8, %v4713_v9, %v4712_v11  ;;  %v4914_v14 = vsel %vm3938_vm8, %v4913_v25, %v4912_v3  ;;  %v4579_v41 = vrot.slane %v4560_v18, 3  ;;  %v4779_v6 = vrot.slane %v4760_v40, 3  ;;  %v4927_v31 = vld [vmem:[#allocation3 + $0x9e] sm:$0x1]  ;;  %v4793_v63 = vld [vmem:[#allocation3 + $0x9a] sm:$0x1] }
0x23cd   : > { %v4716_v27 = vsel %vm3941_vm9, %v4715_v23, %v4714_v24  ;;  %v4916_v56 = vsel %vm3941_vm9, %v4915_v33, %v4914_v14  ;;  %v4581_v26 = vrot.slane %v4561_v30, 2  ;;  %v4781_v34 = vrot.slane %v4761_v2, 2  ;;  %v4928_v36 = vld [vmem:[#allocation3 + $0xbe] sm:$0x1]  ;;  %v4794_v61 = vld [vmem:[#allocation3 + $0xba] sm:$0x1] }
0x23ce   : > { %v4718_v62 = vsel %vm3944_vm10, %v4717_v59, %v4716_v27  ;;  %v4918_v0 = vsel %vm3944_vm10, %v4917_v19, %v4916_v56  ;;  %v4583_v58 = vrot.slane %v4562_v35, 1  ;;  %v4783_v57 = vrot.slane %v4762_v53, 1  ;;  %v4929_v29 = vld [vmem:[#allocation3 + $0xde] sm:$0x1]  ;;  %v4795_v44 = vld [vmem:[#allocation3 + $0xda] sm:$0x1] }
0x23cf   : > { %v9646_v49 = vld [vmem:[#allocation26_spill] sm:$0xff]  ;;  %v9647_v39 = vld [vmem:[#allocation25_spill] sm:$0xff]  ;;  %v4945_v48 = vrot.slane %v4927_v31, 4  ;;  %v4811_v38 = vrot.slane %v4793_v63, 4  ;;  %v4947_v37 = vrot.slane %v4928_v36, 3  ;;  %v4813_v28 = vrot.slane %v4794_v61, 3 }
0x23d0   : > { %4719 = vrot.lane.b32.xlu0 %v4718_v62, %s7121_s20  ;;  %4919 = vrot.lane.b32.xlu1 %v4918_v0, %s7119_s23  ;;  %v4578_v60 = vsel %vm3935_vm7, %v4577_v7, %v9646_v49  ;;  %v4778_v42 = vsel %vm3935_vm7, %v4777_v4, %v9647_v39  ;;  %v4930_v16 = vld [vmem:[#allocation3 + $0xfe] sm:$0x1]  ;;  %v4796_v12 = vld [vmem:[#allocation3 + $0xfa] sm:$0x1]  ;;  %v4961_v54 = vld [vmem:[#allocation3 + $0x9f] sm:$0x1] }
0x23d1   : > { %v4580_v32 = vsel %vm3938_vm8, %v4579_v41, %v4578_v60  ;;  %v4780_v46 = vsel %vm3938_vm8, %v4779_v6, %v4778_v42  ;;  %v4827_v51 = vld [vmem:[#allocation3 + $0x9b] sm:$0x1]  ;;  %v4949_v47 = vrot.slane %v4929_v29, 2  ;;  %v4815_v8 = vrot.slane %v4795_v44, 2  ;;  %v4962_v50 = vld [vmem:[#allocation3 + $0xbf] sm:$0x1] }
0x23d2   : > { %v4582_v5 = vsel %vm3941_vm9, %v4581_v26, %v4580_v32  ;;  %v4782_v15 = vsel %vm3941_vm9, %v4781_v34, %v4780_v46  ;;  %v4828_v21 = vld [vmem:[#allocation3 + $0xbb] sm:$0x1]  ;;  %v4951_v1 = vrot.slane %v4930_v16, 1  ;;  %v4817_v9 = vrot.slane %v4796_v12, 1  ;;  %v4963_v25 = vld [vmem:[#allocation3 + $0xdf] sm:$0x1] }
0x23d3   : > { %v4584_v52 = vsel %vm3944_vm10, %v4583_v58, %v4582_v5  ;;  %v4784_v22 = vsel %vm3944_vm10, %v4783_v57, %v4782_v15  ;;  %v4829_v10 = vld [vmem:[#allocation3 + $0xdb] sm:$0x1]  ;;  %v9648_v45 = vld [vmem:[#allocation28_spill] sm:$0xff]  ;;  %v9649_v17 = vld [vmem:[#allocation27_spill] sm:$0xff]  ;;  %v4979_v18 = vrot.slane %v4961_v54, 4  ;;  %v4845_v20 = vrot.slane %v4827_v51, 4 }
0x23d4   : > { %4585 = vrot.lane.b32.xlu0 %v4584_v52, %s7121_s20  ;;  %4785 = vrot.lane.b32.xlu1 %v4784_v22, %s7119_s23  ;;  %v4946_v55 = vsel %vm3935_vm7, %v4945_v48, %v9648_v45  ;;  %v4812_v23 = vsel %vm3935_vm7, %v4811_v38, %v9649_v17  ;;  %v4964_v33 = vld [vmem:[#allocation3 + $0xff] sm:$0x1]  ;;  %v4830_v40 = vld [vmem:[#allocation3 + $0xfb] sm:$0x1]  ;;  %v4981_v19 = vrot.slane %v4962_v50, 3  ;;  %v4847_v30 = vrot.slane %v4828_v21, 3 }
0x23d5   : > { %v4948_v13 = vsel %vm3938_vm8, %v4947_v37, %v4946_v55  ;;  %v4814_v59 = vsel %vm3938_vm8, %v4813_v28, %v4812_v23  ;;  %v4983_v43 = vrot.slane %v4963_v25, 2  ;;  %v4849_v3 = vrot.slane %v4829_v10, 2  ;;  %v9650_v24 = vld [vmem:[#allocation29_spill] sm:$0xff]  ;;  %v9651_v41 = vld [vmem:[#allocation32_spill] sm:$0xff]  ;;  %v6630_v38 = vld [vmem:[#allocation5 + $0x100] sm:$0xff]  }
0x23d6   : > { %v4950_v2 = vsel %vm3941_vm9, %v4949_v47, %v4948_v13  ;;  %v4816_v11 = vsel %vm3941_vm9, %v4815_v8, %v4814_v59  ;;  %v4985_v53 = vrot.slane %v4964_v33, 1  ;;  %v4851_v4 = vrot.slane %v4830_v40, 1  ;;  %v6632_v46 = vld [vmem:[#allocation5 + $0x148] sm:$0xff]   ;;  %v6636_v51 = vld [vmem:[#allocation5 + $0x150] sm:$0xff]   ;;  %v6639_v22 = vld [vmem:[#allocation5 + $0x180] sm:$0xff]  }
0x23d7   : > { %v4952_v35 = vsel %vm3944_vm10, %v4951_v1, %v4950_v2  ;;  %v4818_v7 = vsel %vm3944_vm10, %v4817_v9, %v4816_v11  ;;  %v4980_v14 = vsel %vm3935_vm7, %v4979_v18, %v9650_v24  ;;  %v4846_v6 = vsel %vm3935_vm7, %v4845_v20, %v9651_v41  ;;  %v6634_v54 = vld [vmem:[#allocation5 + $0x108] sm:$0xff]   ;;  %v6637_v8 = vld [vmem:[#allocation5 + $0x110] sm:$0xff]   ;;  %v6640_v1 = vld [vmem:[#allocation5 + $0x158] sm:$0xff]  }
0x23d8   : > { %4953 = vrot.lane.b32.xlu0 %v4952_v35, %s7120_s17  ;;  %4819 = vrot.lane.b32.xlu1 %v4818_v7, %s7120_s17  ;;  %v4982_v31 = vsel %vm3938_vm8, %v4981_v19, %v4980_v14  ;;  %v4848_v63 = vsel %vm3938_vm8, %v4847_v30, %v4846_v6  ;;  %v6642_v9 = vld [vmem:[#allocation5 + $0x1c8] sm:$0xff]   ;;  %v6641_v45 = vld [vmem:[#allocation5 + $0x118] sm:$0xff]   ;;  %v6644_v17 = vld [vmem:[#allocation5 + $0x160] sm:$0xff]   ;;  %s9411_s17 = scalar_lea.hbm %s9468_s15, %s5961_s18 }
0x23d9   : > { %v4984_v27 = vsel %vm3941_vm9, %v4983_v43, %v4982_v31  ;;  %v4850_v56 = vsel %vm3941_vm9, %v4849_v3, %v4848_v63  ;;  %v6643_v55 = vld [vmem:[#allocation5 + $0x188] sm:$0xff]   ;;  %v6646_v23 = vld [vmem:[#allocation5 + $0x1d0] sm:$0xff]   ;;  %v6645_v40 = vld [vmem:[#allocation5 + $0x120] sm:$0xff]  }
0x23da   : > { %v4986_v26 = vsel %vm3944_vm10, %v4985_v53, %v4984_v27  ;;  %v4852_v34 = vsel %vm3944_vm10, %v4851_v4, %v4850_v56  ;;  %v6647_v20 = vld [vmem:[#allocation5 + $0x190] sm:$0xff]   ;;  %v6648_v13 = vld [vmem:[#allocation5 + $0x168] sm:$0xff]   ;;  %v6650_v59 = vld [vmem:[#allocation5 + $0x1d8] sm:$0xff]  }
0x23db   : > { %v6649_v2 = vld [vmem:[#allocation5 + $0x128] sm:$0xff]   ;;  %v6651_v3 = vld [vmem:[#allocation5 + $0x198] sm:$0xff]   ;;  %v6652_v35 = vld [vmem:[#allocation5 + $0x170] sm:$0xff]  }
0x23dc   : > { %4987 = vrot.lane.b32.xlu0 %v4986_v26, %s7121_s20  ;;  %4853 = vrot.lane.b32.xlu1 %v4852_v34, %s7121_s20  ;;  %v6654_v7 = vld [vmem:[#allocation5 + $0x1e0] sm:$0xff]   ;;  %v6653_v24 = vld [vmem:[#allocation5 + $0x130] sm:$0xff]   ;;  %v6656_v41 = vld [vmem:[#allocation5 + $0x178] sm:$0xff]   ;;  %s5699_s20 = scalar_lea.sflag [#allocation7], %s501_s25 }
0x23dd   : > { %v6655_v14 = vld [vmem:[#allocation5 + $0x1a0] sm:$0xff]   ;;  %v6658_v6 = vld [vmem:[#allocation5 + $0x1e8] sm:$0xff]   ;;  %v6657_v31 = vld [vmem:[#allocation5 + $0x138] sm:$0xff]  }
0x23de   : > { %v6659_v63 = vld [vmem:[#allocation5 + $0x1a8] sm:$0xff]   ;;  %v6660_v56 = vld [vmem:[#allocation5 + $0x1f0] sm:$0xff]  }
0x241d   : > { %v4116_v36 = vpop.permute.xlu0 %4115  ;;  %v3979_v61 = vpop.permute.xlu1 %3978 }
0x241e   : > { %4118 = vst.msk [vmem:[#allocation4 + $0x8] sm:$0xff] %vm3981_vm11, %v4116_v36  ;;  %3982 = vst.msk [vmem:[#allocation4] sm:$0xff] %vm3981_vm11, %v3979_v61  ;;  %v6661_v61 = vld [vmem:[#allocation5 + $0x1b0] sm:$0xff]  }
0x2423   : > { %v4150_v62 = vpop.permute.xlu0 %4149  ;;  %v4014_v0 = vpop.permute.xlu1 %4013 }
0x2424   : > { %4152 = vst.msk [vmem:[#allocation4 + $0x8] sm:$0xff] %vm4016_vm12, %v4150_v62  ;;  %4017 = vst.msk [vmem:[#allocation4] sm:$0xff] %vm4016_vm12, %v4014_v0  ;;  %v6662_v62 = vld [vmem:[#allocation5 + $0x1f8] sm:$0xff]  }
0x2425   : > { %v6663_v0 = vld [vmem:[#allocation5 + $0x1b8] sm:$0xff]  }
0x2427   : > { %v4184_v58 = vpop.permute.xlu0 %4183  ;;  %v4384_v57 = vpop.permute.xlu1 %4383 }
0x2428   : > { %4186 = vst.msk [vmem:[#allocation4 + $0x8] sm:$0xff] %vm4051_vm13, %v4184_v58 }
0x2429   : > { %4386 = vst.msk [vmem:[#allocation4 + $0x18] sm:$0xff] %vm3981_vm11, %v4384_v57 }
0x242b   : > { %v4049_v29 = vpop.permute.xlu0 %4048  ;;  %v4250_v44 = vpop.permute.xlu1 %4249 }
0x242c   : > { %4052 = vst.msk [vmem:[#allocation4] sm:$0xff] %vm4051_vm13, %v4049_v29 }
0x242d   : > { %4252 = vst.msk [vmem:[#allocation4 + $0x10] sm:$0xff] %vm3981_vm11, %v4250_v44 }
0x242f   : > { %v4418_v49 = vpop.permute.xlu0 %4417  ;;  %v4284_v60 = vpop.permute.xlu1 %4283  ;;  %v4992_v39 = vld [vmem:[#allocation4 + $0x8] sm:$0xff] }
0x2430   : > { %4420 = vst.msk [vmem:[#allocation4 + $0x18] sm:$0xff] %vm4016_vm12, %v4418_v49  ;;  %4286 = vst.msk [vmem:[#allocation4 + $0x10] sm:$0xff] %vm4016_vm12, %v4284_v60  ;;  %v5000_v42 = vpack.c.bf16 %v4992_v39, %v4992_v39 }
0x2432   : > { %5558 = vmatprep.mubr.bf16.mxu0 %v5000_v42  ;;  %v5895_v42 = vld [vmem:[%s9467_s14] ss:$0 sm:$0xff] }
0x2433   : > { %v4991_v12 = vld [vmem:[#allocation4] sm:$0xff] }
0x2434   : > { %v4999_v32 = vpack.c.bf16 %v4991_v12, %v4991_v12 }
0x2435   : > { %v4452_v16 = vpop.permute.xlu0 %4451  ;;  %v4318_v48 = vpop.permute.xlu1 %4317 }
0x2436   : > { %4454 = vst.msk [vmem:[#allocation4 + $0x18] sm:$0xff] %vm4051_vm13, %v4452_v16  ;;  %4320 = vst.msk [vmem:[#allocation4 + $0x10] sm:$0xff] %vm4051_vm13, %v4318_v48  ;;  %5559 = vmatmul.mubr.bf16.vlgmr.msra.gmra.mrb[84].mxu0 %v4999_v32 }
0x2437   : > { %6166 = vmatpush3.bf16.msra.mxu0 %v6630_v38 }
0x2438   : > { %6167 = vmatprep.subr.bf16.mxu0 %v6632_v46 }
0x243a   : > { %v4652_v37 = vpop.permute.xlu0 %4651  ;;  %v4518_v28 = vpop.permute.xlu1 %4517 }
0x243b   : > { %4654 = vst.msk [vmem:[#allocation4 + $0x28] sm:$0xff] %vm3981_vm11, %v4652_v37  ;;  %4520 = vst.msk [vmem:[#allocation4 + $0x20] sm:$0xff] %vm3981_vm11, %v4518_v28  ;;  %6168 = vmatpush3.bf16.msra.mxu0 %v6634_v54 }
0x243c   : > { %6169 = vmatprep.subr.bf16.mxu0 %v6636_v51 }
0x243d   : > { %v4994_v47 = vld [vmem:[#allocation4 + $0x18] sm:$0xff]  ;;  %v4993_v50 = vld [vmem:[#allocation4 + $0x10] sm:$0xff] }
0x243e   : > { %v4686_v5 = vpop.permute.xlu0 %4685  ;;  %v4552_v15 = vpop.permute.xlu1 %4551  ;;  %v5002_v21 = vpack.c.bf16 %v4994_v47, %v4994_v47  ;;  %v5001_v52 = vpack.c.bf16 %v4993_v50, %v4993_v50 }
0x243f   : > { %4688 = vst.msk [vmem:[#allocation4 + $0x28] sm:$0xff] %vm4016_vm12, %v4686_v5  ;;  %4554 = vst.msk [vmem:[#allocation4 + $0x20] sm:$0xff] %vm4016_vm12, %v4552_v15  ;;  %6170 = vmatpush3.bf16.msra.mxu0 %v6637_v8 }
0x2440   : > { %5598 = vmatprep.mubr.bf16.mxu1 %v5002_v21  ;;  %6171 = vmatprep.subr.bf16.mxu0 %v6640_v1 }
0x2441   : > { %5599 = vmatmul.mubr.bf16.vlgmr.msra.gmra.mrb[84].mxu1 %v5001_v52 }
0x2442   : > { %v4720_v25 = vpop.permute.xlu0 %4719  ;;  %v4920_v10 = vpop.permute.xlu1 %4919  ;;  %6188 = vmatpush3.bf16.msra.mxu1 %v6639_v22 }
0x2443   : > { %4722 = vst.msk [vmem:[#allocation4 + $0x28] sm:$0xff] %vm4051_vm13, %v4720_v25  ;;  %6189 = vmatprep.subr.bf16.mxu1 %v6642_v9  ;;  %6172 = vmatpush3.bf16.msra.mxu0 %v6641_v45 }
0x2444   : > { %4922 = vst.msk [vmem:[#allocation4 + $0x38] sm:$0xff] %vm3981_vm11, %v4920_v10  ;;  %6173 = vmatprep.subr.bf16.mxu0 %v6644_v17 }
0x2446   : > { %v4586_v33 = vpop.permute.xlu0 %4585  ;;  %v4786_v18 = vpop.permute.xlu1 %4785  ;;  %6190 = vmatpush3.bf16.msra.mxu1 %v6643_v55 }
0x2447   : > { %4588 = vst.msk [vmem:[#allocation4 + $0x20] sm:$0xff] %vm4051_vm13, %v4586_v33  ;;  %6191 = vmatprep.subr.bf16.mxu1 %v6646_v23  ;;  %6174 = vmatpush3.bf16.msra.mxu0 %v6645_v40 }
0x2448   : > { %4788 = vst.msk [vmem:[#allocation4 + $0x30] sm:$0xff] %vm3981_vm11, %v4786_v18  ;;  %6175 = vmatprep.subr.bf16.mxu0 %v6648_v13 }
0x244a   : > { %v4954_v19 = vpop.permute.xlu0 %4953  ;;  %v4820_v30 = vpop.permute.xlu1 %4819  ;;  %v4996_v11 = vld [vmem:[#allocation4 + $0x28] sm:$0xff]  ;;  %6192 = vmatpush3.bf16.msra.mxu1 %v6647_v20 }
0x244b   : > { %4956 = vst.msk [vmem:[#allocation4 + $0x38] sm:$0xff] %vm4016_vm12, %v4954_v19  ;;  %4822 = vst.msk [vmem:[#allocation4 + $0x30] sm:$0xff] %vm4016_vm12, %v4820_v30  ;;  %v5004_v43 = vpack.c.bf16 %v4996_v11, %v4996_v11  ;;  %6193 = vmatprep.subr.bf16.mxu1 %v6650_v59  ;;  %6176 = vmatpush3.bf16.msra.mxu0 %v6649_v2 }
0x244c   : > { %6177 = vmatprep.subr.bf16.mxu0 %v6652_v35 }
0x244d   : > { %5638 = vmatprep.mubr.bf16.mxu0 %v5004_v43 }
0x244e   : > { %v4988_v53 = vpop.permute.xlu0 %4987  ;;  %v4854_v4 = vpop.permute.xlu1 %4853  ;;  %6194 = vmatpush3.bf16.msra.mxu1 %v6651_v3  ;;  %v4995_v27 = vld [vmem:[#allocation4 + $0x20] sm:$0xff] }
0x244f   : > { %4990 = vst.msk [vmem:[#allocation4 + $0x38] sm:$0xff] %vm4051_vm13, %v4988_v53  ;;  %4856 = vst.msk [vmem:[#allocation4 + $0x30] sm:$0xff] %vm4051_vm13, %v4854_v4  ;;  %6195 = vmatprep.subr.bf16.mxu1 %v6654_v7  ;;  %6178 = vmatpush3.bf16.msra.mxu0 %v6653_v24  ;;  %v5003_v34 = vpack.c.bf16 %v4995_v27, %v4995_v27 }
0x2450   : > { %6179 = vmatprep.subr.bf16.mxu0 %v6656_v41 }
0x2452   : > { %6196 = vmatpush3.bf16.msra.mxu1 %v6655_v14 }
0x2453   : > { %6197 = vmatprep.subr.bf16.mxu1 %v6658_v6  ;;  %6180 = vmatpush3.bf16.msra.mxu0 %v6657_v31 }
0x2456   : > { %v4998_v26 = vld [vmem:[#allocation4 + $0x38] sm:$0xff]  ;;  %6198 = vmatpush3.bf16.msra.mxu1 %v6659_v63  ;;  %5639 = vmatmul.mubr.bf16.vlgmr.msra.gmra.mrb[88].mxu0 %v5003_v34  ;;  %v4997_v58 = vld [vmem:[#allocation4 + $0x30] sm:$0xff] }
0x2457   : > { %v5006_v36 = vpack.c.bf16 %v4998_v26, %v4998_v26  ;;  %6199 = vmatprep.subr.bf16.mxu1 %v6660_v56  ;;  %v5005_v57 = vpack.c.bf16 %v4997_v58, %v4997_v58 }
0x2459   : > { %5678 = vmatprep.mubr.bf16.mxu1 %v5006_v36 }
0x245a   : > { %6200 = vmatpush3.bf16.msra.mxu1 %v6661_v61 }
0x245b   : > { %6201 = vmatprep.subr.bf16.mxu1 %v6662_v62 }
0x245e   : > { %6202 = vmatpush3.bf16.msra.mxu1 %v6663_v0 }
0x2461   : > { %5679 = vmatmul.mubr.bf16.vlgmr.msra.gmra.mrb[88].mxu1 %v5005_v57 }
0x2509   : > { %v6137_v29 = vpop.f32.mrb[84].mxu0 }
0x250a   : > { %v6138_v44 = vpop.f32.mrb[85].mxu0 }
0x250b   : > { %v6139_v49 = vadd.f32 %v6138_v44, %v6137_v29  ;;  %v6140_v60 = vpop.f32.mrb[86].mxu0 }
0x250c   : > { %v6141_v39 = vpop.f32.mrb[87].mxu0 }
0x250d   : > { %v5561_v12 = vadd.f32 %v6139_v49, %v5895_v42 }
0x2514   : > { %v6159_v16 = vpop.f32.mrb[84].mxu1 }
0x2515   : > { %v6160_v48 = vpop.f32.mrb[85].mxu1 }
0x2516   : > { %v6161_v38 = vadd.f32 %v6160_v48, %v6159_v16  ;;  %v6162_v32 = vpop.f32.mrb[86].mxu1 }
0x2517   : > { %v6163_v46 = vpop.f32.mrb[87].mxu1 }
0x2518   : > { %v5601_v37 = vadd.f32 %v6161_v38, %v5561_v12 }
0x2529   : > { %v6181_v28 = vpop.f32.mrb[88].mxu0 }
0x252a   : > { %v6182_v54 = vpop.f32.mrb[89].mxu0 }
0x252b   : > { %v6183_v51 = vadd.f32 %v6182_v54, %v6181_v28  ;;  %v6184_v5 = vpop.f32.mrb[90].mxu0 }
0x252c   : > { %v6185_v15 = vpop.f32.mrb[91].mxu0 }
0x252d   : > { %v5641_v47 = vadd.f32 %v6183_v51, %v5601_v37 }
0x2534   : > { %v6203_v8 = vpop.f32.mrb[88].mxu1 }
0x2535   : > { %v6204_v50 = vpop.f32.mrb[89].mxu1 }
0x2536   : > { %v6205_v21 = vadd.f32 %v6204_v50, %v6203_v8  ;;  %v6206_v52 = vpop.f32.mrb[90].mxu1 }
0x2537   : > { %v6207_v22 = vpop.f32.mrb[91].mxu1 }
0x2538   : > { %v5681_v1 = vadd.f32 %v6205_v21, %v5641_v47 }
0x253a   : > { %5686 = vmax.xlane.f32.xlu0 %v5681_v1 }
0x25c7   : > { %v5687_v9 = vpop.xlane.xlu0 %5686 }
0x25c8   : > { %v5688_v25 = vsub.f32 %v5681_v1, %v5687_v9 }
0x25ca   : > { %v5689_v10 = vmul.f32 1.442695, %v5688_v25 }
0x25cc   : > { %7000 = vpow2.f32 %v5689_v10 }
0x25d6   : > { %v7001_v45 = vpop.eup %7000 }
0x25d7   : > { %5691 = vadd.xlane.f32.xlu1 %v7001_v45 }
0x2664   : > { %v5692_v55 = vpop.xlane.xlu1 %5691 }
0x2665   : > { %7002 = vlog2.f32 %v5692_v55 }
0x266f   : > { %v7003_v17 = vpop.eup %7002 }
0x2670   : > { %v5694_v23 = vmul.f32 0.6931472, %v7003_v17 }
0x2672   : > { %v5695_v33 = vadd.f32 %v5694_v23, %v5687_v9 }
0x2674   : > { %v5696_v18 = vsub.f32 %v5681_v1, %v5695_v33 }
0x2676   : > { %5697 = vst [vmem:[%s503_s27] sm:$0xff] %v5696_v18 }
0x2677   : > { %7061 = shalt.err (!%p7058_p7)
}
0x2678   : > { %s7062_s25 = scalar_lea.hbm %s9411_s17, 128  ;;  %s7066_s29 = scalar_lea.hbm %s9468_s15, 256 }
0x2679   : > { %p7063_p8 = scmp.ne.s32.totalorder %s9411_s17, %s7062_s25  ;;  %p7067_p1 = scmp.lt.u32.totalorder %s9411_s17, %s9468_s15 }
0x267a   : > { %p7068_p0 = scmp.lt.u32.totalorder %s7066_s29, %s7062_s25  ;;  %p7070_p6 = scmp.lt.u32.totalorder %s7062_s25, %s9411_s17 }
0x267b   : > { %p7064_p11 = pnand %p7063_p8, %p9652_p9 }
0x267c   : > { %p7069_p5 = por %p7068_p0, %p7067_p1 }
0x267d   : > { %p7065_p13 = pneg %p7064_p11 }
0x267e   : > { %p7071_p10 = por %p7070_p6, %p7069_p5 }
0x2680   : > { %p7072_p12 = pnand %p7071_p10, %p7065_p13 }
0x2682   : > { %7075 = shalt.err (!%p7072_p12)
}
0x2683   : > { %6535 = dma.vmem_to_hbm [thread:$0]  (%p9652_p9), %s9413_s16, 128, %s9411_s17, %s5699_s20  }
0x2684 PF: > { %s9653_s30 = sld [smem:[#allocation11_spill]]  ;;  %s9654_s24 = sld [smem:[#allocation15_spill]] }
0x2685   : > { %p6547_p2 = scmp.ge.s32.totalorder %s7114_s21, 2 }
0x268a   : > { %s5724_s26 = sand.u32 1, %s9653_s30   ;;  %p9655_p3 = scmp.ne.s32.totalorder %s9654_s24, 0 }
0x268b   : > { %s5725_s18 = scalar_lea.sflag [#allocation7], %s5724_s26 }
0x268c   : > { %p6542_p4 = pnand %p6547_p2, %p9655_p3 }
0x268e   : > { %7097 = dma.done.wait (!%p6542_p4), %s5725_s18, 128  }
0x268f   : > { %7099 = vsyncadd (!%p6542_p4), %s5725_s18, 4294967168  ;;  %s9656_s21 = sld [smem:[#allocation13_spill]]  ;;  %s9657_s25 = sld [smem:[#allocation12_spill]] }
0x2690   : > { %s9658_s20 = sld [smem:[#allocation14_spill]]  ;;  %s9659_s18 = smov %s7106_s19 }
0x2695   : > { %p26_p7 = scmp.ge.s32.totalorder %s9656_s21, 4   ;;  %s9660_s19 = smov %s9657_s25 }
0x2697   :  { %28 = sbr.rel (!%p26_p7) target bundleno = 4 (0x4), region = 127 }
0x269e   :  { %5730 = vsyncpa [#allocation6], 1 }
0x269f   :  { %5732 = vsyncpa [#allocation6 + $0x1], 1 }
0x26a0   :  { %5733 = vsyncpa [#allocation7], 1 }
0x26a1   :  { %5735 = vsyncpa [#allocation7 + $0x1], 1 }

</bundles_post_ra>
